<compile_context>
chip_gen: v7x
topology: tpu7x:2x2x1
jax: 0.10.0
libtpu: 0.0.40
codegen_flags: <defaults>
</compile_context>

<pallas_src>
import functools

import jax
import jax.numpy as jnp
from jax.experimental import pallas as pl
from jax.experimental.pallas import tpu as pltpu


_LANES = 128


# ------------------------------ Pallas kernels ------------------------------

def _matmul_bias_kernel(x_ref, w_ref, b_ref, o_ref, *, relu, out_dtype):
    # o = x @ w + b (optional ReLU) — bf16 MXU inputs, f32 accumulate/epilogue.
    acc = jnp.dot(x_ref[...], w_ref[...], preferred_element_type=jnp.float32)
    acc = acc + b_ref[...]
    if relu:
        acc = jnp.maximum(acc, 0.0)
    o_ref[...] = acc.astype(out_dtype)


def _dual_matmul_bias_kernel(x1_ref, w1_ref, x2_ref, w2_ref, b_ref, o_ref, *,
                             out_dtype):
    # o = x1 @ w1 + x2 @ w2 + b  — fused conv_b + 1x1-skip + residual add.
    acc = jnp.dot(x1_ref[...], w1_ref[...], preferred_element_type=jnp.float32)
    acc = acc + jnp.dot(x2_ref[...], w2_ref[...], preferred_element_type=jnp.float32)
    acc = acc + b_ref[...]
    o_ref[...] = acc.astype(out_dtype)


# ----------------------------- grid / tm selection --------------------------

@functools.lru_cache(maxsize=None)
def _tensorcores_per_chip():
    try:
        kind = jax.devices()[0].device_kind.lower()
    except Exception:
        return 1
    return 2 if ("v7" in kind or "tpu7" in kind) else 1


def _pick_tm(M):
    # v5e/v6e (1 TC): single grid block — grid steps are a serial loop.
    # v7x (2 TCs): exactly 2 row blocks, only when M is large enough to
    # amortize the split (conv1: M=512 -> tm=256). Tiny-M calls stay single.
    if _tensorcores_per_chip() >= 2 and M >= 256 and M % 2 == 0 and (M // 2) % 8 == 0:
        return M // 2
    return M


# ------------------------------ call wrappers --------------------------------

def matmul_bias(cols, pw, *, relu, out_dtype):
    """out[M, O_pad] = cols[M, K_pad] @ w[K_pad, O_pad] + b, optional ReLU."""
    M, K_pad = cols.shape
    O_pad = pw["w"].shape[1]
    tm = _pick_tm(M)
    grid = (M // tm,)
    sem = ("parallel",) if grid[0] > 1 else ("arbitrary",)
    return pl.pallas_call(
        functools.partial(_matmul_bias_kernel, relu=relu, out_dtype=out_dtype),
        out_shape=jax.ShapeDtypeStruct((M, O_pad), out_dtype),
        grid=grid,
        in_specs=[
            pl.BlockSpec((tm, K_pad), lambda i: (i, 0)),
            pl.BlockSpec((K_pad, O_pad), lambda i: (0, 0)),
            pl.BlockSpec((1, O_pad), lambda i: (0, 0)),
        ],
        out_specs=pl.BlockSpec((tm, O_pad), lambda i: (i, 0)),
        compiler_params=pltpu.CompilerParams(dimension_semantics=sem),
    )(cols, pw["w"], pw["b"])


def dual_matmul_bias(cols1, pw1, cols2, pw2, *, out_dtype):
    """out = cols1 @ w1 + cols2 @ w2 + b1 (residual-block tail, M is tiny)."""
    M, K1 = cols1.shape
    K2 = cols2.shape[1]
    O_pad = pw1["w"].shape[1]
    return pl.pallas_call(
        functools.partial(_dual_matmul_bias_kernel, out_dtype=out_dtype),
        out_shape=jax.ShapeDtypeStruct((M, O_pad), out_dtype),
        grid=(1,),
        in_specs=[
            pl.BlockSpec((M, K1), lambda i: (0, 0)),
            pl.BlockSpec((K1, O_pad), lambda i: (0, 0)),
            pl.BlockSpec((M, K2), lambda i: (0, 0)),
            pl.BlockSpec((K2, O_pad), lambda i: (0, 0)),
            pl.BlockSpec((1, O_pad), lambda i: (0, 0)),
        ],
        out_specs=pl.BlockSpec((M, O_pad), lambda i: (0, 0)),
        compiler_params=pltpu.CompilerParams(dimension_semantics=("arbitrary",)),
    )(cols1, pw1["w"], cols2, pw2["w"], pw1["b"])


# ------------------------------ layer helpers --------------------------------

def _round_up(n, m):
    return ((n + m - 1) // m) * m


def _bn_scale_shift(gamma, beta, mean, var, eps=1e-5):
    scale = gamma * jax.lax.rsqrt(var + eps)
    return scale, beta - mean * scale


def _im2col(x, kh, kw, stride, pad):
    """x: [N, H, W, C] NHWC -> patches [N*OH*OW, kh*kw*C] (row order (i, j, c))."""
    N, H, W, C = x.shape
    xp = jnp.pad(x, ((0, 0), (pad, pad), (pad, pad), (0, 0)))
    OH = (H + 2 * pad - kh) // stride + 1
    OW = (W + 2 * pad - kw) // stride + 1
    cols = []
    for i in range(kh):
        for j in range(kw):
            cols.append(xp[:, i:i + stride * OH:stride, j:j + stride * OW:stride, :])
    patches = jnp.concatenate(cols, axis=-1)                 # [N, OH, OW, kh*kw*C]
    return patches.reshape(N * OH * OW, kh * kw * C), (N, OH, OW)


def _pad_k(cols, k_pad):
    k = cols.shape[1]
    if k == k_pad:
        return cols
    return jnp.pad(cols, ((0, 0), (0, k_pad - k)))


def bn_relu(x, scale_shift):
    """Inference BatchNorm2d + ReLU on NHWC, bf16, plain jnp (XLA-fused glue)."""
    scale, shift = scale_shift
    return jnp.maximum(x * scale + shift, 0.0).astype(x.dtype)


def conv2d(x, pw, *, stride=1, relu=False, out_dtype=jnp.bfloat16):
    """Conv2d via im2col + prepped-weight Pallas matmul (BN already folded)."""
    kh, kw = pw["kh"], pw["kw"]
    pad = kh // 2                                            # 'same' for odd k
    cols, (N, OH, OW) = _im2col(x, kh, kw, stride, pad)
    cols = _pad_k(cols, pw["K_pad"])
    out = matmul_bias(cols, pw, relu=relu, out_dtype=out_dtype)
    return out[:, :pw["O"]].reshape(N, OH, OW, pw["O"])


def residual_block(x, bp, *, out_dtype=jnp.bfloat16):
    stride = 2
    # BN1 + ReLU cannot be folded (the skip path taps x BEFORE bn1) -> jnp.
    h = bn_relu(x, bp["bn1"])
    # conv_a: bn2 folded into weights/bias at prep time, ReLU fused in epilogue.
    u = conv2d(h, bp["conv_a"], stride=stride, relu=True)
    # conv_b ('same') + strided 1x1 skip conv + residual add: ONE dual matmul,
    # no HBM concat of the two col buffers.
    pwb, pws = bp["conv_b"], bp["skip"]
    cols_u, (N, OH, OW) = _im2col(u, pwb["kh"], pwb["kw"], 1, pwb["kh"] // 2)
    cols_u = _pad_k(cols_u, pwb["K_pad"])
    skip = x[:, ::stride, ::stride, :].reshape(N * OH * OW, x.shape[-1])
    skip = _pad_k(skip, pws["K_pad"])
    out = dual_matmul_bias(cols_u, pwb, skip, pws, out_dtype=out_dtype)
    return out[:, :pwb["O"]].reshape(N, OH, OW, pwb["O"])


def forward(x_nchw, prep):
    """ResidualModel.forward — input NCHW (PyTorch), output [N, n_classes] f32."""
    x = jnp.transpose(x_nchw, (0, 2, 3, 1)).astype(jnp.bfloat16)   # NCHW -> NHWC
    # init_conv: BN -> ReLU -> Conv(C,16,5,'same') -> MaxPool(2) -> ReLU.
    # ReLU commutes with MaxPool, so it is fused into the conv epilogue and the
    # pool is a plain jnp reshape-max.
    h = bn_relu(x, prep["bn0"])
    c = conv2d(h, prep["conv1"], stride=1, relu=True)
    N, H, W, C = c.shape
    x = c.reshape(N, H // 2, 2, W // 2, 2, C).max(axis=(2, 4))
    # residual blocks (all downsample=True, channel doubling)
    x = residual_block(x, prep["block1"])
    x = residual_block(x, prep["block2"])
    x = residual_block(x, prep["block3"], out_dtype=jnp.float32)
    # AdaptiveAvgPool2d((1,1)) + Flatten + Linear(128, n_classes): 2x128x10 —
    # kept in jnp per the perf review (a pallas_call here is pure launch cost).
    feat = jnp.mean(x.astype(jnp.float32), axis=(1, 2))            # [N, 128]
    fcw, fcb = prep["fc"]
    return feat @ fcw + fcb


# --------------------------- one-time weight prep ----------------------------

def _prep_conv(w_oihw, bias, out_bn=None):
    """OIHW conv weight -> padded bf16 [K_pad, O_pad] matrix + padded f32 bias.

    `out_bn`: (gamma, beta, mean, var) of an inference BatchNorm that directly
    follows this conv — folded into the weights/bias here, once.
    """
    O, I, kh, kw = w_oihw.shape
    w = jnp.transpose(w_oihw, (2, 3, 1, 0)).reshape(kh * kw * I, O).astype(jnp.float32)
    b = bias.astype(jnp.float32)
    if out_bn is not None:
        scale, shift = _bn_scale_shift(*out_bn)
        w = w * scale[None, :]
        b = b * scale + shift
    K = kh * kw * I
    K_pad = _round_up(K, _LANES)
    O_pad = _round_up(max(O, _LANES), _LANES)
    w_p = jnp.pad(w, ((0, K_pad - K), (0, O_pad - O))).astype(jnp.bfloat16)
    b_p = jnp.pad(b, (0, O_pad - O)).reshape(1, O_pad)
    return {"w": w_p, "b": b_p, "kh": kh, "kw": kw,
            "K": K, "K_pad": K_pad, "O": O, "O_pad": O_pad}


def prepare_params(params):
    """Hoist all weight preprocessing out of the per-forward path."""
    def bn_bf16(bn):
        s, t = _bn_scale_shift(*bn)
        return s.astype(jnp.bfloat16), t.astype(jnp.bfloat16)

    prep = {
        "bn0": bn_bf16(params["bn0"]),
        "conv1": _prep_conv(*params["conv1"]),
        "fc": (params["fc"][0].astype(jnp.float32),
               params["fc"][1].astype(jnp.float32)),
    }
    for name in ("block1", "block2", "block3"):
        p = params[name]
        prep[name] = {
            "bn1": bn_bf16(p["bn1"]),
            # conv_a with its following BN folded in.
            "conv_a": _prep_conv(p["w1"], p["b1"], out_bn=p["bn2"]),
            # conv_b carries the combined bias (b2 + res_b); skip is weight-only.
            "conv_b": _prep_conv(p["w2"], p["b2"] + p["res_b"]),
            "skip": _prep_conv(p["res_w"], jnp.zeros_like(p["res_b"])),
        }
    return prep


# --------------------------- deterministic params ---------------------------

def _conv_params(key, cin, cout, k):
    kw, kb = jax.random.split(key)
    fan_in = cin * k * k
    w = jax.random.normal(kw, (cout, cin, k, k), jnp.float32) / (fan_in ** 0.5)
    b = 0.01 * jax.random.normal(kb, (cout,), jnp.float32)
    return w, b


def _bn_params(key, c):
    k1, k2, k3, k4 = jax.random.split(key, 4)
    gamma = 1.0 + 0.1 * jax.random.normal(k1, (c,), jnp.float32)
    beta = 0.1 * jax.random.normal(k2, (c,), jnp.float32)
    mean = 0.1 * jax.random.normal(k3, (c,), jnp.float32)
    var = 1.0 + 0.1 * jax.random.uniform(k4, (c,), jnp.float32)
    return gamma, beta, mean, var


def _block_params(key, cin, cout, k=5):
    keys = jax.random.split(key, 5)
    w1, b1 = _conv_params(keys[1], cin, cout, k)
    w2, b2 = _conv_params(keys[3], cout, cout, k)
    res_w, res_b = _conv_params(keys[4], cin, cout, 1)
    return {
        "bn1": _bn_params(keys[0], cin),
        "w1": w1, "b1": b1,
        "bn2": _bn_params(keys[2], cout),
        "w2": w2, "b2": b2,
        "res_w": res_w, "res_b": res_b,
    }


def make_params(key, C=4, n_classes=10):
    keys = jax.random.split(key, 7)
    fcw = jax.random.normal(keys[5], (128, n_classes), jnp.float32) / (128.0 ** 0.5)
    fcb = 0.01 * jax.random.normal(keys[6], (n_classes,), jnp.float32)
    return {
        "bn0": _bn_params(keys[0], C),
        "conv1": _conv_params(keys[1], C, 16, 5),
        "block1": _block_params(keys[2], 16, 32),
        "block2": _block_params(keys[3], 32, 64),
        "block3": _block_params(keys[4], 64, 128),
        "fc": (fcw, fcb),
    }


# ----------------------------------- main -----------------------------------

if __name__ == "__main__":
    key = jax.random.PRNGKey(0)
    pkey, xkey = jax.random.split(key)

    # input_size = (H=16, W=16, C=4), n_classes = 10, batch = 2; input is NCHW.
    params = make_params(pkey, C=4, n_classes=10)
    x = jax.random.normal(xkey, (2, 4, 16, 16), jnp.float32)

    # One-time weight prep (fold/transpose/pad/cast) — NOT in the per-step path.
    prep = prepare_params(params)
    prep = jax.block_until_ready(prep)

    fwd = jax.jit(functools.partial(forward, prep=prep))
    logits = fwd(x)
    logits = jax.block_until_ready(logits)

    assert logits.shape == (2, 10), logits.shape
    assert logits.dtype == jnp.float32
    assert bool(jnp.all(jnp.isfinite(logits)))
    print("KERNEL_OK")
</pallas_src>

<mosaic_0001>
module attributes {stable_mosaic.version = 11 : i64} {
  func.func @_matmul_bias_kernel(%arg0: i32, %arg1: memref<512x128xbf16, #tpu.memory_space<vmem>>, %arg2: memref<128x128xbf16, #tpu.memory_space<vmem>>, %arg3: memref<1x128xf32, #tpu.memory_space<vmem>>, %arg4: memref<512x128xbf16, #tpu.memory_space<vmem>>) attributes {dimension_semantics = [#tpu.dimension_semantics<arbitrary>], iteration_bounds = array<i64: 1>, scalar_prefetch = 0 : i64, scratch_operands = 0 : i64, tpu.core_type = #tpu.core_type<tc>, window_params = [{transform_indices = @transform_0, window_bounds = array<i64: 512, 128>}, {pipeline_mode = #tpu.pipeline_mode<synchronous>, transform_indices = @transform_1, window_bounds = array<i64: 128, 128>}, {pipeline_mode = #tpu.pipeline_mode<synchronous>, transform_indices = @transform_2, window_bounds = array<i64: 1, 128>}, {transform_indices = @transform_3, window_bounds = array<i64: 512, 128>}]} {
    %c0 = arith.constant 0 : index
    %c0_0 = arith.constant 0 : index
    %0 = vector.load %arg1[%c0, %c0_0] : memref<512x128xbf16, #tpu.memory_space<vmem>>, vector<512x128xbf16>
    %c0_1 = arith.constant 0 : index
    %c0_2 = arith.constant 0 : index
    %1 = vector.load %arg2[%c0_1, %c0_2] : memref<128x128xbf16, #tpu.memory_space<vmem>>, vector<128x128xbf16>
    %cst = arith.constant dense<0.000000e+00> : vector<512x128xf32>
    %2 = tpu.matmul %0, %1, %cst {dimension_numbers = #tpu.dot_dimension_numbers<[1], [0], [0], [1], [0, 0, 1, 1], [], []>} : vector<512x128xbf16>, vector<128x128xbf16>, vector<512x128xf32> -> vector<512x128xf32>
    %c0_3 = arith.constant 0 : index
    %c0_4 = arith.constant 0 : index
    %3 = vector.load %arg3[%c0_3, %c0_4] : memref<1x128xf32, #tpu.memory_space<vmem>>, vector<1x128xf32>
    %4 = vector.broadcast %3 : vector<1x128xf32> to vector<512x128xf32>
    %5 = arith.addf %2, %4 : vector<512x128xf32>
    %cst_5 = arith.constant 0.000000e+00 : f32
    %6 = vector.broadcast %cst_5 : f32 to vector<512x128xf32>
    %7 = arith.maximumf %5, %6 : vector<512x128xf32>
    %8 = arith.truncf %7 : vector<512x128xf32> to vector<512x128xbf16>
    %c0_6 = arith.constant 0 : index
    %c0_7 = arith.constant 0 : index
    %9 = vector.load %arg4[%c0_6, %c0_7] : memref<512x128xbf16, #tpu.memory_space<vmem>>, vector<512x128xbf16>
    tpu.vector_store %arg4[%c0_6, %c0_7], %8 {strides = array<i32>} : memref<512x128xbf16, #tpu.memory_space<vmem>>, vector<512x128xbf16>,
    return
  }
  func.func @transform_0(%arg0: i32) -> (i32, i32) {
    %c0_i32 = arith.constant 0 : i32
    %c0_i32_0 = arith.constant 0 : i32
    return %arg0, %c0_i32 : i32, i32
  }
  func.func @transform_1(%arg0: i32) -> (i32, i32) {
    %c0_i32 = arith.constant 0 : i32
    %c0_i32_0 = arith.constant 0 : i32
    %c0_i32_1 = arith.constant 0 : i32
    return %c0_i32, %c0_i32_0 : i32, i32
  }
  func.func @transform_2(%arg0: i32) -> (i32, i32) {
    %c0_i32 = arith.constant 0 : i32
    %c0_i32_0 = arith.constant 0 : i32
    %c0_i32_1 = arith.constant 0 : i32
    return %c0_i32, %c0_i32_0 : i32, i32
  }
  func.func @transform_3(%arg0: i32) -> (i32, i32) {
    %c0_i32 = arith.constant 0 : i32
    %c0_i32_0 = arith.constant 0 : i32
    return %arg0, %c0_i32 : i32, i32
  }
}

module attributes {stable_mosaic.version = 11 : i64} {
  func.func @_matmul_bias_kernel(%arg0: i32, %arg1: memref<32x512xbf16, #tpu.memory_space<vmem>>, %arg2: memref<512x128xbf16, #tpu.memory_space<vmem>>, %arg3: memref<1x128xf32, #tpu.memory_space<vmem>>, %arg4: memref<32x128xbf16, #tpu.memory_space<vmem>>) attributes {dimension_semantics = [#tpu.dimension_semantics<arbitrary>], iteration_bounds = array<i64: 1>, scalar_prefetch = 0 : i64, scratch_operands = 0 : i64, tpu.core_type = #tpu.core_type<tc>, window_params = [{transform_indices = @transform_0, window_bounds = array<i64: 32, 512>}, {pipeline_mode = #tpu.pipeline_mode<synchronous>, transform_indices = @transform_1, window_bounds = array<i64: 512, 128>}, {pipeline_mode = #tpu.pipeline_mode<synchronous>, transform_indices = @transform_2, window_bounds = array<i64: 1, 128>}, {transform_indices = @transform_3, window_bounds = array<i64: 32, 128>}]} {
    %c0 = arith.constant 0 : index
    %c0_0 = arith.constant 0 : index
    %0 = vector.load %arg1[%c0, %c0_0] : memref<32x512xbf16, #tpu.memory_space<vmem>>, vector<32x512xbf16>
    %c0_1 = arith.constant 0 : index
    %c0_2 = arith.constant 0 : index
    %1 = vector.load %arg2[%c0_1, %c0_2] : memref<512x128xbf16, #tpu.memory_space<vmem>>, vector<512x128xbf16>
    %cst = arith.constant dense<0.000000e+00> : vector<32x128xf32>
    %2 = tpu.matmul %0, %1, %cst {dimension_numbers = #tpu.dot_dimension_numbers<[1], [0], [0], [1], [0, 0, 1, 1], [], []>} : vector<32x512xbf16>, vector<512x128xbf16>, vector<32x128xf32> -> vector<32x128xf32>
    %c0_3 = arith.constant 0 : index
    %c0_4 = arith.constant 0 : index
    %3 = vector.load %arg3[%c0_3, %c0_4] : memref<1x128xf32, #tpu.memory_space<vmem>>, vector<1x128xf32>
    %4 = vector.broadcast %3 : vector<1x128xf32> to vector<32x128xf32>
    %5 = arith.addf %2, %4 : vector<32x128xf32>
    %cst_5 = arith.constant 0.000000e+00 : f32
    %6 = vector.broadcast %cst_5 : f32 to vector<32x128xf32>
    %7 = arith.maximumf %5, %6 : vector<32x128xf32>
    %8 = arith.truncf %7 : vector<32x128xf32> to vector<32x128xbf16>
    %c0_6 = arith.constant 0 : index
    %c0_7 = arith.constant 0 : index
    %9 = vector.load %arg4[%c0_6, %c0_7] : memref<32x128xbf16, #tpu.memory_space<vmem>>, vector<32x128xbf16>
    tpu.vector_store %arg4[%c0_6, %c0_7], %8 {strides = array<i32>} : memref<32x128xbf16, #tpu.memory_space<vmem>>, vector<32x128xbf16>,
    return
  }
  func.func @transform_0(%arg0: i32) -> (i32, i32) {
    %c0_i32 = arith.constant 0 : i32
    %c0_i32_0 = arith.constant 0 : i32
    return %arg0, %c0_i32 : i32, i32
  }
  func.func @transform_1(%arg0: i32) -> (i32, i32) {
    %c0_i32 = arith.constant 0 : i32
    %c0_i32_0 = arith.constant 0 : i32
    %c0_i32_1 = arith.constant 0 : i32
    return %c0_i32, %c0_i32_0 : i32, i32
  }
  func.func @transform_2(%arg0: i32) -> (i32, i32) {
    %c0_i32 = arith.constant 0 : i32
    %c0_i32_0 = arith.constant 0 : i32
    %c0_i32_1 = arith.constant 0 : i32
    return %c0_i32, %c0_i32_0 : i32, i32
  }
  func.func @transform_3(%arg0: i32) -> (i32, i32) {
    %c0_i32 = arith.constant 0 : i32
    %c0_i32_0 = arith.constant 0 : i32
    return %arg0, %c0_i32 : i32, i32
  }
}

module attributes {stable_mosaic.version = 11 : i64} {
  func.func @_dual_matmul_bias_kernel(%arg0: i32, %arg1: memref<32x896xbf16, #tpu.memory_space<vmem>>, %arg2: memref<896x128xbf16, #tpu.memory_space<vmem>>, %arg3: memref<32x128xbf16, #tpu.memory_space<vmem>>, %arg4: memref<128x128xbf16, #tpu.memory_space<vmem>>, %arg5: memref<1x128xf32, #tpu.memory_space<vmem>>, %arg6: memref<32x128xbf16, #tpu.memory_space<vmem>>) attributes {dimension_semantics = [#tpu.dimension_semantics<arbitrary>], iteration_bounds = array<i64: 1>, scalar_prefetch = 0 : i64, scratch_operands = 0 : i64, tpu.core_type = #tpu.core_type<tc>, window_params = [{pipeline_mode = #tpu.pipeline_mode<synchronous>, transform_indices = @transform_0, window_bounds = array<i64: 32, 896>}, {pipeline_mode = #tpu.pipeline_mode<synchronous>, transform_indices = @transform_1, window_bounds = array<i64: 896, 128>}, {pipeline_mode = #tpu.pipeline_mode<synchronous>, transform_indices = @transform_2, window_bounds = array<i64: 32, 128>}, {pipeline_mode = #tpu.pipeline_mode<synchronous>, transform_indices = @transform_3, window_bounds = array<i64: 128, 128>}, {pipeline_mode = #tpu.pipeline_mode<synchronous>, transform_indices = @transform_4, window_bounds = array<i64: 1, 128>}, {pipeline_mode = #tpu.pipeline_mode<synchronous>, transform_indices = @transform_5, window_bounds = array<i64: 32, 128>}]} {
    %c0 = arith.constant 0 : index
    %c0_0 = arith.constant 0 : index
    %0 = vector.load %arg1[%c0, %c0_0] : memref<32x896xbf16, #tpu.memory_space<vmem>>, vector<32x896xbf16>
    %c0_1 = arith.constant 0 : index
    %c0_2 = arith.constant 0 : index
    %1 = vector.load %arg2[%c0_1, %c0_2] : memref<896x128xbf16, #tpu.memory_space<vmem>>, vector<896x128xbf16>
    %cst = arith.constant dense<0.000000e+00> : vector<32x128xf32>
    %2 = tpu.matmul %0, %1, %cst {dimension_numbers = #tpu.dot_dimension_numbers<[1], [0], [0], [1], [0, 0, 1, 1], [], []>} : vector<32x896xbf16>, vector<896x128xbf16>, vector<32x128xf32> -> vector<32x128xf32>
    %c0_3 = arith.constant 0 : index
    %c0_4 = arith.constant 0 : index
    %3 = vector.load %arg3[%c0_3, %c0_4] : memref<32x128xbf16, #tpu.memory_space<vmem>>, vector<32x128xbf16>
    %c0_5 = arith.constant 0 : index
    %c0_6 = arith.constant 0 : index
    %4 = vector.load %arg4[%c0_5, %c0_6] : memref<128x128xbf16, #tpu.memory_space<vmem>>, vector<128x128xbf16>
    %cst_7 = arith.constant dense<0.000000e+00> : vector<32x128xf32>
    %5 = tpu.matmul %3, %4, %cst_7 {dimension_numbers = #tpu.dot_dimension_numbers<[1], [0], [0], [1], [0, 0, 1, 1], [], []>} : vector<32x128xbf16>, vector<128x128xbf16>, vector<32x128xf32> -> vector<32x128xf32>
    %6 = arith.addf %2, %5 : vector<32x128xf32>
    %c0_8 = arith.constant 0 : index
    %c0_9 = arith.constant 0 : index
    %7 = vector.load %arg5[%c0_8, %c0_9] : memref<1x128xf32, #tpu.memory_space<vmem>>, vector<1x128xf32>
    %8 = vector.broadcast %7 : vector<1x128xf32> to vector<32x128xf32>
    %9 = arith.addf %6, %8 : vector<32x128xf32>
    %10 = arith.truncf %9 : vector<32x128xf32> to vector<32x128xbf16>
    %c0_10 = arith.constant 0 : index
    %c0_11 = arith.constant 0 : index
    %11 = vector.load %arg6[%c0_10, %c0_11] : memref<32x128xbf16, #tpu.memory_space<vmem>>, vector<32x128xbf16>
    tpu.vector_store %arg6[%c0_10, %c0_11], %10 {strides = array<i32>} : memref<32x128xbf16, #tpu.memory_space<vmem>>, vector<32x128xbf16>,
    return
  }
  func.func @transform_0(%arg0: i32) -> (i32, i32) {
    %c0_i32 = arith.constant 0 : i32
    %c0_i32_0 = arith.constant 0 : i32
    %c0_i32_1 = arith.constant 0 : i32
    return %c0_i32, %c0_i32_0 : i32, i32
  }
  func.func @transform_1(%arg0: i32) -> (i32, i32) {
    %c0_i32 = arith.constant 0 : i32
    %c0_i32_0 = arith.constant 0 : i32
    %c0_i32_1 = arith.constant 0 : i32
    return %c0_i32, %c0_i32_0 : i32, i32
  }
  func.func @transform_2(%arg0: i32) -> (i32, i32) {
    %c0_i32 = arith.constant 0 : i32
    %c0_i32_0 = arith.constant 0 : i32
    %c0_i32_1 = arith.constant 0 : i32
    return %c0_i32, %c0_i32_0 : i32, i32
  }
  func.func @transform_3(%arg0: i32) -> (i32, i32) {
    %c0_i32 = arith.constant 0 : i32
    %c0_i32_0 = arith.constant 0 : i32
    %c0_i32_1 = arith.constant 0 : i32
    return %c0_i32, %c0_i32_0 : i32, i32
  }
  func.func @transform_4(%arg0: i32) -> (i32, i32) {
    %c0_i32 = arith.constant 0 : i32
    %c0_i32_0 = arith.constant 0 : i32
    %c0_i32_1 = arith.constant 0 : i32
    return %c0_i32, %c0_i32_0 : i32, i32
  }
  func.func @transform_5(%arg0: i32) -> (i32, i32) {
    %c0_i32 = arith.constant 0 : i32
    %c0_i32_0 = arith.constant 0 : i32
    %c0_i32_1 = arith.constant 0 : i32
    return %c0_i32, %c0_i32_0 : i32, i32
  }
}

module attributes {stable_mosaic.version = 11 : i64} {
  func.func @_matmul_bias_kernel(%arg0: i32, %arg1: memref<8x896xbf16, #tpu.memory_space<vmem>>, %arg2: memref<896x128xbf16, #tpu.memory_space<vmem>>, %arg3: memref<1x128xf32, #tpu.memory_space<vmem>>, %arg4: memref<8x128xbf16, #tpu.memory_space<vmem>>) attributes {dimension_semantics = [#tpu.dimension_semantics<arbitrary>], iteration_bounds = array<i64: 1>, scalar_prefetch = 0 : i64, scratch_operands = 0 : i64, tpu.core_type = #tpu.core_type<tc>, window_params = [{transform_indices = @transform_0, window_bounds = array<i64: 8, 896>}, {pipeline_mode = #tpu.pipeline_mode<synchronous>, transform_indices = @transform_1, window_bounds = array<i64: 896, 128>}, {pipeline_mode = #tpu.pipeline_mode<synchronous>, transform_indices = @transform_2, window_bounds = array<i64: 1, 128>}, {transform_indices = @transform_3, window_bounds = array<i64: 8, 128>}]} {
    %c0 = arith.constant 0 : index
    %c0_0 = arith.constant 0 : index
    %0 = vector.load %arg1[%c0, %c0_0] : memref<8x896xbf16, #tpu.memory_space<vmem>>, vector<8x896xbf16>
    %c0_1 = arith.constant 0 : index
    %c0_2 = arith.constant 0 : index
    %1 = vector.load %arg2[%c0_1, %c0_2] : memref<896x128xbf16, #tpu.memory_space<vmem>>, vector<896x128xbf16>
    %cst = arith.constant dense<0.000000e+00> : vector<8x128xf32>
    %2 = tpu.matmul %0, %1, %cst {dimension_numbers = #tpu.dot_dimension_numbers<[1], [0], [0], [1], [0, 0, 1, 1], [], []>} : vector<8x896xbf16>, vector<896x128xbf16>, vector<8x128xf32> -> vector<8x128xf32>
    %c0_3 = arith.constant 0 : index
    %c0_4 = arith.constant 0 : index
    %3 = vector.load %arg3[%c0_3, %c0_4] : memref<1x128xf32, #tpu.memory_space<vmem>>, vector<1x128xf32>
    %4 = vector.broadcast %3 : vector<1x128xf32> to vector<8x128xf32>
    %5 = arith.addf %2, %4 : vector<8x128xf32>
    %cst_5 = arith.constant 0.000000e+00 : f32
    %6 = vector.broadcast %cst_5 : f32 to vector<8x128xf32>
    %7 = arith.maximumf %5, %6 : vector<8x128xf32>
    %8 = arith.truncf %7 : vector<8x128xf32> to vector<8x128xbf16>
    %c0_6 = arith.constant 0 : index
    %c0_7 = arith.constant 0 : index
    %9 = vector.load %arg4[%c0_6, %c0_7] : memref<8x128xbf16, #tpu.memory_space<vmem>>, vector<8x128xbf16>
    tpu.vector_store %arg4[%c0_6, %c0_7], %8 {strides = array<i32>} : memref<8x128xbf16, #tpu.memory_space<vmem>>, vector<8x128xbf16>,
    return
  }
  func.func @transform_0(%arg0: i32) -> (i32, i32) {
    %c0_i32 = arith.constant 0 : i32
    %c0_i32_0 = arith.constant 0 : i32
    return %arg0, %c0_i32 : i32, i32
  }
  func.func @transform_1(%arg0: i32) -> (i32, i32) {
    %c0_i32 = arith.constant 0 : i32
    %c0_i32_0 = arith.constant 0 : i32
    %c0_i32_1 = arith.constant 0 : i32
    return %c0_i32, %c0_i32_0 : i32, i32
  }
  func.func @transform_2(%arg0: i32) -> (i32, i32) {
    %c0_i32 = arith.constant 0 : i32
    %c0_i32_0 = arith.constant 0 : i32
    %c0_i32_1 = arith.constant 0 : i32
    return %c0_i32, %c0_i32_0 : i32, i32
  }
  func.func @transform_3(%arg0: i32) -> (i32, i32) {
    %c0_i32 = arith.constant 0 : i32
    %c0_i32_0 = arith.constant 0 : i32
    return %arg0, %c0_i32 : i32, i32
  }
}

module attributes {stable_mosaic.version = 11 : i64} {
  func.func @_dual_matmul_bias_kernel(%arg0: i32, %arg1: memref<8x1664xbf16, #tpu.memory_space<vmem>>, %arg2: memref<1664x128xbf16, #tpu.memory_space<vmem>>, %arg3: memref<8x128xbf16, #tpu.memory_space<vmem>>, %arg4: memref<128x128xbf16, #tpu.memory_space<vmem>>, %arg5: memref<1x128xf32, #tpu.memory_space<vmem>>, %arg6: memref<8x128xbf16, #tpu.memory_space<vmem>>) attributes {dimension_semantics = [#tpu.dimension_semantics<arbitrary>], iteration_bounds = array<i64: 1>, scalar_prefetch = 0 : i64, scratch_operands = 0 : i64, tpu.core_type = #tpu.core_type<tc>, window_params = [{pipeline_mode = #tpu.pipeline_mode<synchronous>, transform_indices = @transform_0, window_bounds = array<i64: 8, 1664>}, {pipeline_mode = #tpu.pipeline_mode<synchronous>, transform_indices = @transform_1, window_bounds = array<i64: 1664, 128>}, {pipeline_mode = #tpu.pipeline_mode<synchronous>, transform_indices = @transform_2, window_bounds = array<i64: 8, 128>}, {pipeline_mode = #tpu.pipeline_mode<synchronous>, transform_indices = @transform_3, window_bounds = array<i64: 128, 128>}, {pipeline_mode = #tpu.pipeline_mode<synchronous>, transform_indices = @transform_4, window_bounds = array<i64: 1, 128>}, {pipeline_mode = #tpu.pipeline_mode<synchronous>, transform_indices = @transform_5, window_bounds = array<i64: 8, 128>}]} {
    %c0 = arith.constant 0 : index
    %c0_0 = arith.constant 0 : index
    %0 = vector.load %arg1[%c0, %c0_0] : memref<8x1664xbf16, #tpu.memory_space<vmem>>, vector<8x1664xbf16>
    %c0_1 = arith.constant 0 : index
    %c0_2 = arith.constant 0 : index
    %1 = vector.load %arg2[%c0_1, %c0_2] : memref<1664x128xbf16, #tpu.memory_space<vmem>>, vector<1664x128xbf16>
    %cst = arith.constant dense<0.000000e+00> : vector<8x128xf32>
    %2 = tpu.matmul %0, %1, %cst {dimension_numbers = #tpu.dot_dimension_numbers<[1], [0], [0], [1], [0, 0, 1, 1], [], []>} : vector<8x1664xbf16>, vector<1664x128xbf16>, vector<8x128xf32> -> vector<8x128xf32>
    %c0_3 = arith.constant 0 : index
    %c0_4 = arith.constant 0 : index
    %3 = vector.load %arg3[%c0_3, %c0_4] : memref<8x128xbf16, #tpu.memory_space<vmem>>, vector<8x128xbf16>
    %c0_5 = arith.constant 0 : index
    %c0_6 = arith.constant 0 : index
    %4 = vector.load %arg4[%c0_5, %c0_6] : memref<128x128xbf16, #tpu.memory_space<vmem>>, vector<128x128xbf16>
    %cst_7 = arith.constant dense<0.000000e+00> : vector<8x128xf32>
    %5 = tpu.matmul %3, %4, %cst_7 {dimension_numbers = #tpu.dot_dimension_numbers<[1], [0], [0], [1], [0, 0, 1, 1], [], []>} : vector<8x128xbf16>, vector<128x128xbf16>, vector<8x128xf32> -> vector<8x128xf32>
    %6 = arith.addf %2, %5 : vector<8x128xf32>
    %c0_8 = arith.constant 0 : index
    %c0_9 = arith.constant 0 : index
    %7 = vector.load %arg5[%c0_8, %c0_9] : memref<1x128xf32, #tpu.memory_space<vmem>>, vector<1x128xf32>
    %8 = vector.broadcast %7 : vector<1x128xf32> to vector<8x128xf32>
    %9 = arith.addf %6, %8 : vector<8x128xf32>
    %10 = arith.truncf %9 : vector<8x128xf32> to vector<8x128xbf16>
    %c0_10 = arith.constant 0 : index
    %c0_11 = arith.constant 0 : index
    %11 = vector.load %arg6[%c0_10, %c0_11] : memref<8x128xbf16, #tpu.memory_space<vmem>>, vector<8x128xbf16>
    tpu.vector_store %arg6[%c0_10, %c0_11], %10 {strides = array<i32>} : memref<8x128xbf16, #tpu.memory_space<vmem>>, vector<8x128xbf16>,
    return
  }
  func.func @transform_0(%arg0: i32) -> (i32, i32) {
    %c0_i32 = arith.constant 0 : i32
    %c0_i32_0 = arith.constant 0 : i32
    %c0_i32_1 = arith.constant 0 : i32
    return %c0_i32, %c0_i32_0 : i32, i32
  }
  func.func @transform_1(%arg0: i32) -> (i32, i32) {
    %c0_i32 = arith.constant 0 : i32
    %c0_i32_0 = arith.constant 0 : i32
    %c0_i32_1 = arith.constant 0 : i32
    return %c0_i32, %c0_i32_0 : i32, i32
  }
  func.func @transform_2(%arg0: i32) -> (i32, i32) {
    %c0_i32 = arith.constant 0 : i32
    %c0_i32_0 = arith.constant 0 : i32
    %c0_i32_1 = arith.constant 0 : i32
    return %c0_i32, %c0_i32_0 : i32, i32
  }
  func.func @transform_3(%arg0: i32) -> (i32, i32) {
    %c0_i32 = arith.constant 0 : i32
    %c0_i32_0 = arith.constant 0 : i32
    %c0_i32_1 = arith.constant 0 : i32
    return %c0_i32, %c0_i32_0 : i32, i32
  }
  func.func @transform_4(%arg0: i32) -> (i32, i32) {
    %c0_i32 = arith.constant 0 : i32
    %c0_i32_0 = arith.constant 0 : i32
    %c0_i32_1 = arith.constant 0 : i32
    return %c0_i32, %c0_i32_0 : i32, i32
  }
  func.func @transform_5(%arg0: i32) -> (i32, i32) {
    %c0_i32 = arith.constant 0 : i32
    %c0_i32_0 = arith.constant 0 : i32
    %c0_i32_1 = arith.constant 0 : i32
    return %c0_i32, %c0_i32_0 : i32, i32
  }
}

module attributes {stable_mosaic.version = 11 : i64} {
  func.func @_matmul_bias_kernel(%arg0: i32, %arg1: memref<2x1664xbf16, #tpu.memory_space<vmem>>, %arg2: memref<1664x128xbf16, #tpu.memory_space<vmem>>, %arg3: memref<1x128xf32, #tpu.memory_space<vmem>>, %arg4: memref<2x128xbf16, #tpu.memory_space<vmem>>) attributes {dimension_semantics = [#tpu.dimension_semantics<arbitrary>], iteration_bounds = array<i64: 1>, scalar_prefetch = 0 : i64, scratch_operands = 0 : i64, tpu.core_type = #tpu.core_type<tc>, window_params = [{transform_indices = @transform_0, window_bounds = array<i64: 2, 1664>}, {pipeline_mode = #tpu.pipeline_mode<synchronous>, transform_indices = @transform_1, window_bounds = array<i64: 1664, 128>}, {pipeline_mode = #tpu.pipeline_mode<synchronous>, transform_indices = @transform_2, window_bounds = array<i64: 1, 128>}, {transform_indices = @transform_3, window_bounds = array<i64: 2, 128>}]} {
    %c0 = arith.constant 0 : index
    %c0_0 = arith.constant 0 : index
    %0 = vector.load %arg1[%c0, %c0_0] : memref<2x1664xbf16, #tpu.memory_space<vmem>>, vector<2x1664xbf16>
    %c0_1 = arith.constant 0 : index
    %c0_2 = arith.constant 0 : index
    %1 = vector.load %arg2[%c0_1, %c0_2] : memref<1664x128xbf16, #tpu.memory_space<vmem>>, vector<1664x128xbf16>
    %cst = arith.constant dense<0.000000e+00> : vector<2x128xf32>
    %2 = tpu.matmul %0, %1, %cst {dimension_numbers = #tpu.dot_dimension_numbers<[1], [0], [0], [1], [0, 0, 1, 1], [], []>} : vector<2x1664xbf16>, vector<1664x128xbf16>, vector<2x128xf32> -> vector<2x128xf32>
    %c0_3 = arith.constant 0 : index
    %c0_4 = arith.constant 0 : index
    %3 = vector.load %arg3[%c0_3, %c0_4] : memref<1x128xf32, #tpu.memory_space<vmem>>, vector<1x128xf32>
    %4 = vector.broadcast %3 : vector<1x128xf32> to vector<2x128xf32>
    %5 = arith.addf %2, %4 : vector<2x128xf32>
    %cst_5 = arith.constant 0.000000e+00 : f32
    %6 = vector.broadcast %cst_5 : f32 to vector<2x128xf32>
    %7 = arith.maximumf %5, %6 : vector<2x128xf32>
    %8 = arith.truncf %7 : vector<2x128xf32> to vector<2x128xbf16>
    %c0_6 = arith.constant 0 : index
    %c0_7 = arith.constant 0 : index
    %9 = vector.load %arg4[%c0_6, %c0_7] : memref<2x128xbf16, #tpu.memory_space<vmem>>, vector<2x128xbf16>
    tpu.vector_store %arg4[%c0_6, %c0_7], %8 {strides = array<i32>} : memref<2x128xbf16, #tpu.memory_space<vmem>>, vector<2x128xbf16>,
    return
  }
  func.func @transform_0(%arg0: i32) -> (i32, i32) {
    %c0_i32 = arith.constant 0 : i32
    %c0_i32_0 = arith.constant 0 : i32
    return %arg0, %c0_i32 : i32, i32
  }
  func.func @transform_1(%arg0: i32) -> (i32, i32) {
    %c0_i32 = arith.constant 0 : i32
    %c0_i32_0 = arith.constant 0 : i32
    %c0_i32_1 = arith.constant 0 : i32
    return %c0_i32, %c0_i32_0 : i32, i32
  }
  func.func @transform_2(%arg0: i32) -> (i32, i32) {
    %c0_i32 = arith.constant 0 : i32
    %c0_i32_0 = arith.constant 0 : i32
    %c0_i32_1 = arith.constant 0 : i32
    return %c0_i32, %c0_i32_0 : i32, i32
  }
  func.func @transform_3(%arg0: i32) -> (i32, i32) {
    %c0_i32 = arith.constant 0 : i32
    %c0_i32_0 = arith.constant 0 : i32
    return %arg0, %c0_i32 : i32, i32
  }
}

module attributes {stable_mosaic.version = 11 : i64} {
  func.func @_dual_matmul_bias_kernel(%arg0: i32, %arg1: memref<2x3200xbf16, #tpu.memory_space<vmem>>, %arg2: memref<3200x128xbf16, #tpu.memory_space<vmem>>, %arg3: memref<2x128xbf16, #tpu.memory_space<vmem>>, %arg4: memref<128x128xbf16, #tpu.memory_space<vmem>>, %arg5: memref<1x128xf32, #tpu.memory_space<vmem>>, %arg6: memref<2x128xf32, #tpu.memory_space<vmem>>) attributes {dimension_semantics = [#tpu.dimension_semantics<arbitrary>], iteration_bounds = array<i64: 1>, scalar_prefetch = 0 : i64, scratch_operands = 0 : i64, tpu.core_type = #tpu.core_type<tc>, window_params = [{pipeline_mode = #tpu.pipeline_mode<synchronous>, transform_indices = @transform_0, window_bounds = array<i64: 2, 3200>}, {pipeline_mode = #tpu.pipeline_mode<synchronous>, transform_indices = @transform_1, window_bounds = array<i64: 3200, 128>}, {pipeline_mode = #tpu.pipeline_mode<synchronous>, transform_indices = @transform_2, window_bounds = array<i64: 2, 128>}, {pipeline_mode = #tpu.pipeline_mode<synchronous>, transform_indices = @transform_3, window_bounds = array<i64: 128, 128>}, {pipeline_mode = #tpu.pipeline_mode<synchronous>, transform_indices = @transform_4, window_bounds = array<i64: 1, 128>}, {pipeline_mode = #tpu.pipeline_mode<synchronous>, transform_indices = @transform_5, window_bounds = array<i64: 2, 128>}]} {
    %c0 = arith.constant 0 : index
    %c0_0 = arith.constant 0 : index
    %0 = vector.load %arg1[%c0, %c0_0] : memref<2x3200xbf16, #tpu.memory_space<vmem>>, vector<2x3200xbf16>
    %c0_1 = arith.constant 0 : index
    %c0_2 = arith.constant 0 : index
    %1 = vector.load %arg2[%c0_1, %c0_2] : memref<3200x128xbf16, #tpu.memory_space<vmem>>, vector<3200x128xbf16>
    %cst = arith.constant dense<0.000000e+00> : vector<2x128xf32>
    %2 = tpu.matmul %0, %1, %cst {dimension_numbers = #tpu.dot_dimension_numbers<[1], [0], [0], [1], [0, 0, 1, 1], [], []>} : vector<2x3200xbf16>, vector<3200x128xbf16>, vector<2x128xf32> -> vector<2x128xf32>
    %c0_3 = arith.constant 0 : index
    %c0_4 = arith.constant 0 : index
    %3 = vector.load %arg3[%c0_3, %c0_4] : memref<2x128xbf16, #tpu.memory_space<vmem>>, vector<2x128xbf16>
    %c0_5 = arith.constant 0 : index
    %c0_6 = arith.constant 0 : index
    %4 = vector.load %arg4[%c0_5, %c0_6] : memref<128x128xbf16, #tpu.memory_space<vmem>>, vector<128x128xbf16>
    %cst_7 = arith.constant dense<0.000000e+00> : vector<2x128xf32>
    %5 = tpu.matmul %3, %4, %cst_7 {dimension_numbers = #tpu.dot_dimension_numbers<[1], [0], [0], [1], [0, 0, 1, 1], [], []>} : vector<2x128xbf16>, vector<128x128xbf16>, vector<2x128xf32> -> vector<2x128xf32>
    %6 = arith.addf %2, %5 : vector<2x128xf32>
    %c0_8 = arith.constant 0 : index
    %c0_9 = arith.constant 0 : index
    %7 = vector.load %arg5[%c0_8, %c0_9] : memref<1x128xf32, #tpu.memory_space<vmem>>, vector<1x128xf32>
    %8 = vector.broadcast %7 : vector<1x128xf32> to vector<2x128xf32>
    %9 = arith.addf %6, %8 : vector<2x128xf32>
    %c0_10 = arith.constant 0 : index
    %c0_11 = arith.constant 0 : index
    %10 = vector.load %arg6[%c0_10, %c0_11] : memref<2x128xf32, #tpu.memory_space<vmem>>, vector<2x128xf32>
    tpu.vector_store %arg6[%c0_10, %c0_11], %9 {strides = array<i32>} : memref<2x128xf32, #tpu.memory_space<vmem>>, vector<2x128xf32>,
    return
  }
  func.func @transform_0(%arg0: i32) -> (i32, i32) {
    %c0_i32 = arith.constant 0 : i32
    %c0_i32_0 = arith.constant 0 : i32
    %c0_i32_1 = arith.constant 0 : i32
    return %c0_i32, %c0_i32_0 : i32, i32
  }
  func.func @transform_1(%arg0: i32) -> (i32, i32) {
    %c0_i32 = arith.constant 0 : i32
    %c0_i32_0 = arith.constant 0 : i32
    %c0_i32_1 = arith.constant 0 : i32
    return %c0_i32, %c0_i32_0 : i32, i32
  }
  func.func @transform_2(%arg0: i32) -> (i32, i32) {
    %c0_i32 = arith.constant 0 : i32
    %c0_i32_0 = arith.constant 0 : i32
    %c0_i32_1 = arith.constant 0 : i32
    return %c0_i32, %c0_i32_0 : i32, i32
  }
  func.func @transform_3(%arg0: i32) -> (i32, i32) {
    %c0_i32 = arith.constant 0 : i32
    %c0_i32_0 = arith.constant 0 : i32
    %c0_i32_1 = arith.constant 0 : i32
    return %c0_i32, %c0_i32_0 : i32, i32
  }
  func.func @transform_4(%arg0: i32) -> (i32, i32) {
    %c0_i32 = arith.constant 0 : i32
    %c0_i32_0 = arith.constant 0 : i32
    %c0_i32_1 = arith.constant 0 : i32
    return %c0_i32, %c0_i32_0 : i32, i32
  }
  func.func @transform_5(%arg0: i32) -> (i32, i32) {
    %c0_i32 = arith.constant 0 : i32
    %c0_i32_0 = arith.constant 0 : i32
    %c0_i32_1 = arith.constant 0 : i32
    return %c0_i32, %c0_i32_0 : i32, i32
  }
}

</mosaic_0001>

<bundles_post_ra>
// kernel: forward.7
= control target key start
LH: loop header
LB: loop body
LE: loop exit
PB: predicated region body
PF: predicated region fallthrough
CT: control target
= control target key end

     0   :  { %s1860_s1 = inlined_call_operand.vmem [shape: bf16[128,128], index: 1, kind: input, shape index: {}]   ;;  %s1861_s0 = inlined_call_operand.vmem [shape: bf16[512,128], index: 0, kind: input, shape index: {}]   ;;  %s1862_s2 = inlined_call_operand.vmem [shape: f32[1,128], index: 2, kind: input, shape index: {}]   ;;  %s1863_s3 = inlined_call_operand.vmem [shape: bf16[512,128], index: 3, kind: output, shape index: {}]  }
   0x1   :  { %v1515_v0 = vld [vmem:[%s1860_s1] sm:$0xff]   ;;  %v1516_v1 = vld [vmem:[%s1860_s1 + $0x8] sm:$0xff]   ;;  %v1517_v2 = vld [vmem:[%s1860_s1 + $0x10] sm:$0xff]  }
   0x2   :  { %1419 = vmatprep.subr.bf16.mxu0 %v1515_v0  ;;  %1499 = vmatprep.subr.bf16.mxu1 %v1515_v0  ;;  %v1518_v3 = vld [vmem:[%s1860_s1 + $0x18] sm:$0xff]   ;;  %v1523_v4 = vld [vmem:[%s1861_s0] sm:$0xff]   ;;  %v1520_v7 = vld [vmem:[%s1860_s1 + $0x28] sm:$0xff]  }
   0x3   :  { %1420 = vmatpush3.bf16.msra.mxu0 %v1515_v0  ;;  %1507 = vmatpush3.bf16.msra.mxu1 %v1515_v0  ;;  %v1524_v5 = vld [vmem:[%s1861_s0 + $0x80] sm:$0xff]   ;;  %v1521_v8 = vld [vmem:[%s1860_s1 + $0x30] sm:$0xff]   ;;  %v1522_v9 = vld [vmem:[%s1860_s1 + $0x38] sm:$0xff]  }
   0x4   :  { %1421 = vmatprep.subr.bf16.mxu0 %v1516_v1  ;;  %1500 = vmatprep.subr.bf16.mxu1 %v1516_v1  ;;  %v1519_v6 = vld [vmem:[%s1860_s1 + $0x20] sm:$0xff]   ;;  %v1525_v10 = vld [vmem:[%s1861_s0 + $0x8] sm:$0xff]   ;;  %v1527_v12 = vld [vmem:[%s1861_s0 + $0x10] sm:$0xff]  }
   0x5   :  { %1435 = vmatprep.mubr.bf16.mxu0 %v1523_v4  ;;  %1467 = vmatprep.mubr.bf16.mxu1 %v1524_v5  ;;  %v1526_v11 = vld [vmem:[%s1861_s0 + $0x88] sm:$0xff]   ;;  %v1528_v13 = vld [vmem:[%s1861_s0 + $0x90] sm:$0xff]   ;;  %v1529_v14 = vld [vmem:[%s1861_s0 + $0x18] sm:$0xff]  }
   0x6   :  { %v1530_v15 = vld [vmem:[%s1861_s0 + $0x98] sm:$0xff]   ;;  %v1531_v16 = vld [vmem:[%s1861_s0 + $0x20] sm:$0xff]   ;;  %v1533_v18 = vld [vmem:[%s1861_s0 + $0x28] sm:$0xff]  }
   0x7   :  { %1422 = vmatpush3.bf16.msra.mxu0 %v1516_v1  ;;  %1508 = vmatpush3.bf16.msra.mxu1 %v1516_v1  ;;  %v1532_v17 = vld [vmem:[%s1861_s0 + $0xa0] sm:$0xff]   ;;  %v1534_v19 = vld [vmem:[%s1861_s0 + $0xa8] sm:$0xff]   ;;  %v1535_v20 = vld [vmem:[%s1861_s0 + $0x30] sm:$0xff]  }
   0x8   :  { %1423 = vmatprep.subr.bf16.mxu0 %v1517_v2  ;;  %1501 = vmatprep.subr.bf16.mxu1 %v1517_v2  ;;  %v1536_v21 = vld [vmem:[%s1861_s0 + $0xb0] sm:$0xff]   ;;  %v1537_v22 = vld [vmem:[%s1861_s0 + $0x38] sm:$0xff]   ;;  %v1539_v24 = vld [vmem:[%s1861_s0 + $0x40] sm:$0xff]  }
   0x9   :  { %v1538_v23 = vld [vmem:[%s1861_s0 + $0xb8] sm:$0xff]   ;;  %v1540_v25 = vld [vmem:[%s1861_s0 + $0xc0] sm:$0xff]   ;;  %v1541_v26 = vld [vmem:[%s1861_s0 + $0x48] sm:$0xff]  }
   0xa   :  { %v1542_v27 = vld [vmem:[%s1861_s0 + $0xc8] sm:$0xff]   ;;  %v1543_v28 = vld [vmem:[%s1861_s0 + $0x50] sm:$0xff]   ;;  %v1545_v30 = vld [vmem:[%s1861_s0 + $0x58] sm:$0xff]  }
   0xb   :  { %1424 = vmatpush3.bf16.msra.mxu0 %v1517_v2  ;;  %1509 = vmatpush3.bf16.msra.mxu1 %v1517_v2  ;;  %v1544_v29 = vld [vmem:[%s1861_s0 + $0xd0] sm:$0xff]   ;;  %v1546_v31 = vld [vmem:[%s1861_s0 + $0xd8] sm:$0xff]   ;;  %v1547_v32 = vld [vmem:[%s1861_s0 + $0x60] sm:$0xff]  }
   0xc   :  { %1425 = vmatprep.subr.bf16.mxu0 %v1518_v3  ;;  %1502 = vmatprep.subr.bf16.mxu1 %v1518_v3  ;;  %v1548_v33 = vld [vmem:[%s1861_s0 + $0xe0] sm:$0xff]   ;;  %v1549_v34 = vld [vmem:[%s1861_s0 + $0x68] sm:$0xff]   ;;  %v1551_v36 = vld [vmem:[%s1861_s0 + $0x70] sm:$0xff]  }
   0xd   :  { %v1550_v35 = vld [vmem:[%s1861_s0 + $0xe8] sm:$0xff]   ;;  %v1552_v37 = vld [vmem:[%s1861_s0 + $0xf0] sm:$0xff]   ;;  %v1553_v38 = vld [vmem:[%s1861_s0 + $0x78] sm:$0xff]  }
   0xe   :  { %v1554_v39 = vld [vmem:[%s1861_s0 + $0xf8] sm:$0xff]   ;;  %v1698_v40 = vld [vmem:[%s1862_s2] ss:$0 sm:$0xff] }
   0xf   :  { %1426 = vmatpush3.bf16.msra.mxu0 %v1518_v3  ;;  %1510 = vmatpush3.bf16.msra.mxu1 %v1518_v3 }
  0x10   :  { %1427 = vmatprep.subr.bf16.mxu0 %v1519_v6  ;;  %1503 = vmatprep.subr.bf16.mxu1 %v1519_v6 }
  0x13   :  { %1428 = vmatpush3.bf16.msra.mxu0 %v1519_v6  ;;  %1511 = vmatpush3.bf16.msra.mxu1 %v1519_v6 }
  0x14   :  { %1429 = vmatprep.subr.bf16.mxu0 %v1520_v7  ;;  %1504 = vmatprep.subr.bf16.mxu1 %v1520_v7 }
  0x17   :  { %1430 = vmatpush3.bf16.msra.mxu0 %v1520_v7  ;;  %1512 = vmatpush3.bf16.msra.mxu1 %v1520_v7 }
  0x18   :  { %1431 = vmatprep.subr.bf16.mxu0 %v1521_v8  ;;  %1505 = vmatprep.subr.bf16.mxu1 %v1521_v8 }
  0x1b   :  { %1432 = vmatpush3.bf16.msra.mxu0 %v1521_v8  ;;  %1513 = vmatpush3.bf16.msra.mxu1 %v1521_v8 }
  0x1c   :  { %1433 = vmatprep.subr.bf16.mxu0 %v1522_v9  ;;  %1506 = vmatprep.subr.bf16.mxu1 %v1522_v9 }
  0x1f   :  { %1434 = vmatpush3.bf16.msra.mxu0 %v1522_v9  ;;  %1514 = vmatpush3.bf16.msra.mxu1 %v1522_v9 }
  0x22   :  { %1436 = vmatmul.mubr.bf16.vlgmr.msra.gmra.mrb[0].mxu0 %v1525_v10  ;;  %1468 = vmatmul.mubr.bf16.vlgmr.msra.gmra.mrb[0].mxu1 %v1526_v11 }
  0x23   :  { %1439 = vmatprep.mubr.bf16.mxu0 %v1527_v12  ;;  %1471 = vmatprep.mubr.bf16.mxu1 %v1528_v13 }
  0x2a   :  { %1440 = vmatmul.mubr.bf16.gmra.mrb[4].mxu0 %v1529_v14  ;;  %1472 = vmatmul.mubr.bf16.gmra.mrb[4].mxu1 %v1530_v15 }
  0x2b   :  { %1443 = vmatprep.mubr.bf16.mxu0 %v1531_v16  ;;  %1475 = vmatprep.mubr.bf16.mxu1 %v1532_v17 }
  0x32   :  { %1444 = vmatmul.mubr.bf16.gmra.mrb[8].mxu0 %v1533_v18  ;;  %1476 = vmatmul.mubr.bf16.gmra.mrb[8].mxu1 %v1534_v19 }
  0x33   :  { %1447 = vmatprep.mubr.bf16.mxu0 %v1535_v20  ;;  %1479 = vmatprep.mubr.bf16.mxu1 %v1536_v21 }
  0x3a   :  { %1448 = vmatmul.mubr.bf16.gmra.mrb[12].mxu0 %v1537_v22  ;;  %1480 = vmatmul.mubr.bf16.gmra.mrb[12].mxu1 %v1538_v23 }
  0x3b   :  { %1451 = vmatprep.mubr.bf16.mxu0 %v1539_v24  ;;  %1483 = vmatprep.mubr.bf16.mxu1 %v1540_v25 }
  0x42   :  { %1452 = vmatmul.mubr.bf16.gmra.mrb[16].mxu0 %v1541_v26  ;;  %1484 = vmatmul.mubr.bf16.gmra.mrb[16].mxu1 %v1542_v27 }
  0x43   :  { %1455 = vmatprep.mubr.bf16.mxu0 %v1543_v28  ;;  %1487 = vmatprep.mubr.bf16.mxu1 %v1544_v29 }
  0x4a   :  { %1456 = vmatmul.mubr.bf16.gmra.mrb[20].mxu0 %v1545_v30  ;;  %1488 = vmatmul.mubr.bf16.gmra.mrb[20].mxu1 %v1546_v31 }
  0x4b   :  { %1459 = vmatprep.mubr.bf16.mxu0 %v1547_v32  ;;  %1491 = vmatprep.mubr.bf16.mxu1 %v1548_v33 }
  0x52   :  { %1460 = vmatmul.mubr.bf16.gmra.mrb[24].mxu0 %v1549_v34  ;;  %1492 = vmatmul.mubr.bf16.gmra.mrb[24].mxu1 %v1550_v35 }
  0x53   :  { %1463 = vmatprep.mubr.bf16.mxu0 %v1551_v36  ;;  %1495 = vmatprep.mubr.bf16.mxu1 %v1552_v37 }
  0x5a   :  { %1464 = vmatmul.mubr.bf16.gmra.mrb[28].mxu0 %v1553_v38  ;;  %1496 = vmatmul.mubr.bf16.gmra.mrb[28].mxu1 %v1554_v39 }
  0xf5   :  { %v1437_v41 = vpop.f32.mrb[0].mxu0  ;;  %v1469_v42 = vpop.f32.mrb[0].mxu1 }
  0xf6   :  { %v385_v43 = vadd.f32 %v1437_v41, %v1698_v40  ;;  %v513_v44 = vadd.f32 %v1469_v42, %v1698_v40  ;;  %v376_v45 = vpop.f32.mrb[1].mxu0  ;;  %v504_v46 = vpop.f32.mrb[1].mxu1 }
  0xf7   :  { %v377_v47 = vadd.f32 %v1698_v40, %v376_v45  ;;  %v505_v48 = vadd.f32 %v1698_v40, %v504_v46  ;;  %v1438_v49 = vpop.f32.mrb[2].mxu0  ;;  %v1470_v50 = vpop.f32.mrb[2].mxu1 }
  0xf8   :  { %v388_v51 = vadd.f32 %v1438_v49, %v1698_v40  ;;  %v516_v52 = vadd.f32 %v1470_v50, %v1698_v40  ;;  %v379_v53 = vpop.f32.mrb[3].mxu0  ;;  %v507_v54 = vpop.f32.mrb[3].mxu1  ;;  %v633_v57 = vmax.f32 %v385_v43, 0.0  ;;  %v665_v58 = vmax.f32 %v513_v44, 0.0 }
  0xf9   :  { %v380_v55 = vadd.f32 %v1698_v40, %v379_v53  ;;  %v508_v56 = vadd.f32 %v1698_v40, %v507_v54  ;;  %v631_v61 = vmax.f32 %v377_v47, 0.0  ;;  %v663_v62 = vmax.f32 %v505_v48, 0.0 }
  0xfa   :  { %v634_v59 = vmax.f32 %v388_v51, 0.0  ;;  %v666_v60 = vmax.f32 %v516_v52, 0.0 }
  0xfb   :  { %v632_v63 = vmax.f32 %v380_v55, 0.0  ;;  %v664_v0 = vmax.f32 %v508_v56, 0.0 }
  0xfc   :  { %v1196_v1 = vpack.c.bf16 %v634_v59, %v633_v57  ;;  %v1276_v2 = vpack.c.bf16 %v666_v60, %v665_v58 }
  0xfd   :  { %v1191_v3 = vpack.c.bf16 %v632_v63, %v631_v61  ;;  %v1271_v4 = vpack.c.bf16 %v664_v0, %v663_v62  ;;  %v1441_v5 = vpop.f32.mrb[4].mxu0  ;;  %v1473_v6 = vpop.f32.mrb[4].mxu1 }
  0xfe   :  { %1348 = vst [vmem:[%s1863_s3 + $0x8] sm:$0xff] %v1196_v1   ;;  %1364 = vst [vmem:[%s1863_s3 + $0x88] sm:$0xff] %v1276_v2   ;;  %v401_v7 = vadd.f32 %v1441_v5, %v1698_v40  ;;  %v529_v8 = vadd.f32 %v1473_v6, %v1698_v40  ;;  %v392_v9 = vpop.f32.mrb[5].mxu0  ;;  %v520_v10 = vpop.f32.mrb[5].mxu1 }
  0xff   :  { %1192 = vst [vmem:[%s1863_s3] sm:$0xff] %v1191_v3   ;;  %1363 = vst [vmem:[%s1863_s3 + $0x80] sm:$0xff] %v1271_v4   ;;  %v393_v11 = vadd.f32 %v1698_v40, %v392_v9  ;;  %v521_v12 = vadd.f32 %v1698_v40, %v520_v10  ;;  %v1442_v13 = vpop.f32.mrb[6].mxu0  ;;  %v1474_v14 = vpop.f32.mrb[6].mxu1 }
 0x100   :  { %v404_v15 = vadd.f32 %v1442_v13, %v1698_v40  ;;  %v532_v16 = vadd.f32 %v1474_v14, %v1698_v40  ;;  %v395_v17 = vpop.f32.mrb[7].mxu0  ;;  %v523_v18 = vpop.f32.mrb[7].mxu1  ;;  %v637_v21 = vmax.f32 %v401_v7, 0.0  ;;  %v669_v22 = vmax.f32 %v529_v8, 0.0 }
 0x101   :  { %v396_v19 = vadd.f32 %v1698_v40, %v395_v17  ;;  %v524_v20 = vadd.f32 %v1698_v40, %v523_v18  ;;  %v635_v25 = vmax.f32 %v393_v11, 0.0  ;;  %v667_v26 = vmax.f32 %v521_v12, 0.0 }
 0x102   :  { %v638_v23 = vmax.f32 %v404_v15, 0.0  ;;  %v670_v24 = vmax.f32 %v532_v16, 0.0 }
 0x103   :  { %v636_v27 = vmax.f32 %v396_v19, 0.0  ;;  %v668_v28 = vmax.f32 %v524_v20, 0.0 }
 0x104   :  { %v1206_v29 = vpack.c.bf16 %v638_v23, %v637_v21  ;;  %v1286_v30 = vpack.c.bf16 %v670_v24, %v669_v22 }
 0x105   :  { %v1201_v31 = vpack.c.bf16 %v636_v27, %v635_v25  ;;  %v1281_v32 = vpack.c.bf16 %v668_v28, %v667_v26  ;;  %v1445_v33 = vpop.f32.mrb[8].mxu0  ;;  %v1477_v34 = vpop.f32.mrb[8].mxu1 }
 0x106   :  { %1350 = vst [vmem:[%s1863_s3 + $0x18] sm:$0xff] %v1206_v29   ;;  %1366 = vst [vmem:[%s1863_s3 + $0x98] sm:$0xff] %v1286_v30   ;;  %v417_v35 = vadd.f32 %v1445_v33, %v1698_v40  ;;  %v545_v36 = vadd.f32 %v1477_v34, %v1698_v40  ;;  %v408_v37 = vpop.f32.mrb[9].mxu0  ;;  %v536_v38 = vpop.f32.mrb[9].mxu1 }
 0x107   :  { %1349 = vst [vmem:[%s1863_s3 + $0x10] sm:$0xff] %v1201_v31   ;;  %1365 = vst [vmem:[%s1863_s3 + $0x90] sm:$0xff] %v1281_v32   ;;  %v409_v39 = vadd.f32 %v1698_v40, %v408_v37  ;;  %v537_v41 = vadd.f32 %v1698_v40, %v536_v38  ;;  %v1446_v42 = vpop.f32.mrb[10].mxu0  ;;  %v1478_v43 = vpop.f32.mrb[10].mxu1 }
 0x108   :  { %v420_v44 = vadd.f32 %v1446_v42, %v1698_v40  ;;  %v548_v45 = vadd.f32 %v1478_v43, %v1698_v40  ;;  %v411_v46 = vpop.f32.mrb[11].mxu0  ;;  %v539_v47 = vpop.f32.mrb[11].mxu1  ;;  %v641_v50 = vmax.f32 %v417_v35, 0.0  ;;  %v673_v51 = vmax.f32 %v545_v36, 0.0 }
 0x109   :  { %v412_v48 = vadd.f32 %v1698_v40, %v411_v46  ;;  %v540_v49 = vadd.f32 %v1698_v40, %v539_v47  ;;  %v639_v54 = vmax.f32 %v409_v39, 0.0  ;;  %v671_v55 = vmax.f32 %v537_v41, 0.0 }
 0x10a   :  { %v642_v52 = vmax.f32 %v420_v44, 0.0  ;;  %v674_v53 = vmax.f32 %v548_v45, 0.0 }
 0x10b   :  { %v640_v56 = vmax.f32 %v412_v48, 0.0  ;;  %v672_v57 = vmax.f32 %v540_v49, 0.0 }
 0x10c   :  { %v1216_v58 = vpack.c.bf16 %v642_v52, %v641_v50  ;;  %v1296_v59 = vpack.c.bf16 %v674_v53, %v673_v51 }
 0x10d   :  { %v1211_v60 = vpack.c.bf16 %v640_v56, %v639_v54  ;;  %v1291_v61 = vpack.c.bf16 %v672_v57, %v671_v55  ;;  %v1449_v62 = vpop.f32.mrb[12].mxu0  ;;  %v1481_v63 = vpop.f32.mrb[12].mxu1 }
 0x10e   :  { %1352 = vst [vmem:[%s1863_s3 + $0x28] sm:$0xff] %v1216_v58   ;;  %1368 = vst [vmem:[%s1863_s3 + $0xa8] sm:$0xff] %v1296_v59   ;;  %v433_v0 = vadd.f32 %v1449_v62, %v1698_v40  ;;  %v561_v1 = vadd.f32 %v1481_v63, %v1698_v40  ;;  %v424_v2 = vpop.f32.mrb[13].mxu0  ;;  %v552_v3 = vpop.f32.mrb[13].mxu1 }
 0x10f   :  { %1351 = vst [vmem:[%s1863_s3 + $0x20] sm:$0xff] %v1211_v60   ;;  %1367 = vst [vmem:[%s1863_s3 + $0xa0] sm:$0xff] %v1291_v61   ;;  %v425_v4 = vadd.f32 %v1698_v40, %v424_v2  ;;  %v553_v5 = vadd.f32 %v1698_v40, %v552_v3  ;;  %v1450_v6 = vpop.f32.mrb[14].mxu0  ;;  %v1482_v7 = vpop.f32.mrb[14].mxu1 }
 0x110   :  { %v436_v8 = vadd.f32 %v1450_v6, %v1698_v40  ;;  %v564_v9 = vadd.f32 %v1482_v7, %v1698_v40  ;;  %v427_v10 = vpop.f32.mrb[15].mxu0  ;;  %v555_v11 = vpop.f32.mrb[15].mxu1  ;;  %v645_v14 = vmax.f32 %v433_v0, 0.0  ;;  %v677_v15 = vmax.f32 %v561_v1, 0.0 }
 0x111   :  { %v428_v12 = vadd.f32 %v1698_v40, %v427_v10  ;;  %v556_v13 = vadd.f32 %v1698_v40, %v555_v11  ;;  %v643_v18 = vmax.f32 %v425_v4, 0.0  ;;  %v675_v19 = vmax.f32 %v553_v5, 0.0 }
 0x112   :  { %v646_v16 = vmax.f32 %v436_v8, 0.0  ;;  %v678_v17 = vmax.f32 %v564_v9, 0.0 }
 0x113   :  { %v644_v20 = vmax.f32 %v428_v12, 0.0  ;;  %v676_v21 = vmax.f32 %v556_v13, 0.0 }
 0x114   :  { %v1226_v22 = vpack.c.bf16 %v646_v16, %v645_v14  ;;  %v1306_v23 = vpack.c.bf16 %v678_v17, %v677_v15 }
 0x115   :  { %v1221_v24 = vpack.c.bf16 %v644_v20, %v643_v18  ;;  %v1301_v25 = vpack.c.bf16 %v676_v21, %v675_v19  ;;  %v1453_v26 = vpop.f32.mrb[16].mxu0  ;;  %v1485_v27 = vpop.f32.mrb[16].mxu1 }
 0x116   :  { %1354 = vst [vmem:[%s1863_s3 + $0x38] sm:$0xff] %v1226_v22   ;;  %1370 = vst [vmem:[%s1863_s3 + $0xb8] sm:$0xff] %v1306_v23   ;;  %v449_v28 = vadd.f32 %v1453_v26, %v1698_v40  ;;  %v577_v29 = vadd.f32 %v1485_v27, %v1698_v40  ;;  %v440_v30 = vpop.f32.mrb[17].mxu0  ;;  %v568_v31 = vpop.f32.mrb[17].mxu1 }
 0x117   :  { %1353 = vst [vmem:[%s1863_s3 + $0x30] sm:$0xff] %v1221_v24   ;;  %1369 = vst [vmem:[%s1863_s3 + $0xb0] sm:$0xff] %v1301_v25   ;;  %v441_v32 = vadd.f32 %v1698_v40, %v440_v30  ;;  %v569_v33 = vadd.f32 %v1698_v40, %v568_v31  ;;  %v1454_v34 = vpop.f32.mrb[18].mxu0  ;;  %v1486_v35 = vpop.f32.mrb[18].mxu1 }
 0x118   :  { %v452_v36 = vadd.f32 %v1454_v34, %v1698_v40  ;;  %v580_v37 = vadd.f32 %v1486_v35, %v1698_v40  ;;  %v443_v38 = vpop.f32.mrb[19].mxu0  ;;  %v571_v39 = vpop.f32.mrb[19].mxu1  ;;  %v649_v43 = vmax.f32 %v449_v28, 0.0  ;;  %v681_v44 = vmax.f32 %v577_v29, 0.0 }
 0x119   :  { %v444_v41 = vadd.f32 %v1698_v40, %v443_v38  ;;  %v572_v42 = vadd.f32 %v1698_v40, %v571_v39  ;;  %v647_v47 = vmax.f32 %v441_v32, 0.0  ;;  %v679_v48 = vmax.f32 %v569_v33, 0.0 }
 0x11a   :  { %v650_v45 = vmax.f32 %v452_v36, 0.0  ;;  %v682_v46 = vmax.f32 %v580_v37, 0.0 }
 0x11b   :  { %v648_v49 = vmax.f32 %v444_v41, 0.0  ;;  %v680_v50 = vmax.f32 %v572_v42, 0.0 }
 0x11c   :  { %v1236_v51 = vpack.c.bf16 %v650_v45, %v649_v43  ;;  %v1316_v52 = vpack.c.bf16 %v682_v46, %v681_v44 }
 0x11d   :  { %v1231_v53 = vpack.c.bf16 %v648_v49, %v647_v47  ;;  %v1311_v54 = vpack.c.bf16 %v680_v50, %v679_v48  ;;  %v1457_v55 = vpop.f32.mrb[20].mxu0  ;;  %v1489_v56 = vpop.f32.mrb[20].mxu1 }
 0x11e   :  { %1356 = vst [vmem:[%s1863_s3 + $0x48] sm:$0xff] %v1236_v51   ;;  %1372 = vst [vmem:[%s1863_s3 + $0xc8] sm:$0xff] %v1316_v52   ;;  %v465_v57 = vadd.f32 %v1457_v55, %v1698_v40  ;;  %v593_v58 = vadd.f32 %v1489_v56, %v1698_v40  ;;  %v456_v59 = vpop.f32.mrb[21].mxu0  ;;  %v584_v60 = vpop.f32.mrb[21].mxu1 }
 0x11f   :  { %1355 = vst [vmem:[%s1863_s3 + $0x40] sm:$0xff] %v1231_v53   ;;  %1371 = vst [vmem:[%s1863_s3 + $0xc0] sm:$0xff] %v1311_v54   ;;  %v457_v61 = vadd.f32 %v1698_v40, %v456_v59  ;;  %v585_v62 = vadd.f32 %v1698_v40, %v584_v60  ;;  %v1458_v63 = vpop.f32.mrb[22].mxu0  ;;  %v1490_v0 = vpop.f32.mrb[22].mxu1 }
 0x120   :  { %v468_v1 = vadd.f32 %v1458_v63, %v1698_v40  ;;  %v596_v2 = vadd.f32 %v1490_v0, %v1698_v40  ;;  %v459_v3 = vpop.f32.mrb[23].mxu0  ;;  %v587_v4 = vpop.f32.mrb[23].mxu1  ;;  %v653_v7 = vmax.f32 %v465_v57, 0.0  ;;  %v685_v8 = vmax.f32 %v593_v58, 0.0 }
 0x121   :  { %v460_v5 = vadd.f32 %v1698_v40, %v459_v3  ;;  %v588_v6 = vadd.f32 %v1698_v40, %v587_v4  ;;  %v651_v11 = vmax.f32 %v457_v61, 0.0  ;;  %v683_v12 = vmax.f32 %v585_v62, 0.0 }
 0x122   :  { %v654_v9 = vmax.f32 %v468_v1, 0.0  ;;  %v686_v10 = vmax.f32 %v596_v2, 0.0 }
 0x123   :  { %v652_v13 = vmax.f32 %v460_v5, 0.0  ;;  %v684_v14 = vmax.f32 %v588_v6, 0.0 }
 0x124   :  { %v1246_v15 = vpack.c.bf16 %v654_v9, %v653_v7  ;;  %v1326_v16 = vpack.c.bf16 %v686_v10, %v685_v8 }
 0x125   :  { %v1241_v17 = vpack.c.bf16 %v652_v13, %v651_v11  ;;  %v1321_v18 = vpack.c.bf16 %v684_v14, %v683_v12  ;;  %v1461_v19 = vpop.f32.mrb[24].mxu0  ;;  %v1493_v20 = vpop.f32.mrb[24].mxu1 }
 0x126   :  { %1358 = vst [vmem:[%s1863_s3 + $0x58] sm:$0xff] %v1246_v15   ;;  %1374 = vst [vmem:[%s1863_s3 + $0xd8] sm:$0xff] %v1326_v16   ;;  %v481_v21 = vadd.f32 %v1461_v19, %v1698_v40  ;;  %v609_v22 = vadd.f32 %v1493_v20, %v1698_v40  ;;  %v472_v23 = vpop.f32.mrb[25].mxu0  ;;  %v600_v24 = vpop.f32.mrb[25].mxu1 }
 0x127   :  { %1357 = vst [vmem:[%s1863_s3 + $0x50] sm:$0xff] %v1241_v17   ;;  %1373 = vst [vmem:[%s1863_s3 + $0xd0] sm:$0xff] %v1321_v18   ;;  %v473_v25 = vadd.f32 %v1698_v40, %v472_v23  ;;  %v601_v26 = vadd.f32 %v1698_v40, %v600_v24  ;;  %v1462_v27 = vpop.f32.mrb[26].mxu0  ;;  %v1494_v28 = vpop.f32.mrb[26].mxu1 }
 0x128   :  { %v484_v29 = vadd.f32 %v1462_v27, %v1698_v40  ;;  %v612_v30 = vadd.f32 %v1494_v28, %v1698_v40  ;;  %v475_v31 = vpop.f32.mrb[27].mxu0  ;;  %v603_v32 = vpop.f32.mrb[27].mxu1  ;;  %v657_v35 = vmax.f32 %v481_v21, 0.0  ;;  %v689_v36 = vmax.f32 %v609_v22, 0.0 }
 0x129   :  { %v476_v33 = vadd.f32 %v1698_v40, %v475_v31  ;;  %v604_v34 = vadd.f32 %v1698_v40, %v603_v32  ;;  %v655_v39 = vmax.f32 %v473_v25, 0.0  ;;  %v687_v41 = vmax.f32 %v601_v26, 0.0 }
 0x12a   :  { %v658_v37 = vmax.f32 %v484_v29, 0.0  ;;  %v690_v38 = vmax.f32 %v612_v30, 0.0 }
 0x12b   :  { %v656_v42 = vmax.f32 %v476_v33, 0.0  ;;  %v688_v43 = vmax.f32 %v604_v34, 0.0 }
 0x12c   :  { %v1256_v44 = vpack.c.bf16 %v658_v37, %v657_v35  ;;  %v1336_v45 = vpack.c.bf16 %v690_v38, %v689_v36 }
 0x12d   :  { %v1251_v46 = vpack.c.bf16 %v656_v42, %v655_v39  ;;  %v1331_v47 = vpack.c.bf16 %v688_v43, %v687_v41  ;;  %v1465_v48 = vpop.f32.mrb[28].mxu0  ;;  %v1497_v49 = vpop.f32.mrb[28].mxu1 }
 0x12e   :  { %1360 = vst [vmem:[%s1863_s3 + $0x68] sm:$0xff] %v1256_v44   ;;  %1376 = vst [vmem:[%s1863_s3 + $0xe8] sm:$0xff] %v1336_v45   ;;  %v497_v50 = vadd.f32 %v1465_v48, %v1698_v40  ;;  %v625_v51 = vadd.f32 %v1497_v49, %v1698_v40  ;;  %v488_v52 = vpop.f32.mrb[29].mxu0  ;;  %v616_v53 = vpop.f32.mrb[29].mxu1 }
 0x12f   :  { %1359 = vst [vmem:[%s1863_s3 + $0x60] sm:$0xff] %v1251_v46   ;;  %1375 = vst [vmem:[%s1863_s3 + $0xe0] sm:$0xff] %v1331_v47   ;;  %v489_v54 = vadd.f32 %v1698_v40, %v488_v52  ;;  %v617_v55 = vadd.f32 %v1698_v40, %v616_v53  ;;  %v1466_v56 = vpop.f32.mrb[30].mxu0  ;;  %v1498_v57 = vpop.f32.mrb[30].mxu1 }
 0x130   :  { %v500_v58 = vadd.f32 %v1466_v56, %v1698_v40  ;;  %v628_v59 = vadd.f32 %v1498_v57, %v1698_v40  ;;  %v491_v60 = vpop.f32.mrb[31].mxu0  ;;  %v619_v61 = vpop.f32.mrb[31].mxu1  ;;  %v661_v0 = vmax.f32 %v497_v50, 0.0  ;;  %v693_v1 = vmax.f32 %v625_v51, 0.0 }
 0x131   :  { %v492_v62 = vadd.f32 %v1698_v40, %v491_v60  ;;  %v620_v63 = vadd.f32 %v1698_v40, %v619_v61  ;;  %v659_v4 = vmax.f32 %v489_v54, 0.0  ;;  %v691_v5 = vmax.f32 %v617_v55, 0.0 }
 0x132   :  { %v662_v2 = vmax.f32 %v500_v58, 0.0  ;;  %v694_v3 = vmax.f32 %v628_v59, 0.0 }
 0x133   :  { %v660_v6 = vmax.f32 %v492_v62, 0.0  ;;  %v692_v7 = vmax.f32 %v620_v63, 0.0 }
 0x134   :  { %v1266_v8 = vpack.c.bf16 %v662_v2, %v661_v0  ;;  %v1346_v9 = vpack.c.bf16 %v694_v3, %v693_v1 }
 0x135   :  { %v1261_v10 = vpack.c.bf16 %v660_v6, %v659_v4  ;;  %v1341_v11 = vpack.c.bf16 %v692_v7, %v691_v5 }
 0x136   :  { %1362 = vst [vmem:[%s1863_s3 + $0x78] sm:$0xff] %v1266_v8   ;;  %1378 = vst [vmem:[%s1863_s3 + $0xf8] sm:$0xff] %v1346_v9  }
 0x137   :  { %1361 = vst [vmem:[%s1863_s3 + $0x70] sm:$0xff] %v1261_v10   ;;  %1377 = vst [vmem:[%s1863_s3 + $0xf0] sm:$0xff] %v1341_v11  }

// kernel: forward.8
= control target key start
LH: loop header
LB: loop body
LE: loop exit
PB: predicated region body
PF: predicated region fallthrough
CT: control target
= control target key end

     0   :  { %s761_s1 = inlined_call_operand.vmem [shape: bf16[512,128], index: 1, kind: input, shape index: {}]   ;;  %s762_s0 = inlined_call_operand.vmem [shape: bf16[32,512], index: 0, kind: input, shape index: {}]   ;;  %s763_s2 = inlined_call_operand.vmem [shape: f32[1,128], index: 2, kind: input, shape index: {}]   ;;  %s764_s3 = inlined_call_operand.vmem [shape: bf16[32,128], index: 3, kind: output, shape index: {}]  }
   0x1   :  { %v568_v0 = vld [vmem:[%s761_s1 + $0x40] sm:$0xff]   ;;  %v572_v4 = vld [vmem:[%s761_s1 + $0x48] sm:$0xff]   ;;  %v576_v8 = vld [vmem:[%s761_s1 + $0x50] sm:$0xff]  }
   0x2   :  { %v569_v1 = vld [vmem:[%s761_s1 + $0xc0] sm:$0xff]   ;;  %512 = vmatprep.subr.bf16.mxu0 %v568_v0  ;;  %v573_v5 = vld [vmem:[%s761_s1 + $0xc8] sm:$0xff]   ;;  %v577_v9 = vld [vmem:[%s761_s1 + $0xd0] sm:$0xff]  }
   0x3   :  { %v570_v2 = vld [vmem:[%s761_s1] sm:$0xff]   ;;  %540 = vmatprep.subr.bf16.mxu1 %v569_v1  ;;  %v574_v6 = vld [vmem:[%s761_s1 + $0x8] sm:$0xff]   ;;  %v578_v10 = vld [vmem:[%s761_s1 + $0x10] sm:$0xff]  }
   0x4   :  { %v571_v3 = vld [vmem:[%s761_s1 + $0x80] sm:$0xff]   ;;  %513 = vmatpush3.bf16.msra.mxu0 %v570_v2  ;;  %v575_v7 = vld [vmem:[%s761_s1 + $0x88] sm:$0xff]   ;;  %v579_v11 = vld [vmem:[%s761_s1 + $0x90] sm:$0xff]  }
   0x5   :  { %541 = vmatpush3.bf16.msra.mxu1 %v571_v3  ;;  %514 = vmatprep.subr.bf16.mxu0 %v572_v4  ;;  %v580_v12 = vld [vmem:[%s761_s1 + $0x58] sm:$0xff]   ;;  %v584_v16 = vld [vmem:[%s761_s1 + $0x60] sm:$0xff]   ;;  %v588_v20 = vld [vmem:[%s761_s1 + $0x68] sm:$0xff]  }
   0x6   :  { %542 = vmatprep.subr.bf16.mxu1 %v573_v5  ;;  %v581_v13 = vld [vmem:[%s761_s1 + $0xd8] sm:$0xff]   ;;  %v585_v17 = vld [vmem:[%s761_s1 + $0xe0] sm:$0xff]   ;;  %v589_v21 = vld [vmem:[%s761_s1 + $0xe8] sm:$0xff]  }
   0x7   :  { %v582_v14 = vld [vmem:[%s761_s1 + $0x18] sm:$0xff]   ;;  %v586_v18 = vld [vmem:[%s761_s1 + $0x20] sm:$0xff]   ;;  %v590_v22 = vld [vmem:[%s761_s1 + $0x28] sm:$0xff]  }
   0x8   :  { %515 = vmatpush3.bf16.msra.mxu0 %v574_v6  ;;  %v583_v15 = vld [vmem:[%s761_s1 + $0x98] sm:$0xff]   ;;  %v587_v19 = vld [vmem:[%s761_s1 + $0xa0] sm:$0xff]   ;;  %v591_v23 = vld [vmem:[%s761_s1 + $0xa8] sm:$0xff]  }
   0x9   :  { %543 = vmatpush3.bf16.msra.mxu1 %v575_v7  ;;  %516 = vmatprep.subr.bf16.mxu0 %v576_v8  ;;  %v592_v24 = vld [vmem:[%s761_s1 + $0x70] sm:$0xff]   ;;  %v596_v28 = vld [vmem:[%s761_s1 + $0x78] sm:$0xff]   ;;  %v452_v42 = vld [vmem:[%s763_s2] ss:$0 sm:$0xff] }
   0xa   :  { %544 = vmatprep.subr.bf16.mxu1 %v577_v9  ;;  %v593_v25 = vld [vmem:[%s761_s1 + $0xf0] sm:$0xff]   ;;  %v597_v29 = vld [vmem:[%s761_s1 + $0xf8] sm:$0xff]  }
   0xb   :  { %v594_v26 = vld [vmem:[%s761_s1 + $0x30] sm:$0xff]   ;;  %v598_v30 = vld [vmem:[%s761_s1 + $0x38] sm:$0xff]  }
   0xc   :  { %517 = vmatpush3.bf16.msra.mxu0 %v578_v10  ;;  %v595_v27 = vld [vmem:[%s761_s1 + $0xb0] sm:$0xff]   ;;  %v599_v31 = vld [vmem:[%s761_s1 + $0xb8] sm:$0xff]  }
   0xd   :  { %545 = vmatpush3.bf16.msra.mxu1 %v579_v11  ;;  %518 = vmatprep.subr.bf16.mxu0 %v580_v12  ;;  %v600_v32 = vld [vmem:[%s762_s0] ss:$16 sps:$4 sm:$0xff]   ;;  %v602_v33 = vld [vmem:[%s762_s0 + $0x4] ss:$16 sps:$4 sm:$0xff]   ;;  %v603_v34 = vld [vmem:[%s762_s0 + $0x8] ss:$16 sps:$4 sm:$0xff]  }
   0xe   :  { %546 = vmatprep.subr.bf16.mxu1 %v581_v13  ;;  %v605_v35 = vld [vmem:[%s762_s0 + $0xc] ss:$16 sps:$4 sm:$0xff]   ;;  %358 = vmatprep.mubr.bf16.mxu0 %v602_v33  ;;  %v606_v36 = vld [vmem:[%s762_s0 + $0x24] ss:$16 sps:$4 sm:$0xff]   ;;  %v610_v38 = vld [vmem:[%s762_s0 + $0x20] ss:$16 sps:$4 sm:$0xff]  }
   0xf   :  { %407 = vmatprep.mubr.bf16.mxu1 %v605_v35  ;;  %v608_v37 = vld [vmem:[%s762_s0 + $0x2c] ss:$16 sps:$4 sm:$0xff]   ;;  %v611_v39 = vld [vmem:[%s762_s0 + $0x28] ss:$16 sps:$4 sm:$0xff]  }
  0x10   :  { %519 = vmatpush3.bf16.msra.mxu0 %v582_v14 }
  0x11   :  { %547 = vmatpush3.bf16.msra.mxu1 %v583_v15  ;;  %520 = vmatprep.subr.bf16.mxu0 %v584_v16 }
  0x12   :  { %548 = vmatprep.subr.bf16.mxu1 %v585_v17 }
  0x14   :  { %521 = vmatpush3.bf16.msra.mxu0 %v586_v18 }
  0x15   :  { %549 = vmatpush3.bf16.msra.mxu1 %v587_v19  ;;  %522 = vmatprep.subr.bf16.mxu0 %v588_v20 }
  0x16   :  { %550 = vmatprep.subr.bf16.mxu1 %v589_v21 }
  0x18   :  { %523 = vmatpush3.bf16.msra.mxu0 %v590_v22 }
  0x19   :  { %551 = vmatpush3.bf16.msra.mxu1 %v591_v23  ;;  %524 = vmatprep.subr.bf16.mxu0 %v592_v24 }
  0x1a   :  { %552 = vmatprep.subr.bf16.mxu1 %v593_v25 }
  0x1c   :  { %525 = vmatpush3.bf16.msra.mxu0 %v594_v26 }
  0x1d   :  { %553 = vmatpush3.bf16.msra.mxu1 %v595_v27  ;;  %526 = vmatprep.subr.bf16.mxu0 %v596_v28 }
  0x1e   :  { %554 = vmatprep.subr.bf16.mxu1 %v597_v29 }
  0x20   :  { %527 = vmatpush3.bf16.msra.mxu0 %v598_v30 }
  0x21   :  { %555 = vmatpush3.bf16.msra.mxu1 %v599_v31 }
  0x23   :  { %359 = vmatmul.mubr.bf16.vlgmr.msra.gmra.mrb[0].mxu0 %v600_v32 }
  0x24   :  { %408 = vmatmul.mubr.bf16.vlgmr.msra.gmra.mrb[0].mxu1 %v603_v34  ;;  %366 = vmatprep.mubr.bf16.mxu0 %v606_v36 }
  0x25   :  { %415 = vmatprep.mubr.bf16.mxu1 %v608_v37 }
  0x2b   :  { %367 = vmatmul.mubr.bf16.gmra.mrb[4].mxu0 %v610_v38 }
  0x2c   :  { %416 = vmatmul.mubr.bf16.gmra.mrb[4].mxu1 %v611_v39 }
  0xf6   :  { %v528_v40 = vpop.f32.mrb[0].mxu0 }
  0xf7   :  { %v556_v41 = vpop.f32.mrb[0].mxu1  ;;  %v529_v43 = vpop.f32.mrb[1].mxu0 }
  0xf8   :  { %v530_v44 = vadd.f32 %v529_v43, %v528_v40  ;;  %v557_v45 = vpop.f32.mrb[1].mxu1  ;;  %v531_v46 = vpop.f32.mrb[2].mxu0 }
  0xf9   :  { %v558_v47 = vadd.f32 %v557_v45, %v556_v41  ;;  %v559_v48 = vpop.f32.mrb[2].mxu1  ;;  %v532_v49 = vpop.f32.mrb[3].mxu0 }
  0xfa   :  { %v361_v50 = vadd.f32 %v530_v44, %v452_v42  ;;  %v533_v51 = vadd.f32 %v532_v49, %v531_v46  ;;  %v560_v52 = vpop.f32.mrb[3].mxu1 }
  0xfb   :  { %v561_v53 = vadd.f32 %v560_v52, %v559_v48 }
  0xfc   :  { %v410_v54 = vadd.f32 %v558_v47, %v361_v50  ;;  %v364_v55 = vadd.f32 %v533_v51, %v452_v42 }
  0xfe   :  { %v413_v56 = vadd.f32 %v561_v53, %v364_v55  ;;  %v534_v57 = vpop.f32.mrb[4].mxu0  ;;  %v424_v60 = vmax.f32 %v410_v54, 0.0 }
  0xff   :  { %v562_v58 = vpop.f32.mrb[4].mxu1  ;;  %v535_v59 = vpop.f32.mrb[5].mxu0 }
 0x100   :  { %v425_v61 = vmax.f32 %v413_v56, 0.0  ;;  %v536_v62 = vadd.f32 %v535_v59, %v534_v57  ;;  %v563_v63 = vpop.f32.mrb[5].mxu1  ;;  %v537_v0 = vpop.f32.mrb[6].mxu0 }
 0x101   :  { %v564_v1 = vadd.f32 %v563_v63, %v562_v58  ;;  %v565_v2 = vpop.f32.mrb[6].mxu1  ;;  %v538_v3 = vpop.f32.mrb[7].mxu0 }
 0x102   :  { %v504_v4 = vpack.c.bf16 %v425_v61, %v424_v60  ;;  %v369_v5 = vadd.f32 %v536_v62, %v452_v42  ;;  %v539_v6 = vadd.f32 %v538_v3, %v537_v0  ;;  %v566_v7 = vpop.f32.mrb[7].mxu1 }
 0x103   :  { %v567_v8 = vadd.f32 %v566_v7, %v565_v2 }
 0x104   :  { %505 = vst [vmem:[%s764_s3] sm:$0xff] %v504_v4   ;;  %v418_v9 = vadd.f32 %v564_v1, %v369_v5  ;;  %v372_v10 = vadd.f32 %v539_v6, %v452_v42 }
 0x106   :  { %v421_v11 = vadd.f32 %v567_v8, %v372_v10  ;;  %v426_v12 = vmax.f32 %v418_v9, 0.0 }
 0x108   :  { %v427_v13 = vmax.f32 %v421_v11, 0.0 }
 0x10a   :  { %v509_v14 = vpack.c.bf16 %v427_v13, %v426_v12 }
 0x10c   :  { %511 = vst [vmem:[%s764_s3 + $0x8] sm:$0xff] %v509_v14  }

// kernel: forward.9
= control target key start
LH: loop header
LB: loop body
LE: loop exit
PB: predicated region body
PF: predicated region fallthrough
CT: control target
= control target key end

     0   :  { %s1542_s3 = inlined_call_operand.vmem [shape: bf16[128,128], index: 3, kind: input, shape index: {}]   ;;  %s1543_s1 = inlined_call_operand.vmem [shape: bf16[896,128], index: 1, kind: input, shape index: {}]   ;;  %s1544_s2 = inlined_call_operand.vmem [shape: bf16[32,128], index: 2, kind: input, shape index: {}]   ;;  %s1545_s0 = inlined_call_operand.vmem [shape: bf16[32,896], index: 0, kind: input, shape index: {}]   ;;  %s1546_s4 = inlined_call_operand.vmem [shape: f32[1,128], index: 4, kind: input, shape index: {}]   ;;  %s1547_s5 = inlined_call_operand.vmem [shape: bf16[32,128], index: 5, kind: output, shape index: {}]  }
   0x1   :  { %v1177_v0 = vld [vmem:[%s1542_s3] sm:$0xff]   ;;  %v1180_v3 = vld [vmem:[%s1542_s3 + $0x8] sm:$0xff]   ;;  %v1183_v6 = vld [vmem:[%s1542_s3 + $0x10] sm:$0xff]  }
   0x2   :  { %v1178_v1 = vld [vmem:[%s1543_s1 + $0x40] sm:$0xff]   ;;  %1121 = vmatprep.subr.bf16.mxu0 %v1177_v0  ;;  %v1181_v4 = vld [vmem:[%s1543_s1 + $0x48] sm:$0xff]   ;;  %v1184_v7 = vld [vmem:[%s1543_s1 + $0x50] sm:$0xff]  }
   0x3   :  { %v1179_v2 = vld [vmem:[%s1543_s1] sm:$0xff]   ;;  %1122 = vmatpush3.bf16.msra.mxu0 %v1177_v0  ;;  %1027 = vmatprep.subr.bf16.mxu1 %v1178_v1  ;;  %v1182_v5 = vld [vmem:[%s1543_s1 + $0x8] sm:$0xff]   ;;  %v1185_v8 = vld [vmem:[%s1543_s1 + $0x10] sm:$0xff]  }
   0x4   :  { %1028 = vmatpush3.bf16.msra.mxu1 %v1179_v2  ;;  %1123 = vmatprep.subr.bf16.mxu0 %v1180_v3  ;;  %v1186_v9 = vld [vmem:[%s1542_s3 + $0x18] sm:$0xff]   ;;  %v1189_v12 = vld [vmem:[%s1542_s3 + $0x20] sm:$0xff]   ;;  %v1192_v15 = vld [vmem:[%s1542_s3 + $0x28] sm:$0xff]  }
   0x5   :  { %1029 = vmatprep.subr.bf16.mxu1 %v1181_v4  ;;  %v1187_v10 = vld [vmem:[%s1543_s1 + $0x58] sm:$0xff]   ;;  %v1190_v13 = vld [vmem:[%s1543_s1 + $0x60] sm:$0xff]   ;;  %v1193_v16 = vld [vmem:[%s1543_s1 + $0x68] sm:$0xff]  }
   0x6   :  { %v1188_v11 = vld [vmem:[%s1543_s1 + $0x18] sm:$0xff]   ;;  %v1191_v14 = vld [vmem:[%s1543_s1 + $0x20] sm:$0xff]   ;;  %v1194_v17 = vld [vmem:[%s1543_s1 + $0x28] sm:$0xff]  }
   0x7   :  { %1124 = vmatpush3.bf16.msra.mxu0 %v1180_v3  ;;  %v1195_v18 = vld [vmem:[%s1542_s3 + $0x30] sm:$0xff]   ;;  %v1198_v21 = vld [vmem:[%s1542_s3 + $0x38] sm:$0xff]   ;;  %v1201_v22 = vld [vmem:[%s1544_s2] sm:$0xff]  }
   0x8   :  { %1030 = vmatpush3.bf16.msra.mxu1 %v1182_v5  ;;  %1125 = vmatprep.subr.bf16.mxu0 %v1183_v6  ;;  %v1196_v19 = vld [vmem:[%s1543_s1 + $0x70] sm:$0xff]   ;;  %v1199_v23 = vld [vmem:[%s1543_s1 + $0x78] sm:$0xff]   ;;  %v1202_v25 = vld [vmem:[%s1543_s1 + $0xc0] sm:$0xff]  }
   0x9   :  { %1031 = vmatprep.subr.bf16.mxu1 %v1184_v7  ;;  %v1197_v20 = vld [vmem:[%s1543_s1 + $0x30] sm:$0xff]   ;;  %v1200_v24 = vld [vmem:[%s1543_s1 + $0x38] sm:$0xff]   ;;  %1137 = vmatprep.mubr.bf16.mxu0 %v1201_v22  ;;  %v1203_v26 = vld [vmem:[%s1544_s2 + $0x8] sm:$0xff]  }
   0xa   :  { %v1204_v27 = vld [vmem:[%s1543_s1 + $0x80] sm:$0xff]   ;;  %v1210_v32 = vld [vmem:[%s1543_s1 + $0xc8] sm:$0xff]   ;;  %v1214_v36 = vld [vmem:[%s1543_s1 + $0xd0] sm:$0xff]  }
   0xb   :  { %1126 = vmatpush3.bf16.msra.mxu0 %v1183_v6  ;;  %v1205_v28 = vld [vmem:[%s1545_s0] ss:$28 sps:$4 sm:$0xff]   ;;  %v1211_v33 = vld [vmem:[%s1543_s1 + $0x88] sm:$0xff]   ;;  %v1215_v37 = vld [vmem:[%s1543_s1 + $0x90] sm:$0xff]  }
   0xc   :  { %1032 = vmatpush3.bf16.msra.mxu1 %v1185_v8  ;;  %1127 = vmatprep.subr.bf16.mxu0 %v1186_v9  ;;  %v1207_v29 = vld [vmem:[%s1545_s0 + $0x4] ss:$28 sps:$4 sm:$0xff]   ;;  %v1212_v34 = vld [vmem:[%s1543_s1 + $0x148] sm:$0xff]   ;;  %v1216_v38 = vld [vmem:[%s1543_s1 + $0x150] sm:$0xff]  }
   0xd   :  { %1033 = vmatprep.subr.bf16.mxu1 %v1187_v10  ;;  %v1208_v30 = vld [vmem:[%s1543_s1 + $0x140] sm:$0xff]   ;;  %718 = vmatprep.mubr.bf16.mxu1 %v1207_v29  ;;  %v1213_v35 = vld [vmem:[%s1543_s1 + $0x108] sm:$0xff]   ;;  %v1217_v39 = vld [vmem:[%s1543_s1 + $0x110] sm:$0xff]  }
   0xe   :  { %v1209_v31 = vld [vmem:[%s1543_s1 + $0x100] sm:$0xff]   ;;  %v1218_v40 = vld [vmem:[%s1543_s1 + $0xd8] sm:$0xff]   ;;  %v1226_v48 = vld [vmem:[%s1543_s1 + $0xe8] sm:$0xff]  }
   0xf   :  { %1128 = vmatpush3.bf16.msra.mxu0 %v1186_v9  ;;  %v1219_v41 = vld [vmem:[%s1543_s1 + $0x98] sm:$0xff]   ;;  %v1222_v44 = vld [vmem:[%s1543_s1 + $0xe0] sm:$0xff]   ;;  %v1227_v49 = vld [vmem:[%s1543_s1 + $0xa8] sm:$0xff]  }
  0x10   :  { %1034 = vmatpush3.bf16.msra.mxu1 %v1188_v11  ;;  %1129 = vmatprep.subr.bf16.mxu0 %v1189_v12  ;;  %v1220_v42 = vld [vmem:[%s1543_s1 + $0x158] sm:$0xff]   ;;  %v1223_v45 = vld [vmem:[%s1543_s1 + $0xa0] sm:$0xff]   ;;  %v1228_v50 = vld [vmem:[%s1543_s1 + $0x168] sm:$0xff]  }
  0x11   :  { %1035 = vmatprep.subr.bf16.mxu1 %v1190_v13  ;;  %v1221_v43 = vld [vmem:[%s1543_s1 + $0x118] sm:$0xff]   ;;  %v1224_v46 = vld [vmem:[%s1543_s1 + $0x160] sm:$0xff]   ;;  %v1229_v51 = vld [vmem:[%s1543_s1 + $0x128] sm:$0xff]  }
  0x12   :  { %v1225_v47 = vld [vmem:[%s1543_s1 + $0x120] sm:$0xff]   ;;  %v1230_v52 = vld [vmem:[%s1543_s1 + $0xf0] sm:$0xff]   ;;  %v1231_v53 = vld [vmem:[%s1545_s0 + $0x3c] ss:$28 sps:$4 sm:$0xff]  }
  0x13   :  { %1130 = vmatpush3.bf16.msra.mxu0 %v1189_v12  ;;  %v1233_v54 = vld [vmem:[%s1543_s1 + $0xb0] sm:$0xff]   ;;  %v1237_v58 = vld [vmem:[%s1543_s1 + $0xf8] sm:$0xff]   ;;  %v1240_v61 = vld [vmem:[%s1545_s0 + $0x8] ss:$28 sps:$4 sm:$0xff]  }
  0x14   :  { %1036 = vmatpush3.bf16.msra.mxu1 %v1191_v14  ;;  %1131 = vmatprep.subr.bf16.mxu0 %v1192_v15  ;;  %v1234_v55 = vld [vmem:[%s1545_s0 + $0x38] ss:$28 sps:$4 sm:$0xff]   ;;  %v1242_v62 = vld [vmem:[%s1545_s0 + $0xc] ss:$28 sps:$4 sm:$0xff]   ;;  %v1244_v0 = vld [vmem:[%s1543_s1 + $0x180] sm:$0xff]  }
  0x15   :  { %1037 = vmatprep.subr.bf16.mxu1 %v1193_v16  ;;  %v1235_v56 = vld [vmem:[%s1543_s1 + $0x170] sm:$0xff]   ;;  %v1238_v59 = vld [vmem:[%s1543_s1 + $0xb8] sm:$0xff]   ;;  %v1248_v3 = vld [vmem:[%s1543_s1 + $0x188] sm:$0xff]  }
  0x16   :  { %v1236_v57 = vld [vmem:[%s1543_s1 + $0x130] sm:$0xff]   ;;  %v1239_v60 = vld [vmem:[%s1543_s1 + $0x178] sm:$0xff]   ;;  %v1249_v4 = vld [vmem:[%s1545_s0 + $0x44] ss:$28 sps:$4 sm:$0xff]  }
  0x17   :  { %1132 = vmatpush3.bf16.msra.mxu0 %v1192_v15  ;;  %v1243_v63 = vld [vmem:[%s1543_s1 + $0x138] sm:$0xff]   ;;  %v1245_v1 = vld [vmem:[%s1545_s0 + $0x10] ss:$28 sps:$4 sm:$0xff]   ;;  %v1255_v8 = vld [vmem:[%s1545_s0 + $0x48] ss:$28 sps:$4 sm:$0xff]  }
  0x18   :  { %1038 = vmatpush3.bf16.msra.mxu1 %v1194_v17  ;;  %1133 = vmatprep.subr.bf16.mxu0 %v1195_v18  ;;  %v1247_v2 = vld [vmem:[%s1545_s0 + $0x14] ss:$28 sps:$4 sm:$0xff]   ;;  %v1253_v6 = vld [vmem:[%s1545_s0 + $0x4c] ss:$28 sps:$4 sm:$0xff]   ;;  %v1252_v7 = vld [vmem:[%s1545_s0 + $0x40] ss:$28 sps:$4 sm:$0xff]  }
  0x19   :  { %1039 = vmatprep.subr.bf16.mxu1 %v1196_v19  ;;  %v1251_v5 = vld [vmem:[%s1543_s1 + $0x190] sm:$0xff]   ;;  %v1256_v9 = vld [vmem:[%s1543_s1 + $0x198] sm:$0xff]   ;;  %v1257_v11 = vld [vmem:[%s1543_s1 + $0x1a0] sm:$0xff]  }
  0x1a   :  { %v1261_v10 = vld [vmem:[%s1545_s0 + $0x18] ss:$28 sps:$4 sm:$0xff]   ;;  %v1258_v12 = vld [vmem:[%s1543_s1 + $0x1a8] sm:$0xff]  }
  0x1b   :  { %1134 = vmatpush3.bf16.msra.mxu0 %v1195_v18  ;;  %v1259_v13 = vld [vmem:[%s1543_s1 + $0x1b0] sm:$0xff]   ;;  %v1260_v14 = vld [vmem:[%s1543_s1 + $0x1b8] sm:$0xff]  }
  0x1c   :  { %1040 = vmatpush3.bf16.msra.mxu1 %v1197_v20  ;;  %1135 = vmatprep.subr.bf16.mxu0 %v1198_v21  ;;  %v1262_v15 = vld [vmem:[%s1545_s0 + $0x50] ss:$28 sps:$4 sm:$0xff]  }
  0x1d   :  { %1041 = vmatprep.subr.bf16.mxu1 %v1199_v23 }
  0x1f   :  { %1136 = vmatpush3.bf16.msra.mxu0 %v1198_v21 }
  0x20   :  { %1042 = vmatpush3.bf16.msra.mxu1 %v1200_v24  ;;  %1055 = vmatprep.subr.bf16.mxu0 %v1202_v25 }
  0x21   :  { %1083 = vmatprep.subr.bf16.mxu1 %v1208_v30 }
  0x22   :  { %1138 = vmatmul.mubr.bf16.vlgmr.msra.gmra.mrb[0].mxu0 %v1203_v26 }
  0x23   :  { %1056 = vmatpush3.bf16.msra.mxu0 %v1204_v27  ;;  %719 = vmatmul.mubr.bf16.vlgmr.msra.gmra.mrb[0].mxu1 %v1205_v28 }
  0x24   :  { %1084 = vmatpush3.bf16.msra.mxu1 %v1209_v31  ;;  %1057 = vmatprep.subr.bf16.mxu0 %v1210_v32 }
  0x25   :  { %1085 = vmatprep.subr.bf16.mxu1 %v1212_v34  ;;  %726 = vmatprep.mubr.bf16.mxu1 %v1231_v53 }
  0x26   :  { %767 = vmatprep.mubr.bf16.mxu0 %v1242_v62 }
  0x27   :  { %1058 = vmatpush3.bf16.msra.mxu0 %v1211_v33 }
  0x28   :  { %1086 = vmatpush3.bf16.msra.mxu1 %v1213_v35  ;;  %1059 = vmatprep.subr.bf16.mxu0 %v1214_v36 }
  0x29   :  { %1087 = vmatprep.subr.bf16.mxu1 %v1216_v38 }
  0x2b   :  { %1060 = vmatpush3.bf16.msra.mxu0 %v1215_v37  ;;  %727 = vmatmul.mubr.bf16.gmra.mrb[4].mxu1 %v1234_v55 }
  0x2c   :  { %1088 = vmatpush3.bf16.msra.mxu1 %v1217_v39  ;;  %1061 = vmatprep.subr.bf16.mxu0 %v1218_v40 }
  0x2d   :  { %1089 = vmatprep.subr.bf16.mxu1 %v1220_v42  ;;  %816 = vmatprep.mubr.bf16.mxu1 %v1247_v2 }
  0x2f   :  { %1062 = vmatpush3.bf16.msra.mxu0 %v1219_v41 }
  0x30   :  { %1090 = vmatpush3.bf16.msra.mxu1 %v1221_v43  ;;  %1063 = vmatprep.subr.bf16.mxu0 %v1222_v44 }
  0x31   :  { %1091 = vmatprep.subr.bf16.mxu1 %v1224_v46 }
  0x33   :  { %1064 = vmatpush3.bf16.msra.mxu0 %v1223_v45 }
  0x34   :  { %1092 = vmatpush3.bf16.msra.mxu1 %v1225_v47  ;;  %1065 = vmatprep.subr.bf16.mxu0 %v1226_v48 }
  0x35   :  { %1093 = vmatprep.subr.bf16.mxu1 %v1228_v50 }
  0x37   :  { %1066 = vmatpush3.bf16.msra.mxu0 %v1227_v49 }
  0x38   :  { %1094 = vmatpush3.bf16.msra.mxu1 %v1229_v51  ;;  %1067 = vmatprep.subr.bf16.mxu0 %v1230_v52 }
  0x39   :  { %1095 = vmatprep.subr.bf16.mxu1 %v1235_v56 }
  0x3b   :  { %1068 = vmatpush3.bf16.msra.mxu0 %v1233_v54 }
  0x3c   :  { %1096 = vmatpush3.bf16.msra.mxu1 %v1236_v57  ;;  %1069 = vmatprep.subr.bf16.mxu0 %v1237_v58 }
  0x3d   :  { %1097 = vmatprep.subr.bf16.mxu1 %v1239_v60 }
  0x3f   :  { %1070 = vmatpush3.bf16.msra.mxu0 %v1238_v59 }
  0x40   :  { %1098 = vmatpush3.bf16.msra.mxu1 %v1243_v63  ;;  %1141 = vmatprep.subr.bf16.mxu0 %v1244_v0  ;;  %v997_v63 = vld [vmem:[%s1546_s4] ss:$0 sm:$0xff] }
  0x42   :  { %768 = vmatmul.mubr.bf16.vlgmr.msra.gmra.mrb[4].mxu0 %v1240_v61 }
  0x43   :  { %1142 = vmatpush3.bf16.msra.mxu0 %v1244_v0  ;;  %817 = vmatmul.mubr.bf16.vlgmr.msra.gmra.mrb[8].mxu1 %v1245_v1 }
  0x44   :  { %1143 = vmatprep.subr.bf16.mxu0 %v1248_v3  ;;  %775 = vmatprep.mubr.bf16.mxu0 %v1249_v4 }
  0x45   :  { %824 = vmatprep.mubr.bf16.mxu1 %v1253_v6 }
  0x47   :  { %1144 = vmatpush3.bf16.msra.mxu0 %v1248_v3 }
  0x48   :  { %1145 = vmatprep.subr.bf16.mxu0 %v1251_v5 }
  0x4a   :  { %776 = vmatmul.mubr.bf16.gmra.mrb[8].mxu0 %v1252_v7 }
  0x4b   :  { %1146 = vmatpush3.bf16.msra.mxu0 %v1251_v5  ;;  %825 = vmatmul.mubr.bf16.gmra.mrb[12].mxu1 %v1255_v8 }
  0x4c   :  { %1147 = vmatprep.subr.bf16.mxu0 %v1256_v9  ;;  %1157 = vmatprep.mubr.bf16.mxu0 %v1261_v10 }
  0x4f   :  { %1148 = vmatpush3.bf16.msra.mxu0 %v1256_v9 }
  0x50   :  { %1149 = vmatprep.subr.bf16.mxu0 %v1257_v11 }
  0x53   :  { %1150 = vmatpush3.bf16.msra.mxu0 %v1257_v11 }
  0x54   :  { %1151 = vmatprep.subr.bf16.mxu0 %v1258_v12 }
  0x57   :  { %1152 = vmatpush3.bf16.msra.mxu0 %v1258_v12 }
  0x58   :  { %1153 = vmatprep.subr.bf16.mxu0 %v1259_v13 }
  0x5b   :  { %1154 = vmatpush3.bf16.msra.mxu0 %v1259_v13 }
  0x5c   :  { %1155 = vmatprep.subr.bf16.mxu0 %v1260_v14 }
  0x5f   :  { %1156 = vmatpush3.bf16.msra.mxu0 %v1260_v14 }
  0x62   :  { %1158 = vmatmul.mubr.bf16.vlgmr.msra.gmra.mrb[0].mxu0 %v1262_v15 }
  0xf6   :  { %v1043_v16 = vpop.f32.mrb[0].mxu1 }
  0xf7   :  { %v1044_v17 = vpop.f32.mrb[1].mxu1 }
  0xf8   :  { %v1045_v18 = vadd.f32 %v1044_v17, %v1043_v16  ;;  %v1046_v19 = vpop.f32.mrb[2].mxu1 }
  0xf9   :  { %v1047_v20 = vpop.f32.mrb[3].mxu1 }
  0xfa   :  { %v1048_v21 = vadd.f32 %v1047_v20, %v1046_v19 }
  0xfe   :  { %v1049_v22 = vpop.f32.mrb[4].mxu1 }
  0xff   :  { %v1050_v23 = vpop.f32.mrb[5].mxu1 }
 0x100   :  { %v1051_v24 = vadd.f32 %v1050_v23, %v1049_v22  ;;  %v1052_v25 = vpop.f32.mrb[6].mxu1 }
 0x101   :  { %v1053_v26 = vpop.f32.mrb[7].mxu1 }
 0x102   :  { %v1054_v27 = vadd.f32 %v1053_v26, %v1052_v25 }
 0x115   :  { %v1071_v28 = vpop.f32.mrb[4].mxu0 }
 0x116   :  { %v1072_v29 = vpop.f32.mrb[5].mxu0  ;;  %v1099_v30 = vpop.f32.mrb[8].mxu1 }
 0x117   :  { %v1073_v31 = vadd.f32 %v1072_v29, %v1071_v28  ;;  %v1074_v32 = vpop.f32.mrb[6].mxu0  ;;  %v1100_v33 = vpop.f32.mrb[9].mxu1 }
 0x118   :  { %v1075_v34 = vpop.f32.mrb[7].mxu0  ;;  %v1101_v35 = vadd.f32 %v1100_v33, %v1099_v30  ;;  %v1102_v36 = vpop.f32.mrb[10].mxu1 }
 0x119   :  { %v1164_v37 = vadd.f32 %v1073_v31, %v1045_v18  ;;  %v1076_v38 = vadd.f32 %v1075_v34, %v1074_v32  ;;  %v1103_v39 = vpop.f32.mrb[11].mxu1 }
 0x11a   :  { %v1104_v40 = vadd.f32 %v1103_v39, %v1102_v36 }
 0x11b   :  { %v1170_v41 = vadd.f32 %v1076_v38, %v1048_v21  ;;  %v1165_v42 = vadd.f32 %v1164_v37, %v1101_v35 }
 0x11d   :  { %v1077_v43 = vpop.f32.mrb[8].mxu0  ;;  %v1171_v44 = vadd.f32 %v1170_v41, %v1104_v40 }
 0x11e   :  { %v1078_v45 = vpop.f32.mrb[9].mxu0  ;;  %v1105_v46 = vpop.f32.mrb[12].mxu1 }
 0x11f   :  { %v1079_v47 = vadd.f32 %v1078_v45, %v1077_v43  ;;  %v1080_v48 = vpop.f32.mrb[10].mxu0  ;;  %v1106_v49 = vpop.f32.mrb[13].mxu1 }
 0x120   :  { %v1081_v50 = vpop.f32.mrb[11].mxu0  ;;  %v1107_v51 = vadd.f32 %v1106_v49, %v1105_v46  ;;  %v1108_v52 = vpop.f32.mrb[14].mxu1 }
 0x121   :  { %v1161_v53 = vadd.f32 %v1079_v47, %v1051_v24  ;;  %v1082_v54 = vadd.f32 %v1081_v50, %v1080_v48  ;;  %v1109_v55 = vpop.f32.mrb[15].mxu1 }
 0x122   :  { %v1110_v56 = vadd.f32 %v1109_v55, %v1108_v52 }
 0x123   :  { %v1167_v57 = vadd.f32 %v1082_v54, %v1054_v27  ;;  %v1162_v58 = vadd.f32 %v1161_v53, %v1107_v51 }
 0x125   :  { %v1168_v59 = vadd.f32 %v1167_v57, %v1110_v56 }
 0x135   :  { %v1159_v60 = vpop.f32.mrb[0].mxu0 }
 0x136   :  { %v1163_v61 = vadd.f32 %v1162_v58, %v1159_v60  ;;  %v867_v62 = vpop.f32.mrb[1].mxu0 }
 0x137   :  { %v1166_v0 = vadd.f32 %v1165_v42, %v867_v62  ;;  %v1160_v1 = vpop.f32.mrb[2].mxu0 }
 0x138   :  { %v1169_v2 = vadd.f32 %v1168_v59, %v1160_v1  ;;  %v870_v3 = vpop.f32.mrb[3].mxu0  ;;  %v891_v5 = vadd.f32 %v1163_v61, %v997_v63 }
 0x139   :  { %v1172_v4 = vadd.f32 %v1171_v44, %v870_v3  ;;  %v889_v7 = vadd.f32 %v1166_v0, %v997_v63 }
 0x13a   :  { %v892_v6 = vadd.f32 %v1169_v2, %v997_v63 }
 0x13b   :  { %v890_v8 = vadd.f32 %v1172_v4, %v997_v63 }
 0x13c   :  { %v1014_v9 = vpack.c.bf16 %v892_v6, %v891_v5 }
 0x13d   :  { %v1009_v10 = vpack.c.bf16 %v890_v8, %v889_v7 }
 0x13e   :  { %1016 = vst [vmem:[%s1547_s5 + $0x8] sm:$0xff] %v1014_v9  }
 0x13f   :  { %1010 = vst [vmem:[%s1547_s5] sm:$0xff] %v1009_v10  }

// kernel: forward.10
= control target key start
LH: loop header
LB: loop body
LE: loop exit
PB: predicated region body
PF: predicated region fallthrough
CT: control target
= control target key end

     0   :  { %v890_v42 = vmov 0.0   ;;  %vm891_vm0 = vmmov 0   ;;  %s1098_s1 = inlined_call_operand.vmem [shape: bf16[896,128], index: 1, kind: input, shape index: {}]   ;;  %s1099_s0 = inlined_call_operand.vmem [shape: bf16[8,896], index: 0, kind: input, shape index: {}]   ;;  %s1100_s2 = inlined_call_operand.vmem [shape: f32[1,128], index: 2, kind: input, shape index: {}]   ;;  %s1101_s3 = inlined_call_operand.vmem [shape: bf16[8,128], index: 3, kind: output, shape index: {}]  }
   0x1   :  { %v827_v0 = vld [vmem:[%s1098_s1 + $0x40] sm:$0xff]   ;;  %v831_v4 = vld [vmem:[%s1098_s1 + $0x48] sm:$0xff]   ;;  %v835_v8 = vld [vmem:[%s1098_s1 + $0x50] sm:$0xff]  }
   0x2   :  { %v828_v1 = vld [vmem:[%s1098_s1] sm:$0xff]   ;;  %730 = vmatprep.subr.bf16.mxu0 %v827_v0  ;;  %v832_v5 = vld [vmem:[%s1098_s1 + $0x8] sm:$0xff]   ;;  %v836_v9 = vld [vmem:[%s1098_s1 + $0x10] sm:$0xff]  }
   0x3   :  { %v829_v2 = vld [vmem:[%s1098_s1 + $0xc0] sm:$0xff]   ;;  %731 = vmatpush3.bf16.msra.mxu0 %v828_v1  ;;  %v833_v6 = vld [vmem:[%s1098_s1 + $0xc8] sm:$0xff]   ;;  %v837_v10 = vld [vmem:[%s1098_s1 + $0xd0] sm:$0xff]  }
   0x4   :  { %v830_v3 = vld [vmem:[%s1098_s1 + $0x80] sm:$0xff]   ;;  %752 = vmatprep.subr.bf16.mxu1 %v829_v2  ;;  %732 = vmatprep.subr.bf16.mxu0 %v831_v4  ;;  %v834_v7 = vld [vmem:[%s1098_s1 + $0x88] sm:$0xff]   ;;  %v838_v11 = vld [vmem:[%s1098_s1 + $0x90] sm:$0xff]  }
   0x5   :  { %753 = vmatpush3.bf16.msra.mxu1 %v830_v3  ;;  %v839_v12 = vld [vmem:[%s1098_s1 + $0x58] sm:$0xff]   ;;  %v843_v16 = vld [vmem:[%s1098_s1 + $0x60] sm:$0xff]   ;;  %v847_v20 = vld [vmem:[%s1098_s1 + $0x68] sm:$0xff]  }
   0x6   :  { %754 = vmatprep.subr.bf16.mxu1 %v833_v6  ;;  %v840_v13 = vld [vmem:[%s1098_s1 + $0x18] sm:$0xff]   ;;  %v844_v17 = vld [vmem:[%s1098_s1 + $0x20] sm:$0xff]   ;;  %v848_v21 = vld [vmem:[%s1098_s1 + $0x28] sm:$0xff]  }
   0x7   :  { %733 = vmatpush3.bf16.msra.mxu0 %v832_v5  ;;  %v841_v14 = vld [vmem:[%s1098_s1 + $0xd8] sm:$0xff]   ;;  %v845_v18 = vld [vmem:[%s1098_s1 + $0xe0] sm:$0xff]   ;;  %v849_v22 = vld [vmem:[%s1098_s1 + $0xe8] sm:$0xff]  }
   0x8   :  { %734 = vmatprep.subr.bf16.mxu0 %v835_v8  ;;  %v842_v15 = vld [vmem:[%s1098_s1 + $0x98] sm:$0xff]   ;;  %v846_v19 = vld [vmem:[%s1098_s1 + $0xa0] sm:$0xff]   ;;  %v850_v23 = vld [vmem:[%s1098_s1 + $0xa8] sm:$0xff]  }
   0x9   :  { %755 = vmatpush3.bf16.msra.mxu1 %v834_v7  ;;  %v851_v24 = vld [vmem:[%s1098_s1 + $0x70] sm:$0xff]   ;;  %v855_v28 = vld [vmem:[%s1098_s1 + $0x78] sm:$0xff]   ;;  %v15_v31 = vld [vmem:[%s1099_s0] sm:$0xff] }
   0xa   :  { %756 = vmatprep.subr.bf16.mxu1 %v837_v10  ;;  %v852_v25 = vld [vmem:[%s1098_s1 + $0x30] sm:$0xff]   ;;  %v856_v29 = vld [vmem:[%s1098_s1 + $0x38] sm:$0xff]   ;;  %v667_v32 = vcombine.low %v15_v31, %v15_v31  ;;  %v668_v33 = vcombine.high %v15_v31, %v15_v31  ;;  %v861_v35 = vld [vmem:[%s1098_s1 + $0x140] sm:$0xff]  }
   0xb   :  { %735 = vmatpush3.bf16.msra.mxu0 %v836_v9  ;;  %v853_v26 = vld [vmem:[%s1098_s1 + $0xf0] sm:$0xff]   ;;  %v857_v30 = vld [vmem:[%s1098_s1 + $0xf8] sm:$0xff]   ;;  %v16_v36 = vld [vmem:[%s1099_s0 + $0x8] sm:$0xff] }
   0xc   :  { %736 = vmatprep.subr.bf16.mxu0 %v839_v12  ;;  %v854_v27 = vld [vmem:[%s1098_s1 + $0xb0] sm:$0xff]   ;;  %v860_v34 = vld [vmem:[%s1098_s1 + $0xb8] sm:$0xff]   ;;  %531 = vmatprep.mubr.bf16.mxu0 %v668_v33  ;;  %v669_v37 = vcombine.low %v16_v36, %v16_v36  ;;  %v670_v38 = vcombine.high %v16_v36, %v16_v36  ;;  %v864_v39 = vld [vmem:[%s1098_s1 + $0x100] sm:$0xff]  }
   0xd   :  { %757 = vmatpush3.bf16.msra.mxu1 %v838_v11  ;;  %v865_v40 = vld [vmem:[%s1098_s1 + $0x180] sm:$0xff]   ;;  %v866_v41 = vld [vmem:[%s1098_s1 + $0x148] sm:$0xff]   ;;  %v869_v45 = vld [vmem:[%s1098_s1 + $0x150] sm:$0xff]  }
   0xe   :  { %758 = vmatprep.subr.bf16.mxu1 %v841_v14  ;;  %571 = vmatprep.mubr.bf16.mxu1 %v670_v38  ;;  %v867_v43 = vld [vmem:[%s1098_s1 + $0x108] sm:$0xff]   ;;  %v870_v46 = vld [vmem:[%s1098_s1 + $0x110] sm:$0xff]   ;;  %v872_v48 = vld [vmem:[%s1098_s1 + $0x158] sm:$0xff]  }
   0xf   :  { %737 = vmatpush3.bf16.msra.mxu0 %v840_v13  ;;  %v868_v44 = vld [vmem:[%s1098_s1 + $0x188] sm:$0xff]   ;;  %v871_v47 = vld [vmem:[%s1098_s1 + $0x190] sm:$0xff]   ;;  %v873_v49 = vld [vmem:[%s1098_s1 + $0x118] sm:$0xff]  }
  0x10   :  { %738 = vmatprep.subr.bf16.mxu0 %v843_v16  ;;  %v875_v50 = vld [vmem:[%s1098_s1 + $0x160] sm:$0xff]   ;;  %v874_v51 = vld [vmem:[%s1098_s1 + $0x198] sm:$0xff]   ;;  %v878_v53 = vld [vmem:[%s1098_s1 + $0x168] sm:$0xff]  }
  0x11   :  { %759 = vmatpush3.bf16.msra.mxu1 %v842_v15  ;;  %v876_v52 = vld [vmem:[%s1098_s1 + $0x120] sm:$0xff]   ;;  %v879_v55 = vld [vmem:[%s1098_s1 + $0x128] sm:$0xff]   ;;  %v881_v56 = vld [vmem:[%s1098_s1 + $0x170] sm:$0xff]  }
  0x12   :  { %760 = vmatprep.subr.bf16.mxu1 %v845_v18  ;;  %v877_v54 = vld [vmem:[%s1098_s1 + $0x1a0] sm:$0xff]   ;;  %v880_v57 = vld [vmem:[%s1098_s1 + $0x1a8] sm:$0xff]   ;;  %v17_v58 = vld [vmem:[%s1099_s0 + $0x10] sm:$0xff] }
  0x13   :  { %739 = vmatpush3.bf16.msra.mxu0 %v844_v17  ;;  %v882_v59 = vld [vmem:[%s1098_s1 + $0x130] sm:$0xff]   ;;  %v672_v60 = vcombine.high %v17_v58, %v17_v58  ;;  %v884_v61 = vld [vmem:[%s1098_s1 + $0x178] sm:$0xff]   ;;  %v671_v1 = vcombine.low %v17_v58, %v17_v58  ;;  %v666_v4 = vld [vmem:[%s1100_s2] ss:$0 sm:$0xff] }
  0x14   :  { %740 = vmatprep.subr.bf16.mxu0 %v847_v20  ;;  %v883_v62 = vld [vmem:[%s1098_s1 + $0x1b0] sm:$0xff]   ;;  %v885_v63 = vld [vmem:[%s1098_s1 + $0x138] sm:$0xff]  }
  0x15   :  { %761 = vmatpush3.bf16.msra.mxu1 %v846_v19  ;;  %v888_v0 = vld [vmem:[%s1098_s1 + $0x1b8] sm:$0xff]  }
  0x16   :  { %762 = vmatprep.subr.bf16.mxu1 %v849_v22  ;;  %v889_v2 = vld [vmem:[%s1099_s0 + $0x18] ss:$0 sps:$4 sm:$0xff]  }
  0x17   :  { %741 = vmatpush3.bf16.msra.mxu0 %v848_v21 }
  0x18   :  { %742 = vmatprep.subr.bf16.mxu0 %v851_v24 }
  0x19   :  { %763 = vmatpush3.bf16.msra.mxu1 %v850_v23 }
  0x1a   :  { %764 = vmatprep.subr.bf16.mxu1 %v853_v26 }
  0x1b   :  { %743 = vmatpush3.bf16.msra.mxu0 %v852_v25 }
  0x1c   :  { %744 = vmatprep.subr.bf16.mxu0 %v855_v28 }
  0x1d   :  { %765 = vmatpush3.bf16.msra.mxu1 %v854_v27 }
  0x1e   :  { %766 = vmatprep.subr.bf16.mxu1 %v857_v30 }
  0x1f   :  { %745 = vmatpush3.bf16.msra.mxu0 %v856_v29 }
  0x20   :  { %774 = vmatprep.subr.bf16.mxu0 %v861_v35 }
  0x21   :  { %767 = vmatpush3.bf16.msra.mxu1 %v860_v34 }
  0x22   :  { %532 = vmatmul.mubr.bf16.vlgmr.msra.gmra.mrb[0].mxu0 %v667_v32  ;;  %805 = vmatprep.subr.bf16.mxu1 %v890_v42 }
  0x23   :  { %775 = vmatpush3.bf16.msra.mxu0 %v864_v39  ;;  %611 = vmatprep.mubr.bf16.mxu0 %v672_v60 }
  0x24   :  { %572 = vmatmul.mubr.bf16.vlgmr.msra.gmra.mrb[0].mxu1 %v669_v37  ;;  %776 = vmatprep.subr.bf16.mxu0 %v866_v41 }
  0x25   :  { %806 = vmatpush3.bf16.msra.mxu1 %v865_v40  ;;  %821 = vmatprep.mubr.msk.bf16.mxu1 %vm891_vm0, %v890_v42 }
  0x26   :  { %807 = vmatprep.subr.bf16.mxu1 %v890_v42 }
  0x27   :  { %777 = vmatpush3.bf16.msra.mxu0 %v867_v43 }
  0x28   :  { %778 = vmatprep.subr.bf16.mxu0 %v869_v45 }
  0x29   :  { %808 = vmatpush3.bf16.msra.mxu1 %v868_v44 }
  0x2a   :  { %809 = vmatprep.subr.bf16.mxu1 %v890_v42 }
  0x2b   :  { %779 = vmatpush3.bf16.msra.mxu0 %v870_v46 }
  0x2c   :  { %780 = vmatprep.subr.bf16.mxu0 %v872_v48 }
  0x2d   :  { %810 = vmatpush3.bf16.msra.mxu1 %v871_v47 }
  0x2e   :  { %811 = vmatprep.subr.bf16.mxu1 %v890_v42 }
  0x2f   :  { %781 = vmatpush3.bf16.msra.mxu0 %v873_v49 }
  0x30   :  { %782 = vmatprep.subr.bf16.mxu0 %v875_v50 }
  0x31   :  { %812 = vmatpush3.bf16.msra.mxu1 %v874_v51 }
  0x32   :  { %813 = vmatprep.subr.bf16.mxu1 %v890_v42 }
  0x33   :  { %783 = vmatpush3.bf16.msra.mxu0 %v876_v52 }
  0x34   :  { %784 = vmatprep.subr.bf16.mxu0 %v878_v53 }
  0x35   :  { %814 = vmatpush3.bf16.msra.mxu1 %v877_v54 }
  0x36   :  { %815 = vmatprep.subr.bf16.mxu1 %v890_v42 }
  0x37   :  { %785 = vmatpush3.bf16.msra.mxu0 %v879_v55 }
  0x38   :  { %786 = vmatprep.subr.bf16.mxu0 %v881_v56 }
  0x39   :  { %816 = vmatpush3.bf16.msra.mxu1 %v880_v57 }
  0x3a   :  { %817 = vmatprep.subr.bf16.mxu1 %v890_v42 }
  0x3b   :  { %787 = vmatpush3.bf16.msra.mxu0 %v882_v59 }
  0x3c   :  { %788 = vmatprep.subr.bf16.mxu0 %v884_v61 }
  0x3d   :  { %818 = vmatpush3.bf16.msra.mxu1 %v883_v62 }
  0x3e   :  { %819 = vmatprep.subr.bf16.mxu1 %v890_v42 }
  0x3f   :  { %789 = vmatpush3.bf16.msra.mxu0 %v885_v63 }
  0x41   :  { %820 = vmatpush3.bf16.msra.mxu1 %v888_v0 }
  0x42   :  { %612 = vmatmul.mubr.bf16.vlgmr.msra.gmra.mrb[4].mxu0 %v671_v1 }
  0x44   :  { %822 = vmatmul.mubr.bf16.vlgmr.msra.gmra.mrb[4].mxu1 %v889_v2 }
  0xf5   :  { %v746_v3 = vpop.f32.mrb[0].mxu0 }
  0xf6   :  { %v747_v5 = vpop.f32.mrb[1].mxu0 }
  0xf7   :  { %v748_v6 = vadd.f32 %v747_v5, %v746_v3  ;;  %v749_v7 = vpop.f32.mrb[2].mxu0  ;;  %v768_v8 = vpop.f32.mrb[0].mxu1 }
  0xf8   :  { %v750_v9 = vpop.f32.mrb[3].mxu0  ;;  %v769_v10 = vpop.f32.mrb[1].mxu1 }
  0xf9   :  { %v534_v11 = vadd.f32 %v748_v6, %v666_v4  ;;  %v770_v12 = vadd.f32 %v769_v10, %v768_v8  ;;  %v771_v13 = vpop.f32.mrb[2].mxu1 }
  0xfa   :  { %v772_v14 = vpop.f32.mrb[3].mxu1 }
  0xfb   :  { %v574_v15 = vadd.f32 %v770_v12, %v534_v11 }
 0x115   :  { %v790_v16 = vpop.f32.mrb[4].mxu0 }
 0x116   :  { %v791_v17 = vpop.f32.mrb[5].mxu0 }
 0x117   :  { %v792_v18 = vadd.f32 %v791_v17, %v790_v16  ;;  %v793_v19 = vpop.f32.mrb[6].mxu0  ;;  %v653_v20 = vpop.f32.mrb[4].mxu1 }
 0x118   :  { %v794_v21 = vpop.f32.mrb[7].mxu0  ;;  %v823_v22 = vpop.f32.mrb[5].mxu1 }
 0x119   :  { %v614_v23 = vadd.f32 %v792_v18, %v574_v15  ;;  %v656_v24 = vpop.f32.mrb[6].mxu1 }
 0x11a   :  { %v824_v25 = vpop.f32.mrb[7].mxu1 }
 0x11b   :  { %v654_v26 = vadd.f32 %v653_v20, %v614_v23 }
 0x11d   :  { %v659_v27 = vmax.f32 %v654_v26, 0.0 }
 0x11f   :  { %v660_v28 = vpack.c.bf16 %v659_v27, %v659_v27 }
 0x121   :  { %661 = vst [vmem:[%s1101_s3] sm:$0xf] %v660_v28 }

// kernel: forward.11
= control target key start
LH: loop header
LB: loop body
LE: loop exit
PB: predicated region body
PF: predicated region fallthrough
CT: control target
= control target key end

     0   :  { %v1748_v0 = vmov 0.0   ;;  %vm1749_vm0 = vmmov 0   ;;  %s2166_s3 = inlined_call_operand.vmem [shape: bf16[128,128], index: 3, kind: input, shape index: {}]   ;;  %s2167_s1 = inlined_call_operand.vmem [shape: bf16[1664,128], index: 1, kind: input, shape index: {}]   ;;  %s2168_s0 = inlined_call_operand.vmem [shape: bf16[8,1664], index: 0, kind: input, shape index: {}]   ;;  %s2169_s2 = inlined_call_operand.vmem [shape: bf16[8,128], index: 2, kind: input, shape index: {}]   ;;  %s2170_s4 = inlined_call_operand.vmem [shape: f32[1,128], index: 4, kind: input, shape index: {}]   ;;  %s2171_s5 = inlined_call_operand.vmem [shape: bf16[8,128], index: 5, kind: output, shape index: {}]  }
   0x1   :  { %1581 = vmatprep.subr.bf16.mxu0 %v1748_v0  ;;  %v1623_v1 = vld [vmem:[%s2166_s3] sm:$0xff]   ;;  %1597 = vmatprep.mubr.msk.bf16.mxu0 %vm1749_vm0, %v1748_v0  ;;  %v1626_v4 = vld [vmem:[%s2166_s3 + $0x8] sm:$0xff]   ;;  %v1629_v7 = vld [vmem:[%s2166_s3 + $0x10] sm:$0xff]  }
   0x2   :  { %v1624_v2 = vld [vmem:[%s2167_s1 + $0x40] sm:$0xff]   ;;  %1582 = vmatpush3.bf16.msra.mxu0 %v1623_v1  ;;  %v1627_v5 = vld [vmem:[%s2167_s1 + $0x48] sm:$0xff]   ;;  %v1630_v8 = vld [vmem:[%s2167_s1 + $0x50] sm:$0xff]  }
   0x3   :  { %v1625_v3 = vld [vmem:[%s2167_s1] sm:$0xff]   ;;  %1440 = vmatprep.subr.bf16.mxu1 %v1624_v2  ;;  %1583 = vmatprep.subr.bf16.mxu0 %v1748_v0  ;;  %v1628_v6 = vld [vmem:[%s2167_s1 + $0x8] sm:$0xff]   ;;  %v1631_v9 = vld [vmem:[%s2167_s1 + $0x10] sm:$0xff]  }
   0x4   :  { %1441 = vmatpush3.bf16.msra.mxu1 %v1625_v3  ;;  %v1632_v10 = vld [vmem:[%s2166_s3 + $0x18] sm:$0xff]   ;;  %v1636_v13 = vld [vmem:[%s2167_s1 + $0x60] sm:$0xff]   ;;  %v1639_v16 = vld [vmem:[%s2167_s1 + $0x68] sm:$0xff]  }
   0x5   :  { %1442 = vmatprep.subr.bf16.mxu1 %v1627_v5  ;;  %v1633_v11 = vld [vmem:[%s2167_s1 + $0x58] sm:$0xff]   ;;  %v1635_v14 = vld [vmem:[%s2166_s3 + $0x20] sm:$0xff]   ;;  %v1638_v17 = vld [vmem:[%s2166_s3 + $0x28] sm:$0xff]  }
   0x6   :  { %1584 = vmatpush3.bf16.msra.mxu0 %v1626_v4  ;;  %v1634_v12 = vld [vmem:[%s2167_s1 + $0x18] sm:$0xff]   ;;  %v1637_v15 = vld [vmem:[%s2167_s1 + $0x20] sm:$0xff]   ;;  %v1640_v18 = vld [vmem:[%s2167_s1 + $0x28] sm:$0xff]  }
   0x7   :  { %1585 = vmatprep.subr.bf16.mxu0 %v1748_v0  ;;  %v1642_v19 = vld [vmem:[%s2167_s1 + $0x70] sm:$0xff]   ;;  %v1644_v22 = vld [vmem:[%s2166_s3 + $0x38] sm:$0xff]   ;;  %v21_v23 = vld [vmem:[%s2168_s0] sm:$0xff] }
   0x8   :  { %1443 = vmatpush3.bf16.msra.mxu1 %v1628_v6  ;;  %v1641_v20 = vld [vmem:[%s2166_s3 + $0x30] sm:$0xff]   ;;  %v1645_v24 = vld [vmem:[%s2167_s1 + $0x78] sm:$0xff]   ;;  %v1314_v25 = vcombine.high %v21_v23, %v21_v23  ;;  %v1649_v27 = vld [vmem:[%s2167_s1 + $0xc0] sm:$0xff]   ;;  %v1313_v32 = vcombine.low %v21_v23, %v21_v23 }
   0x9   :  { %1444 = vmatprep.subr.bf16.mxu1 %v1630_v8  ;;  %v1643_v21 = vld [vmem:[%s2167_s1 + $0x30] sm:$0xff]   ;;  %v1646_v26 = vld [vmem:[%s2167_s1 + $0x38] sm:$0xff]   ;;  %v236_v28 = vld [vmem:[%s2169_s2] sm:$0xf] }
   0xa   :  { %1586 = vmatpush3.bf16.msra.mxu0 %v1629_v7  ;;  %1043 = vmatprep.mubr.bf16.mxu1 %v1314_v25  ;;  %v1650_v29 = vld [vmem:[%s2167_s1 + $0x80] sm:$0xff]   ;;  %v1653_v33 = vld [vmem:[%s2167_s1 + $0xc8] sm:$0xff]   ;;  %v1657_v37 = vld [vmem:[%s2167_s1 + $0xd0] sm:$0xff]  }
   0xb   :  { %1587 = vmatprep.subr.bf16.mxu0 %v1748_v0  ;;  %v1651_v30 = vld [vmem:[%s2167_s1 + $0x140] sm:$0xff]   ;;  %v1654_v34 = vld [vmem:[%s2167_s1 + $0x88] sm:$0xff]   ;;  %v1658_v38 = vld [vmem:[%s2167_s1 + $0x90] sm:$0xff]  }
   0xc   :  { %1445 = vmatpush3.bf16.msra.mxu1 %v1631_v9  ;;  %v1652_v31 = vld [vmem:[%s2167_s1 + $0x100] sm:$0xff]   ;;  %v1655_v35 = vld [vmem:[%s2167_s1 + $0x148] sm:$0xff]   ;;  %v1659_v39 = vld [vmem:[%s2167_s1 + $0x150] sm:$0xff]  }
   0xd   :  { %1446 = vmatprep.subr.bf16.mxu1 %v1633_v11  ;;  %v1656_v36 = vld [vmem:[%s2167_s1 + $0x108] sm:$0xff]   ;;  %v1660_v40 = vld [vmem:[%s2167_s1 + $0x110] sm:$0xff]   ;;  %v1661_v41 = vld [vmem:[%s2167_s1 + $0xd8] sm:$0xff]  }
   0xe   :  { %1588 = vmatpush3.bf16.msra.mxu0 %v1632_v10  ;;  %v1662_v42 = vld [vmem:[%s2167_s1 + $0x98] sm:$0xff]   ;;  %v1665_v45 = vld [vmem:[%s2167_s1 + $0xe0] sm:$0xff]   ;;  %v1669_v49 = vld [vmem:[%s2167_s1 + $0xe8] sm:$0xff]  }
   0xf   :  { %1589 = vmatprep.subr.bf16.mxu0 %v1748_v0  ;;  %v1663_v43 = vld [vmem:[%s2167_s1 + $0x158] sm:$0xff]   ;;  %v1666_v46 = vld [vmem:[%s2167_s1 + $0xa0] sm:$0xff]   ;;  %v1670_v50 = vld [vmem:[%s2167_s1 + $0xa8] sm:$0xff]  }
  0x10   :  { %1447 = vmatpush3.bf16.msra.mxu1 %v1634_v12  ;;  %v1664_v44 = vld [vmem:[%s2167_s1 + $0x118] sm:$0xff]   ;;  %v1667_v47 = vld [vmem:[%s2167_s1 + $0x160] sm:$0xff]   ;;  %v1671_v51 = vld [vmem:[%s2167_s1 + $0x168] sm:$0xff]  }
  0x11   :  { %1448 = vmatprep.subr.bf16.mxu1 %v1636_v13  ;;  %v1668_v48 = vld [vmem:[%s2167_s1 + $0x120] sm:$0xff]   ;;  %v1672_v52 = vld [vmem:[%s2167_s1 + $0x128] sm:$0xff]   ;;  %v1673_v53 = vld [vmem:[%s2167_s1 + $0xf0] sm:$0xff]  }
  0x12   :  { %1590 = vmatpush3.bf16.msra.mxu0 %v1635_v14  ;;  %v1674_v54 = vld [vmem:[%s2167_s1 + $0xb0] sm:$0xff]   ;;  %v1677_v57 = vld [vmem:[%s2167_s1 + $0xf8] sm:$0xff]   ;;  %v22_v58 = vld [vmem:[%s2168_s0 + $0x8] sm:$0xff] }
  0x13   :  { %1591 = vmatprep.subr.bf16.mxu0 %v1748_v0  ;;  %v1675_v55 = vld [vmem:[%s2167_s1 + $0x170] sm:$0xff]   ;;  %v1678_v59 = vld [vmem:[%s2167_s1 + $0xb8] sm:$0xff]   ;;  %v1316_v60 = vcombine.high %v22_v58, %v22_v58  ;;  %v1683_v63 = vld [vmem:[%s2167_s1 + $0x1c0] sm:$0xff]   ;;  %v1315_v3 = vcombine.low %v22_v58, %v22_v58 }
  0x14   :  { %1449 = vmatpush3.bf16.msra.mxu1 %v1637_v15  ;;  %v1676_v56 = vld [vmem:[%s2167_s1 + $0x130] sm:$0xff]   ;;  %v1679_v61 = vld [vmem:[%s2167_s1 + $0x178] sm:$0xff]   ;;  %v1687_v4 = vld [vmem:[%s2167_s1 + $0x240] sm:$0xff]  }
  0x15   :  { %1450 = vmatprep.subr.bf16.mxu1 %v1639_v16  ;;  %v23_v62 = vld [vmem:[%s2168_s0 + $0x10] sm:$0xff]  ;;  %v1682_v2 = vld [vmem:[%s2167_s1 + $0x138] sm:$0xff]   ;;  %v1686_v5 = vld [vmem:[%s2167_s1 + $0x180] sm:$0xff]  }
  0x16   :  { %1592 = vmatpush3.bf16.msra.mxu0 %v1638_v17  ;;  %v1318_v1 = vcombine.high %v23_v62, %v23_v62  ;;  %v1317_v6 = vcombine.low %v23_v62, %v23_v62  ;;  %v1689_v7 = vld [vmem:[%s2167_s1 + $0x1c8] sm:$0xff]   ;;  %v1688_v8 = vld [vmem:[%s2167_s1 + $0x200] sm:$0xff]   ;;  %v1693_v11 = vld [vmem:[%s2167_s1 + $0x1d0] sm:$0xff]  }
  0x17   :  { %1593 = vmatprep.subr.bf16.mxu0 %v1748_v0  ;;  %v1691_v9 = vld [vmem:[%s2167_s1 + $0x248] sm:$0xff]   ;;  %v1695_v13 = vld [vmem:[%s2167_s1 + $0x250] sm:$0xff]   ;;  %v1697_v15 = vld [vmem:[%s2167_s1 + $0x1d8] sm:$0xff]  }
  0x18   :  { %1451 = vmatpush3.bf16.msra.mxu1 %v1640_v18  ;;  %v1690_v10 = vld [vmem:[%s2167_s1 + $0x188] sm:$0xff]   ;;  %v1694_v14 = vld [vmem:[%s2167_s1 + $0x190] sm:$0xff]   ;;  %v1699_v17 = vld [vmem:[%s2167_s1 + $0x258] sm:$0xff]  }
  0x19   :  { %1452 = vmatprep.subr.bf16.mxu1 %v1642_v19  ;;  %v1692_v12 = vld [vmem:[%s2167_s1 + $0x208] sm:$0xff]   ;;  %v1696_v16 = vld [vmem:[%s2167_s1 + $0x210] sm:$0xff]   ;;  %v1698_v18 = vld [vmem:[%s2167_s1 + $0x198] sm:$0xff]  }
  0x1a   :  { %1594 = vmatpush3.bf16.msra.mxu0 %v1641_v20  ;;  %v1701_v19 = vld [vmem:[%s2167_s1 + $0x1e0] sm:$0xff]   ;;  %v1700_v20 = vld [vmem:[%s2167_s1 + $0x218] sm:$0xff]   ;;  %v1705_v23 = vld [vmem:[%s2167_s1 + $0x1e8] sm:$0xff]  }
  0x1b   :  { %1595 = vmatprep.subr.bf16.mxu0 %v1748_v0  ;;  %v1707_v25 = vld [vmem:[%s2167_s1 + $0x268] sm:$0xff]  }
  0x1c   :  { %1453 = vmatpush3.bf16.msra.mxu1 %v1643_v21  ;;  %v1703_v21 = vld [vmem:[%s2167_s1 + $0x260] sm:$0xff]   ;;  %v26_v58 = vld [vmem:[%s2168_s0 + $0x28] sm:$0xff] }
  0x1d   :  { %1454 = vmatprep.subr.bf16.mxu1 %v1645_v24  ;;  %v1704_v24 = vld [vmem:[%s2167_s1 + $0x220] sm:$0xff]   ;;  %v1738_v62 = vld [vmem:[%s2167_s1 + $0x328] sm:$0xff]  }
  0x1e   :  { %1596 = vmatpush3.bf16.msra.mxu0 %v1644_v22  ;;  %v1702_v22 = vld [vmem:[%s2167_s1 + $0x1a0] sm:$0xff]  }
  0x1f   :  { %1462 = vmatprep.subr.bf16.mxu0 %v1649_v27  ;;  %v1709_v27 = vld [vmem:[%s2167_s1 + $0x1f0] sm:$0xff]  }
  0x20   :  { %1455 = vmatpush3.bf16.msra.mxu1 %v1646_v26  ;;  %v1706_v26 = vld [vmem:[%s2167_s1 + $0x1a8] sm:$0xff]  }
  0x21   :  { %1598 = vmatmul.mubr.bf16.vlgmr.msra.gmra.mrb[0].mxu0 %v236_v28  ;;  %1484 = vmatprep.subr.bf16.mxu1 %v1651_v30  ;;  %v1708_v28 = vld [vmem:[%s2167_s1 + $0x228] sm:$0xff]   ;;  %v1710_v30 = vld [vmem:[%s2167_s1 + $0x1b0] sm:$0xff]  }
  0x22   :  { %1463 = vmatpush3.bf16.msra.mxu0 %v1650_v29  ;;  %1083 = vmatprep.mubr.bf16.mxu0 %v1316_v60  ;;  %v1711_v29 = vld [vmem:[%s2167_s1 + $0x270] sm:$0xff]   ;;  %v1324_v60 = vcombine.high %v26_v58, %v26_v58 }
  0x23   :  { %1044 = vmatmul.mubr.bf16.vlgmr.msra.gmra.mrb[0].mxu1 %v1313_v32  ;;  %1464 = vmatprep.subr.bf16.mxu0 %v1653_v33  ;;  %v1712_v32 = vld [vmem:[%s2167_s1 + $0x230] sm:$0xff]   ;;  %v24_v33 = vld [vmem:[%s2168_s0 + $0x18] sm:$0xff] }
  0x24   :  { %1485 = vmatpush3.bf16.msra.mxu1 %v1652_v31  ;;  %1123 = vmatprep.mubr.bf16.mxu1 %v1318_v1  ;;  %v1713_v31 = vld [vmem:[%s2167_s1 + $0x1f8] sm:$0xff]  }
  0x25   :  { %1486 = vmatprep.subr.bf16.mxu1 %v1655_v35  ;;  %v1320_v35 = vcombine.high %v24_v33, %v24_v33  ;;  %v1742_v1 = vld [vmem:[%s2167_s1 + $0x2f8] sm:$0xff]  }
  0x26   :  { %1465 = vmatpush3.bf16.msra.mxu0 %v1654_v34  ;;  %v1715_v34 = vld [vmem:[%s2167_s1 + $0x278] sm:$0xff]  }
  0x27   :  { %1466 = vmatprep.subr.bf16.mxu0 %v1657_v37  ;;  %v25_v37 = vld [vmem:[%s2168_s0 + $0x20] sm:$0xff] }
  0x28   :  { %1487 = vmatpush3.bf16.msra.mxu1 %v1656_v36  ;;  %v1714_v36 = vld [vmem:[%s2167_s1 + $0x1b8] sm:$0xff]  }
  0x29   :  { %1488 = vmatprep.subr.bf16.mxu1 %v1659_v39  ;;  %v1322_v39 = vcombine.high %v25_v37, %v25_v37 }
  0x2a   :  { %1467 = vmatpush3.bf16.msra.mxu0 %v1658_v38  ;;  %v1719_v38 = vld [vmem:[%s2167_s1 + $0x2c0] sm:$0xff]  }
  0x2b   :  { %1468 = vmatprep.subr.bf16.mxu0 %v1661_v41  ;;  %v1319_v41 = vcombine.low %v24_v33, %v24_v33 }
  0x2c   :  { %1489 = vmatpush3.bf16.msra.mxu1 %v1660_v40  ;;  %v1718_v40 = vld [vmem:[%s2167_s1 + $0x238] sm:$0xff]  }
  0x2d   :  { %1490 = vmatprep.subr.bf16.mxu1 %v1663_v43  ;;  %v1321_v43 = vcombine.low %v25_v37, %v25_v37 }
  0x2e   :  { %1469 = vmatpush3.bf16.msra.mxu0 %v1662_v42  ;;  %v1722_v42 = vld [vmem:[%s2167_s1 + $0x280] sm:$0xff]  }
  0x2f   :  { %1470 = vmatprep.subr.bf16.mxu0 %v1665_v45  ;;  %v1723_v45 = vld [vmem:[%s2167_s1 + $0x300] sm:$0xff]  }
  0x30   :  { %1491 = vmatpush3.bf16.msra.mxu1 %v1664_v44  ;;  %v1724_v44 = vld [vmem:[%s2167_s1 + $0x2c8] sm:$0xff]  }
  0x31   :  { %1492 = vmatprep.subr.bf16.mxu1 %v1667_v47  ;;  %v1727_v47 = vld [vmem:[%s2167_s1 + $0x2d0] sm:$0xff]  }
  0x32   :  { %1471 = vmatpush3.bf16.msra.mxu0 %v1666_v46  ;;  %v1725_v46 = vld [vmem:[%s2167_s1 + $0x288] sm:$0xff]  }
  0x33   :  { %1472 = vmatprep.subr.bf16.mxu0 %v1669_v49  ;;  %v1728_v49 = vld [vmem:[%s2167_s1 + $0x290] sm:$0xff]  }
  0x34   :  { %1493 = vmatpush3.bf16.msra.mxu1 %v1668_v48  ;;  %v1726_v48 = vld [vmem:[%s2167_s1 + $0x308] sm:$0xff]  }
  0x35   :  { %1494 = vmatprep.subr.bf16.mxu1 %v1671_v51  ;;  %v1729_v51 = vld [vmem:[%s2167_s1 + $0x310] sm:$0xff]  }
  0x36   :  { %1473 = vmatpush3.bf16.msra.mxu0 %v1670_v50  ;;  %v1730_v50 = vld [vmem:[%s2167_s1 + $0x2d8] sm:$0xff]  }
  0x37   :  { %1474 = vmatprep.subr.bf16.mxu0 %v1673_v53  ;;  %v1733_v53 = vld [vmem:[%s2167_s1 + $0x2e0] sm:$0xff]  }
  0x38   :  { %1495 = vmatpush3.bf16.msra.mxu1 %v1672_v52  ;;  %v1731_v52 = vld [vmem:[%s2167_s1 + $0x298] sm:$0xff]  }
  0x39   :  { %1496 = vmatprep.subr.bf16.mxu1 %v1675_v55  ;;  %v1734_v55 = vld [vmem:[%s2167_s1 + $0x2a0] sm:$0xff]  }
  0x3a   :  { %1475 = vmatpush3.bf16.msra.mxu0 %v1674_v54  ;;  %v1732_v54 = vld [vmem:[%s2167_s1 + $0x318] sm:$0xff]  }
  0x3b   :  { %1476 = vmatprep.subr.bf16.mxu0 %v1677_v57  ;;  %v1735_v57 = vld [vmem:[%s2167_s1 + $0x320] sm:$0xff]  }
  0x3c   :  { %1497 = vmatpush3.bf16.msra.mxu1 %v1676_v56  ;;  %v1736_v56 = vld [vmem:[%s2167_s1 + $0x2e8] sm:$0xff]  }
  0x3d   :  { %1498 = vmatprep.subr.bf16.mxu1 %v1679_v61  ;;  %v1739_v61 = vld [vmem:[%s2167_s1 + $0x2f0] sm:$0xff]  }
  0x3e   :  { %1477 = vmatpush3.bf16.msra.mxu0 %v1678_v59  ;;  %v1737_v59 = vld [vmem:[%s2167_s1 + $0x2a8] sm:$0xff]  }
  0x3f   :  { %1506 = vmatprep.subr.bf16.mxu0 %v1683_v63  ;;  %v1740_v63 = vld [vmem:[%s2167_s1 + $0x2b0] sm:$0xff]  }
  0x40   :  { %1499 = vmatpush3.bf16.msra.mxu1 %v1682_v2  ;;  %v1741_v2 = vld [vmem:[%s2167_s1 + $0x330] sm:$0xff]  }
  0x41   :  { %1084 = vmatmul.mubr.bf16.vlgmr.msra.gmra.mrb[4].mxu0 %v1315_v3  ;;  %1528 = vmatprep.subr.bf16.mxu1 %v1687_v4  ;;  %v1743_v3 = vld [vmem:[%s2167_s1 + $0x2b8] sm:$0xff]  }
  0x42   :  { %1507 = vmatpush3.bf16.msra.mxu0 %v1686_v5  ;;  %1163 = vmatprep.mubr.bf16.mxu0 %v1320_v35  ;;  %v1746_v4 = vld [vmem:[%s2167_s1 + $0x338] sm:$0xff]   ;;  %v1323_v5 = vcombine.low %v26_v58, %v26_v58 }
  0x43   :  { %1124 = vmatmul.mubr.bf16.vlgmr.msra.gmra.mrb[4].mxu1 %v1317_v6  ;;  %1508 = vmatprep.subr.bf16.mxu0 %v1689_v7  ;;  %v1747_v6 = vld [vmem:[%s2168_s0 + $0x30] ss:$0 sps:$4 sm:$0xff]  }
  0x44   :  { %1529 = vmatpush3.bf16.msra.mxu1 %v1688_v8  ;;  %1203 = vmatprep.mubr.bf16.mxu1 %v1322_v39 }
  0x45   :  { %1530 = vmatprep.subr.bf16.mxu1 %v1691_v9 }
  0x46   :  { %1509 = vmatpush3.bf16.msra.mxu0 %v1690_v10 }
  0x47   :  { %1510 = vmatprep.subr.bf16.mxu0 %v1693_v11 }
  0x48   :  { %1531 = vmatpush3.bf16.msra.mxu1 %v1692_v12 }
  0x49   :  { %1532 = vmatprep.subr.bf16.mxu1 %v1695_v13 }
  0x4a   :  { %1511 = vmatpush3.bf16.msra.mxu0 %v1694_v14 }
  0x4b   :  { %1512 = vmatprep.subr.bf16.mxu0 %v1697_v15 }
  0x4c   :  { %1533 = vmatpush3.bf16.msra.mxu1 %v1696_v16 }
  0x4d   :  { %1534 = vmatprep.subr.bf16.mxu1 %v1699_v17 }
  0x4e   :  { %1513 = vmatpush3.bf16.msra.mxu0 %v1698_v18 }
  0x4f   :  { %1514 = vmatprep.subr.bf16.mxu0 %v1701_v19 }
  0x50   :  { %1535 = vmatpush3.bf16.msra.mxu1 %v1700_v20 }
  0x51   :  { %1536 = vmatprep.subr.bf16.mxu1 %v1703_v21 }
  0x52   :  { %1515 = vmatpush3.bf16.msra.mxu0 %v1702_v22 }
  0x53   :  { %1516 = vmatprep.subr.bf16.mxu0 %v1705_v23 }
  0x54   :  { %1537 = vmatpush3.bf16.msra.mxu1 %v1704_v24 }
  0x55   :  { %1538 = vmatprep.subr.bf16.mxu1 %v1707_v25 }
  0x56   :  { %1517 = vmatpush3.bf16.msra.mxu0 %v1706_v26 }
  0x57   :  { %1518 = vmatprep.subr.bf16.mxu0 %v1709_v27 }
  0x58   :  { %1539 = vmatpush3.bf16.msra.mxu1 %v1708_v28 }
  0x59   :  { %1540 = vmatprep.subr.bf16.mxu1 %v1711_v29 }
  0x5a   :  { %1519 = vmatpush3.bf16.msra.mxu0 %v1710_v30 }
  0x5b   :  { %1520 = vmatprep.subr.bf16.mxu0 %v1713_v31 }
  0x5c   :  { %1541 = vmatpush3.bf16.msra.mxu1 %v1712_v32 }
  0x5d   :  { %1542 = vmatprep.subr.bf16.mxu1 %v1715_v34 }
  0x5e   :  { %1521 = vmatpush3.bf16.msra.mxu0 %v1714_v36 }
  0x5f   :  { %1550 = vmatprep.subr.bf16.mxu0 %v1719_v38 }
  0x60   :  { %1543 = vmatpush3.bf16.msra.mxu1 %v1718_v40 }
  0x61   :  { %1164 = vmatmul.mubr.bf16.vlgmr.msra.gmra.mrb[8].mxu0 %v1319_v41  ;;  %1601 = vmatprep.subr.bf16.mxu1 %v1748_v0 }
  0x62   :  { %1551 = vmatpush3.bf16.msra.mxu0 %v1722_v42  ;;  %1243 = vmatprep.mubr.bf16.mxu0 %v1324_v60 }
  0x63   :  { %1204 = vmatmul.mubr.bf16.vlgmr.msra.gmra.mrb[8].mxu1 %v1321_v43  ;;  %1552 = vmatprep.subr.bf16.mxu0 %v1724_v44 }
  0x64   :  { %1602 = vmatpush3.bf16.msra.mxu1 %v1723_v45  ;;  %1617 = vmatprep.mubr.msk.bf16.mxu1 %vm1749_vm0, %v1748_v0 }
  0x65   :  { %1603 = vmatprep.subr.bf16.mxu1 %v1748_v0 }
  0x66   :  { %1553 = vmatpush3.bf16.msra.mxu0 %v1725_v46 }
  0x67   :  { %1554 = vmatprep.subr.bf16.mxu0 %v1727_v47 }
  0x68   :  { %1604 = vmatpush3.bf16.msra.mxu1 %v1726_v48 }
  0x69   :  { %1605 = vmatprep.subr.bf16.mxu1 %v1748_v0 }
  0x6a   :  { %1555 = vmatpush3.bf16.msra.mxu0 %v1728_v49  ;;  %v1430_v49 = vld [vmem:[%s2170_s4] ss:$0 sm:$0xff] }
  0x6b   :  { %1556 = vmatprep.subr.bf16.mxu0 %v1730_v50 }
  0x6c   :  { %1606 = vmatpush3.bf16.msra.mxu1 %v1729_v51 }
  0x6d   :  { %1607 = vmatprep.subr.bf16.mxu1 %v1748_v0 }
  0x6e   :  { %1557 = vmatpush3.bf16.msra.mxu0 %v1731_v52 }
  0x6f   :  { %1558 = vmatprep.subr.bf16.mxu0 %v1733_v53 }
  0x70   :  { %1608 = vmatpush3.bf16.msra.mxu1 %v1732_v54 }
  0x71   :  { %1609 = vmatprep.subr.bf16.mxu1 %v1748_v0 }
  0x72   :  { %1559 = vmatpush3.bf16.msra.mxu0 %v1734_v55 }
  0x73   :  { %1560 = vmatprep.subr.bf16.mxu0 %v1736_v56 }
  0x74   :  { %1610 = vmatpush3.bf16.msra.mxu1 %v1735_v57 }
  0x75   :  { %1611 = vmatprep.subr.bf16.mxu1 %v1748_v0 }
  0x76   :  { %1561 = vmatpush3.bf16.msra.mxu0 %v1737_v59 }
  0x77   :  { %1562 = vmatprep.subr.bf16.mxu0 %v1739_v61 }
  0x78   :  { %1612 = vmatpush3.bf16.msra.mxu1 %v1738_v62 }
  0x79   :  { %1613 = vmatprep.subr.bf16.mxu1 %v1748_v0 }
  0x7a   :  { %1563 = vmatpush3.bf16.msra.mxu0 %v1740_v63 }
  0x7b   :  { %1564 = vmatprep.subr.bf16.mxu0 %v1742_v1 }
  0x7c   :  { %1614 = vmatpush3.bf16.msra.mxu1 %v1741_v2 }
  0x7d   :  { %1615 = vmatprep.subr.bf16.mxu1 %v1748_v0 }
  0x7e   :  { %1565 = vmatpush3.bf16.msra.mxu0 %v1743_v3 }
  0x80   :  { %1616 = vmatpush3.bf16.msra.mxu1 %v1746_v4 }
  0x81   :  { %1244 = vmatmul.mubr.bf16.vlgmr.msra.gmra.mrb[12].mxu0 %v1323_v5 }
  0x83   :  { %1618 = vmatmul.mubr.bf16.vlgmr.msra.gmra.mrb[12].mxu1 %v1747_v6 }
  0xf4   :  { %v335_v7 = vpop.f32.mrb[0].mxu0 }
  0xf5   :  { %v1599_v8 = vpop.f32.mrb[1].mxu0 }
  0xf6   :  { %v1456_v9 = vpop.f32.mrb[0].mxu1  ;;  %v338_v10 = vpop.f32.mrb[2].mxu0 }
  0xf7   :  { %v1457_v11 = vpop.f32.mrb[1].mxu1  ;;  %v1600_v12 = vpop.f32.mrb[3].mxu0 }
  0xf8   :  { %v1458_v13 = vadd.f32 %v1457_v11, %v1456_v9  ;;  %v1459_v14 = vpop.f32.mrb[2].mxu1 }
  0xf9   :  { %v1460_v15 = vpop.f32.mrb[3].mxu1 }
  0xfa   :  { %v1046_v16 = vadd.f32 %v1458_v13, %v335_v7 }
 0x114   :  { %v1478_v0 = vpop.f32.mrb[4].mxu0 }
 0x115   :  { %v1479_v17 = vpop.f32.mrb[5].mxu0 }
 0x116   :  { %v1480_v18 = vadd.f32 %v1479_v17, %v1478_v0  ;;  %v1481_v19 = vpop.f32.mrb[6].mxu0  ;;  %v1500_v20 = vpop.f32.mrb[4].mxu1 }
 0x117   :  { %v1482_v21 = vpop.f32.mrb[7].mxu0  ;;  %v1501_v22 = vpop.f32.mrb[5].mxu1 }
 0x118   :  { %v1086_v23 = vadd.f32 %v1480_v18, %v1046_v16  ;;  %v1502_v24 = vadd.f32 %v1501_v22, %v1500_v20  ;;  %v1503_v25 = vpop.f32.mrb[6].mxu1 }
 0x119   :  { %v1504_v26 = vpop.f32.mrb[7].mxu1 }
 0x11a   :  { %v1126_v27 = vadd.f32 %v1502_v24, %v1086_v23 }
 0x134   :  { %v1522_v28 = vpop.f32.mrb[8].mxu0 }
 0x135   :  { %v1523_v29 = vpop.f32.mrb[9].mxu0 }
 0x136   :  { %v1524_v30 = vadd.f32 %v1523_v29, %v1522_v28  ;;  %v1525_v31 = vpop.f32.mrb[10].mxu0  ;;  %v1544_v32 = vpop.f32.mrb[8].mxu1 }
 0x137   :  { %v1526_v33 = vpop.f32.mrb[11].mxu0  ;;  %v1545_v34 = vpop.f32.mrb[9].mxu1 }
 0x138   :  { %v1166_v35 = vadd.f32 %v1524_v30, %v1126_v27  ;;  %v1546_v36 = vadd.f32 %v1545_v34, %v1544_v32  ;;  %v1547_v37 = vpop.f32.mrb[10].mxu1 }
 0x139   :  { %v1548_v38 = vpop.f32.mrb[11].mxu1 }
 0x13a   :  { %v1206_v39 = vadd.f32 %v1546_v36, %v1166_v35 }
 0x154   :  { %v1566_v40 = vpop.f32.mrb[12].mxu0 }
 0x155   :  { %v1567_v41 = vpop.f32.mrb[13].mxu0 }
 0x156   :  { %v1568_v42 = vadd.f32 %v1567_v41, %v1566_v40  ;;  %v1569_v43 = vpop.f32.mrb[14].mxu0  ;;  %v1285_v44 = vpop.f32.mrb[12].mxu1 }
 0x157   :  { %v1570_v45 = vpop.f32.mrb[15].mxu0  ;;  %v1619_v46 = vpop.f32.mrb[13].mxu1 }
 0x158   :  { %v1246_v47 = vadd.f32 %v1568_v42, %v1206_v39  ;;  %v1288_v48 = vpop.f32.mrb[14].mxu1 }
 0x159   :  { %v1620_v50 = vpop.f32.mrb[15].mxu1 }
 0x15a   :  { %v1286_v51 = vadd.f32 %v1285_v44, %v1246_v47 }
 0x15c   :  { %v1298_v52 = vadd.f32 %v1430_v49, %v1286_v51 }
 0x15e   :  { %v1299_v53 = vpack.c.bf16 %v1298_v52, %v1298_v52 }
 0x160   :  { %1300 = vst [vmem:[%s2171_s5] sm:$0xf] %v1299_v53 }

// kernel: forward.12
= control target key start
LH: loop header
LB: loop body
LE: loop exit
PB: predicated region body
PF: predicated region fallthrough
CT: control target
= control target key end

     0   :  { %v1621_v21 = vmov 1966171168   ;;  %v238_v23 = vlaneseq  ;;  %vm1623_vm0 = vmmov 0   ;;  %s1996_s1 = inlined_call_operand.vmem [shape: bf16[1664,128], index: 1, kind: input, shape index: {}]   ;;  %s1997_s0 = inlined_call_operand.vmem [shape: bf16[2,1664], index: 0, kind: input, shape index: {}]   ;;  %s1998_s2 = inlined_call_operand.vmem [shape: f32[1,128], index: 2, kind: input, shape index: {}]   ;;  %s1999_s3 = inlined_call_operand.vmem [shape: bf16[2,128], index: 3, kind: output, shape index: {}]  }
   0x1   :  { %v1515_v0 = vld [vmem:[%s1996_s1 + $0x40] sm:$0xff]   ;;  %v1519_v4 = vld [vmem:[%s1996_s1 + $0x48] sm:$0xff]   ;;  %v1523_v8 = vld [vmem:[%s1996_s1 + $0x50] sm:$0xff]   ;;  %v236_v22 = vunpack.c.l.s4 %v1621_v21 }
   0x2   :  { %v1516_v1 = vld [vmem:[%s1996_s1] sm:$0xff]   ;;  %1351 = vmatprep.subr.bf16.mxu0 %v1515_v0  ;;  %v1520_v5 = vld [vmem:[%s1996_s1 + $0x8] sm:$0xff]   ;;  %v1524_v9 = vld [vmem:[%s1996_s1 + $0x10] sm:$0xff]   ;;  %v239_v29 = vshrl.u32 %v238_v23, 7 }
   0x3   :  { %v1517_v2 = vld [vmem:[%s1996_s1 + $0xc0] sm:$0xff]   ;;  %1352 = vmatpush3.bf16.msra.mxu0 %v1516_v1  ;;  %v1521_v6 = vld [vmem:[%s1996_s1 + $0xc8] sm:$0xff]   ;;  %v1525_v10 = vld [vmem:[%s1996_s1 + $0xd0] sm:$0xff]   ;;  %v237_v28 = vunpack.c.0.s8 %v236_v22 }
   0x4   :  { %v1518_v3 = vld [vmem:[%s1996_s1 + $0x80] sm:$0xff]   ;;  %1373 = vmatprep.subr.bf16.mxu1 %v1517_v2  ;;  %1353 = vmatprep.subr.bf16.mxu0 %v1519_v4  ;;  %v1522_v7 = vld [vmem:[%s1996_s1 + $0x88] sm:$0xff]   ;;  %v1526_v11 = vld [vmem:[%s1996_s1 + $0x90] sm:$0xff]  }
   0x5   :  { %1374 = vmatpush3.bf16.msra.mxu1 %v1518_v3  ;;  %v1527_v12 = vld [vmem:[%s1996_s1 + $0x58] sm:$0xff]   ;;  %v1531_v16 = vld [vmem:[%s1996_s1 + $0x60] sm:$0xff]   ;;  %v1535_v20 = vld [vmem:[%s1996_s1 + $0x68] sm:$0xff]   ;;  %v1731_v34 = vsub.s32 %v237_v28, %v239_v29 }
   0x6   :  { %1375 = vmatprep.subr.bf16.mxu1 %v1521_v6  ;;  %v1528_v13 = vld [vmem:[%s1996_s1 + $0x18] sm:$0xff]   ;;  %v1532_v17 = vld [vmem:[%s1996_s1 + $0x20] sm:$0xff]   ;;  %v1536_v24 = vld [vmem:[%s1996_s1 + $0x28] sm:$0xff]  }
   0x7   :  { %1354 = vmatpush3.bf16.msra.mxu0 %v1520_v5  ;;  %v1529_v14 = vld [vmem:[%s1996_s1 + $0xd8] sm:$0xff]   ;;  %v1533_v18 = vld [vmem:[%s1996_s1 + $0xe0] sm:$0xff]   ;;  %v1537_v25 = vld [vmem:[%s1996_s1 + $0xe8] sm:$0xff]  }
   0x8   :  { %1355 = vmatprep.subr.bf16.mxu0 %v1523_v8  ;;  %v1530_v15 = vld [vmem:[%s1996_s1 + $0x98] sm:$0xff]   ;;  %v1534_v19 = vld [vmem:[%s1996_s1 + $0xa0] sm:$0xff]   ;;  %v1538_v26 = vld [vmem:[%s1996_s1 + $0xa8] sm:$0xff]  }
   0x9   :  { %1376 = vmatpush3.bf16.msra.mxu1 %v1522_v7  ;;  %v1539_v27 = vld [vmem:[%s1996_s1 + $0x70] sm:$0xff]   ;;  %v1543_v33 = vld [vmem:[%s1996_s1 + $0x78] sm:$0xff]   ;;  %v15_v37 = vld [vmem:[%s1997_s0] sm:$0xff] }
   0xa   :  { %1377 = vmatprep.subr.bf16.mxu1 %v1525_v10  ;;  %v1540_v30 = vld [vmem:[%s1996_s1 + $0x30] sm:$0xff]   ;;  %v1544_v35 = vld [vmem:[%s1996_s1 + $0x38] sm:$0xff]   ;;  %v234_v38 = vcombine.high %v15_v37, %v15_v37  ;;  %v241_v39 = vrot.slane %v15_v37, %v1731_v34  ;;  %v1549_v41 = vld [vmem:[%s1996_s1 + $0x140] sm:$0xff]  }
   0xb   :  { %1356 = vmatpush3.bf16.msra.mxu0 %v1524_v9  ;;  %v1541_v31 = vld [vmem:[%s1996_s1 + $0xf0] sm:$0xff]   ;;  %v1545_v36 = vld [vmem:[%s1996_s1 + $0xf8] sm:$0xff]   ;;  %v1551_v45 = vld [vmem:[%s1996_s1 + $0x1c0] sm:$0xff]  }
   0xc   :  { %1357 = vmatprep.subr.bf16.mxu0 %v1527_v12  ;;  %v1542_v32 = vld [vmem:[%s1996_s1 + $0xb0] sm:$0xff]   ;;  %v1548_v40 = vld [vmem:[%s1996_s1 + $0xb8] sm:$0xff]   ;;  %v249_v42 = vcombine.high %v241_v39, %v241_v39  ;;  %v257_v43 = vrot.slane %v241_v39, %v1731_v34  ;;  %v1751_v44 = vrot.slane %v234_v38, %v1731_v34  ;;  %v1550_v47 = vld [vmem:[%s1996_s1 + $0x100] sm:$0xff]  }
   0xd   :  { %1378 = vmatpush3.bf16.msra.mxu1 %v1526_v11  ;;  %v1553_v50 = vld [vmem:[%s1996_s1 + $0x148] sm:$0xff]   ;;  %v1552_v52 = vld [vmem:[%s1996_s1 + $0x180] sm:$0xff]   ;;  %v1557_v57 = vld [vmem:[%s1996_s1 + $0x150] sm:$0xff]  }
   0xe   :  { %1379 = vmatprep.subr.bf16.mxu1 %v1529_v14  ;;  %v271_v46 = vrot.slane %v249_v42, %v1731_v34  ;;  %v250_v48 = vcombine.high %v1751_v44, %v1751_v44  ;;  %v279_v49 = vcombine.high %v257_v43, %v257_v43  ;;  %v1555_v54 = vld [vmem:[%s1996_s1 + $0x1c8] sm:$0xff]   ;;  %v1559_v59 = vld [vmem:[%s1996_s1 + $0x1d0] sm:$0xff]   ;;  %v1561_v61 = vld [vmem:[%s1996_s1 + $0x158] sm:$0xff]  }
   0xf   :  { %1358 = vmatpush3.bf16.msra.mxu0 %v1528_v13  ;;  %v1554_v55 = vld [vmem:[%s1996_s1 + $0x108] sm:$0xff]   ;;  %v1558_v60 = vld [vmem:[%s1996_s1 + $0x110] sm:$0xff]   ;;  %v1563_v63 = vld [vmem:[%s1996_s1 + $0x1d8] sm:$0xff]  }
  0x10   :  { %1359 = vmatprep.subr.bf16.mxu0 %v1531_v16  ;;  %991 = vmatprep.mubr.bf16.mxu0 %v271_v46  ;;  %v281_v51 = vcombine.high %v271_v46, %v271_v46  ;;  %v278_v53 = vrot.slane %v250_v48, %v1731_v34  ;;  %v1556_v58 = vld [vmem:[%s1996_s1 + $0x188] sm:$0xff]   ;;  %v1560_v62 = vld [vmem:[%s1996_s1 + $0x190] sm:$0xff]   ;;  %v1562_v0 = vld [vmem:[%s1996_s1 + $0x118] sm:$0xff]  }
  0x11   :  { %1380 = vmatpush3.bf16.msra.mxu1 %v1530_v15  ;;  %v1565_v1 = vld [vmem:[%s1996_s1 + $0x160] sm:$0xff]   ;;  %v1564_v2 = vld [vmem:[%s1996_s1 + $0x198] sm:$0xff]   ;;  %v1814_v5 = vld [vmem:[%s1997_s0 + $0x8] sm:$0x1f] }
  0x12   :  { %1381 = vmatprep.subr.bf16.mxu1 %v1533_v18  ;;  %1031 = vmatprep.mubr.bf16.mxu1 %v281_v51  ;;  %v282_v56 = vcombine.high %v278_v53, %v278_v53  ;;  %v1567_v3 = vld [vmem:[%s1996_s1 + $0x1e0] sm:$0xff]   ;;  %v1569_v6 = vld [vmem:[%s1996_s1 + $0x168] sm:$0xff]   ;;  %v1573_v10 = vld [vmem:[%s1996_s1 + $0x170] sm:$0xff]   ;;  %v1836_v12 = vrot.slane %v1814_v5, %v1731_v34 }
  0x13   :  { %1360 = vmatpush3.bf16.msra.mxu0 %v1532_v17  ;;  %v1566_v4 = vld [vmem:[%s1996_s1 + $0x120] sm:$0xff]   ;;  %v1571_v8 = vld [vmem:[%s1996_s1 + $0x1e8] sm:$0xff]   ;;  %v1575_v13 = vld [vmem:[%s1996_s1 + $0x1f0] sm:$0xff]  }
  0x14   :  { %1361 = vmatprep.subr.bf16.mxu0 %v1535_v20  ;;  %v1568_v7 = vld [vmem:[%s1996_s1 + $0x1a0] sm:$0xff]   ;;  %v1570_v9 = vld [vmem:[%s1996_s1 + $0x128] sm:$0xff]   ;;  %v1574_v14 = vld [vmem:[%s1996_s1 + $0x130] sm:$0xff]   ;;  %v298_v17 = vcombine.high %v1836_v12, %v1836_v12  ;;  %v264_v20 = vrot.slane %v1751_v44, %v1731_v34 }
  0x15   :  { %1382 = vmatpush3.bf16.msra.mxu1 %v1534_v19  ;;  %v1572_v11 = vld [vmem:[%s1996_s1 + $0x1a8] sm:$0xff]   ;;  %v1577_v15 = vld [vmem:[%s1996_s1 + $0x178] sm:$0xff]   ;;  %v1576_v16 = vld [vmem:[%s1996_s1 + $0x1b0] sm:$0xff]  }
  0x16   :  { %1383 = vmatprep.subr.bf16.mxu1 %v1537_v25  ;;  %v1579_v18 = vld [vmem:[%s1996_s1 + $0x1f8] sm:$0xff]   ;;  %v1581_v21 = vld [vmem:[%s1996_s1 + $0x240] sm:$0xff]   ;;  %v319_v23 = vrot.slane %v298_v17, %v1731_v34  ;;  %v1592_v38 = vld [vmem:[%s1996_s1 + $0x290] sm:$0xff]  }
  0x17   :  { %1362 = vmatpush3.bf16.msra.mxu0 %v1536_v24  ;;  %v1578_v19 = vld [vmem:[%s1996_s1 + $0x138] sm:$0xff]   ;;  %v1583_v24 = vld [vmem:[%s1996_s1 + $0x2c0] sm:$0xff]   ;;  %v1602_v48 = vld [vmem:[%s1996_s1 + $0x228] sm:$0xff]  }
  0x18   :  { %1363 = vmatprep.subr.bf16.mxu0 %v1539_v27  ;;  %v1580_v22 = vld [vmem:[%s1996_s1 + $0x1b8] sm:$0xff]   ;;  %v1582_v25 = vld [vmem:[%s1996_s1 + $0x200] sm:$0xff]   ;;  %v1585_v27 = vld [vmem:[%s1996_s1 + $0x248] sm:$0xff]   ;;  %v321_v29 = vcombine.high %v319_v23, %v319_v23 }
  0x19   :  { %1384 = vmatpush3.bf16.msra.mxu1 %v1538_v26  ;;  %v280_v26 = vcombine.high %v264_v20, %v264_v20  ;;  %v1584_v28 = vld [vmem:[%s1996_s1 + $0x280] sm:$0xff]   ;;  %v1593_v37 = vld [vmem:[%s1996_s1 + $0x258] sm:$0xff]   ;;  %v1607_v51 = vld [vmem:[%s1996_s1 + $0x2f0] sm:$0xff]  }
  0x1a   :  { %1385 = vmatprep.subr.bf16.mxu1 %v1541_v31  ;;  %v1586_v31 = vld [vmem:[%s1996_s1 + $0x208] sm:$0xff]   ;;  %v1595_v39 = vld [vmem:[%s1996_s1 + $0x2d8] sm:$0xff]   ;;  %v1598_v44 = vld [vmem:[%s1996_s1 + $0x220] sm:$0xff]  }
  0x1b   :  { %1364 = vmatpush3.bf16.msra.mxu0 %v1540_v30  ;;  %v1587_v30 = vld [vmem:[%s1996_s1 + $0x2c8] sm:$0xff]   ;;  %v1596_v42 = vld [vmem:[%s1996_s1 + $0x298] sm:$0xff]   ;;  %v1600_v46 = vld [vmem:[%s1996_s1 + $0x2a0] sm:$0xff]  }
  0x1c   :  { %1365 = vmatprep.subr.bf16.mxu0 %v1543_v33  ;;  %v1588_v33 = vld [vmem:[%s1996_s1 + $0x288] sm:$0xff]  }
  0x1d   :  { %1386 = vmatpush3.bf16.msra.mxu1 %v1542_v32  ;;  %v1589_v32 = vld [vmem:[%s1996_s1 + $0x250] sm:$0xff]  }
  0x1e   :  { %1387 = vmatprep.subr.bf16.mxu1 %v1545_v36  ;;  %v1590_v36 = vld [vmem:[%s1996_s1 + $0x210] sm:$0xff]  }
  0x1f   :  { %1366 = vmatpush3.bf16.msra.mxu0 %v1544_v35  ;;  %v1591_v35 = vld [vmem:[%s1996_s1 + $0x2d0] sm:$0xff]  }
  0x20   :  { %1395 = vmatprep.subr.bf16.mxu0 %v1549_v41  ;;  %v1597_v41 = vld [vmem:[%s1996_s1 + $0x260] sm:$0xff]  }
  0x21   :  { %1388 = vmatpush3.bf16.msra.mxu1 %v1548_v40  ;;  %v1594_v40 = vld [vmem:[%s1996_s1 + $0x218] sm:$0xff]  }
  0x22   :  { %1417 = vmatprep.subr.bf16.mxu1 %v1551_v45  ;;  %992 = vmatmul.mubr.bf16.vlgmr.msra.gmra.mrb[0].mxu0 %v257_v43  ;;  %v1599_v43 = vld [vmem:[%s1996_s1 + $0x2e0] sm:$0xff]   ;;  %v1601_v45 = vld [vmem:[%s1996_s1 + $0x268] sm:$0xff]  }
  0x23   :  { %1396 = vmatpush3.bf16.msra.mxu0 %v1550_v47  ;;  %1071 = vmatprep.mubr.bf16.mxu0 %v278_v53  ;;  %v1603_v47 = vld [vmem:[%s1996_s1 + $0x2e8] sm:$0xff]   ;;  %v1609_v53 = vld [vmem:[%s1996_s1 + $0x278] sm:$0xff]  }
  0x24   :  { %1032 = vmatmul.mubr.bf16.vlgmr.msra.gmra.mrb[0].mxu1 %v279_v49  ;;  %1397 = vmatprep.subr.bf16.mxu0 %v1553_v50  ;;  %v1605_v49 = vld [vmem:[%s1996_s1 + $0x270] sm:$0xff]   ;;  %v1604_v50 = vld [vmem:[%s1996_s1 + $0x2a8] sm:$0xff]  }
  0x25   :  { %1418 = vmatpush3.bf16.msra.mxu1 %v1552_v52  ;;  %1111 = vmatprep.mubr.bf16.mxu1 %v282_v56  ;;  %v1606_v52 = vld [vmem:[%s1996_s1 + $0x230] sm:$0xff]   ;;  %v1610_v56 = vld [vmem:[%s1996_s1 + $0x238] sm:$0xff]  }
  0x26   :  { %1419 = vmatprep.subr.bf16.mxu1 %v1555_v54  ;;  %v1608_v54 = vld [vmem:[%s1996_s1 + $0x2b0] sm:$0xff]  }
  0x27   :  { %1398 = vmatpush3.bf16.msra.mxu0 %v1554_v55  ;;  %v1611_v55 = vld [vmem:[%s1996_s1 + $0x2f8] sm:$0xff]  }
  0x28   :  { %1399 = vmatprep.subr.bf16.mxu0 %v1557_v57  ;;  %v305_v57 = vrot.slane %v1836_v12, %v1731_v34 }
  0x29   :  { %1420 = vmatpush3.bf16.msra.mxu1 %v1556_v58  ;;  %v1612_v58 = vld [vmem:[%s1996_s1 + $0x2b8] sm:$0xff]  }
  0x2a   :  { %1421 = vmatprep.subr.bf16.mxu1 %v1559_v59  ;;  %v1613_v59 = vld [vmem:[%s1996_s1 + $0x300] sm:$0xff]  }
  0x2b   :  { %1400 = vmatpush3.bf16.msra.mxu0 %v1558_v60  ;;  %v1622_v60 = vmov 0.0  }
  0x2c   :  { %1401 = vmatprep.subr.bf16.mxu0 %v1561_v61  ;;  %v320_v61 = vcombine.high %v305_v57, %v305_v57 }
  0x2d   :  { %1422 = vmatpush3.bf16.msra.mxu1 %v1560_v62  ;;  %v1614_v62 = vld [vmem:[%s1996_s1 + $0x308] sm:$0xff]  }
  0x2e   :  { %1423 = vmatprep.subr.bf16.mxu1 %v1563_v63  ;;  %v1615_v63 = vld [vmem:[%s1996_s1 + $0x310] sm:$0xff]  }
  0x2f   :  { %1402 = vmatpush3.bf16.msra.mxu0 %v1562_v0  ;;  %v1616_v0 = vld [vmem:[%s1996_s1 + $0x318] sm:$0xff]  }
  0x30   :  { %1403 = vmatprep.subr.bf16.mxu0 %v1565_v1  ;;  %v1617_v1 = vld [vmem:[%s1996_s1 + $0x320] sm:$0xff]  }
  0x31   :  { %1424 = vmatpush3.bf16.msra.mxu1 %v1564_v2  ;;  %v1618_v2 = vld [vmem:[%s1996_s1 + $0x328] sm:$0xff]  }
  0x32   :  { %1425 = vmatprep.subr.bf16.mxu1 %v1567_v3  ;;  %v283_v3 = vcombine.high %v1814_v5, %v1814_v5  ;;  %v1246_v5 = vld [vmem:[%s1998_s2] ss:$0 sm:$0xff] }
  0x33   :  { %1404 = vmatpush3.bf16.msra.mxu0 %v1566_v4  ;;  %v1619_v4 = vld [vmem:[%s1996_s1 + $0x330] sm:$0xff]  }
  0x34   :  { %1405 = vmatprep.subr.bf16.mxu0 %v1569_v6  ;;  %v297_v6 = vrot.slane %v283_v3, %v1731_v34 }
  0x35   :  { %1426 = vmatpush3.bf16.msra.mxu1 %v1568_v7  ;;  %v1620_v7 = vld [vmem:[%s1996_s1 + $0x338] sm:$0xff]  }
  0x36   :  { %1427 = vmatprep.subr.bf16.mxu1 %v1571_v8  ;;  %v312_v8 = vrot.slane %v297_v6, %v1731_v34 }
  0x37   :  { %1406 = vmatpush3.bf16.msra.mxu0 %v1570_v9 }
  0x38   :  { %1407 = vmatprep.subr.bf16.mxu0 %v1573_v10 }
  0x39   :  { %1428 = vmatpush3.bf16.msra.mxu1 %v1572_v11 }
  0x3a   :  { %1429 = vmatprep.subr.bf16.mxu1 %v1575_v13 }
  0x3b   :  { %1408 = vmatpush3.bf16.msra.mxu0 %v1574_v14 }
  0x3c   :  { %1409 = vmatprep.subr.bf16.mxu0 %v1577_v15 }
  0x3d   :  { %1430 = vmatpush3.bf16.msra.mxu1 %v1576_v16 }
  0x3e   :  { %1431 = vmatprep.subr.bf16.mxu1 %v1579_v18 }
  0x3f   :  { %1410 = vmatpush3.bf16.msra.mxu0 %v1578_v19 }
  0x40   :  { %1439 = vmatprep.subr.bf16.mxu0 %v1581_v21 }
  0x41   :  { %1432 = vmatpush3.bf16.msra.mxu1 %v1580_v22 }
  0x42   :  { %1072 = vmatmul.mubr.bf16.vlgmr.msra.gmra.mrb[4].mxu0 %v264_v20  ;;  %1461 = vmatprep.subr.bf16.mxu1 %v1583_v24 }
  0x43   :  { %1440 = vmatpush3.bf16.msra.mxu0 %v1582_v25  ;;  %1151 = vmatprep.mubr.bf16.mxu0 %v319_v23 }
  0x44   :  { %1112 = vmatmul.mubr.bf16.vlgmr.msra.gmra.mrb[4].mxu1 %v280_v26  ;;  %1441 = vmatprep.subr.bf16.mxu0 %v1585_v27 }
  0x45   :  { %1462 = vmatpush3.bf16.msra.mxu1 %v1584_v28  ;;  %1191 = vmatprep.mubr.bf16.mxu1 %v321_v29 }
  0x46   :  { %1463 = vmatprep.subr.bf16.mxu1 %v1587_v30 }
  0x47   :  { %1442 = vmatpush3.bf16.msra.mxu0 %v1586_v31 }
  0x48   :  { %1443 = vmatprep.subr.bf16.mxu0 %v1589_v32 }
  0x49   :  { %1464 = vmatpush3.bf16.msra.mxu1 %v1588_v33 }
  0x4a   :  { %1465 = vmatprep.subr.bf16.mxu1 %v1591_v35 }
  0x4b   :  { %1444 = vmatpush3.bf16.msra.mxu0 %v1590_v36 }
  0x4c   :  { %1445 = vmatprep.subr.bf16.mxu0 %v1593_v37 }
  0x4d   :  { %1466 = vmatpush3.bf16.msra.mxu1 %v1592_v38 }
  0x4e   :  { %1467 = vmatprep.subr.bf16.mxu1 %v1595_v39 }
  0x4f   :  { %1446 = vmatpush3.bf16.msra.mxu0 %v1594_v40 }
  0x50   :  { %1447 = vmatprep.subr.bf16.mxu0 %v1597_v41 }
  0x51   :  { %1468 = vmatpush3.bf16.msra.mxu1 %v1596_v42 }
  0x52   :  { %1469 = vmatprep.subr.bf16.mxu1 %v1599_v43 }
  0x53   :  { %1448 = vmatpush3.bf16.msra.mxu0 %v1598_v44 }
  0x54   :  { %1449 = vmatprep.subr.bf16.mxu0 %v1601_v45 }
  0x55   :  { %1470 = vmatpush3.bf16.msra.mxu1 %v1600_v46 }
  0x56   :  { %1471 = vmatprep.subr.bf16.mxu1 %v1603_v47 }
  0x57   :  { %1450 = vmatpush3.bf16.msra.mxu0 %v1602_v48 }
  0x58   :  { %1451 = vmatprep.subr.bf16.mxu0 %v1605_v49 }
  0x59   :  { %1472 = vmatpush3.bf16.msra.mxu1 %v1604_v50 }
  0x5a   :  { %1473 = vmatprep.subr.bf16.mxu1 %v1607_v51 }
  0x5b   :  { %1452 = vmatpush3.bf16.msra.mxu0 %v1606_v52 }
  0x5c   :  { %1453 = vmatprep.subr.bf16.mxu0 %v1609_v53 }
  0x5d   :  { %1474 = vmatpush3.bf16.msra.mxu1 %v1608_v54 }
  0x5e   :  { %1475 = vmatprep.subr.bf16.mxu1 %v1611_v55 }
  0x5f   :  { %1454 = vmatpush3.bf16.msra.mxu0 %v1610_v56 }
  0x60   :  { %1492 = vmatprep.subr.bf16.mxu0 %v1622_v60 }
  0x61   :  { %1476 = vmatpush3.bf16.msra.mxu1 %v1612_v58 }
  0x62   :  { %1152 = vmatmul.mubr.bf16.vlgmr.msra.gmra.mrb[8].mxu0 %v305_v57 }
  0x63   :  { %1493 = vmatpush3.bf16.msra.mxu0 %v1613_v59  ;;  %1508 = vmatprep.mubr.msk.bf16.mxu0 %vm1623_vm0, %v1622_v60 }
  0x64   :  { %1192 = vmatmul.mubr.bf16.vlgmr.msra.gmra.mrb[8].mxu1 %v320_v61  ;;  %1494 = vmatprep.subr.bf16.mxu0 %v1622_v60 }
  0x67   :  { %1495 = vmatpush3.bf16.msra.mxu0 %v1614_v62 }
  0x68   :  { %1496 = vmatprep.subr.bf16.mxu0 %v1622_v60 }
  0x6b   :  { %1497 = vmatpush3.bf16.msra.mxu0 %v1615_v63 }
  0x6c   :  { %1498 = vmatprep.subr.bf16.mxu0 %v1622_v60 }
  0x6f   :  { %1499 = vmatpush3.bf16.msra.mxu0 %v1616_v0 }
  0x70   :  { %1500 = vmatprep.subr.bf16.mxu0 %v1622_v60 }
  0x73   :  { %1501 = vmatpush3.bf16.msra.mxu0 %v1617_v1 }
  0x74   :  { %1502 = vmatprep.subr.bf16.mxu0 %v1622_v60 }
  0x77   :  { %1503 = vmatpush3.bf16.msra.mxu0 %v1618_v2 }
  0x78   :  { %1504 = vmatprep.subr.bf16.mxu0 %v1622_v60 }
  0x7b   :  { %1505 = vmatpush3.bf16.msra.mxu0 %v1619_v4 }
  0x7c   :  { %1506 = vmatprep.subr.bf16.mxu0 %v1622_v60 }
  0x7f   :  { %1507 = vmatpush3.bf16.msra.mxu0 %v1620_v7 }
  0x82   :  { %1509 = vmatmul.mubr.bf16.vlgmr.msra.gmra.mrb[12].mxu0 %v312_v8 }
  0xf5   :  { %v1367_v9 = vpop.f32.mrb[0].mxu0 }
  0xf6   :  { %v1368_v10 = vpop.f32.mrb[1].mxu0 }
  0xf7   :  { %v1369_v11 = vadd.f32 %v1368_v10, %v1367_v9  ;;  %v1370_v12 = vpop.f32.mrb[2].mxu0  ;;  %v1389_v13 = vpop.f32.mrb[0].mxu1 }
  0xf8   :  { %v1371_v14 = vpop.f32.mrb[3].mxu0  ;;  %v1390_v15 = vpop.f32.mrb[1].mxu1 }
  0xf9   :  { %v994_v16 = vadd.f32 %v1369_v11, %v1246_v5  ;;  %v1391_v17 = vadd.f32 %v1390_v15, %v1389_v13  ;;  %v1392_v18 = vpop.f32.mrb[2].mxu1 }
  0xfa   :  { %v1393_v19 = vpop.f32.mrb[3].mxu1 }
  0xfb   :  { %v1034_v20 = vadd.f32 %v1391_v17, %v994_v16 }
 0x115   :  { %v1411_v21 = vpop.f32.mrb[4].mxu0 }
 0x116   :  { %v1412_v34 = vpop.f32.mrb[5].mxu0 }
 0x117   :  { %v1413_v22 = vadd.f32 %v1412_v34, %v1411_v21  ;;  %v1414_v23 = vpop.f32.mrb[6].mxu0  ;;  %v1433_v24 = vpop.f32.mrb[4].mxu1 }
 0x118   :  { %v1415_v25 = vpop.f32.mrb[7].mxu0  ;;  %v1434_v26 = vpop.f32.mrb[5].mxu1 }
 0x119   :  { %v1074_v27 = vadd.f32 %v1413_v22, %v1034_v20  ;;  %v1435_v28 = vadd.f32 %v1434_v26, %v1433_v24  ;;  %v1436_v29 = vpop.f32.mrb[6].mxu1 }
 0x11a   :  { %v1437_v30 = vpop.f32.mrb[7].mxu1 }
 0x11b   :  { %v1114_v31 = vadd.f32 %v1435_v28, %v1074_v27 }
 0x135   :  { %v1455_v32 = vpop.f32.mrb[8].mxu0 }
 0x136   :  { %v1456_v33 = vpop.f32.mrb[9].mxu0 }
 0x137   :  { %v1457_v35 = vadd.f32 %v1456_v33, %v1455_v32  ;;  %v1458_v36 = vpop.f32.mrb[10].mxu0  ;;  %v1477_v37 = vpop.f32.mrb[8].mxu1 }
 0x138   :  { %v1459_v38 = vpop.f32.mrb[11].mxu0  ;;  %v1478_v39 = vpop.f32.mrb[9].mxu1 }
 0x139   :  { %v1154_v40 = vadd.f32 %v1457_v35, %v1114_v31  ;;  %v1479_v41 = vadd.f32 %v1478_v39, %v1477_v37  ;;  %v1480_v42 = vpop.f32.mrb[10].mxu1 }
 0x13a   :  { %v1481_v43 = vpop.f32.mrb[11].mxu1 }
 0x13b   :  { %v1194_v44 = vadd.f32 %v1479_v41, %v1154_v40 }
 0x155   :  { %v1233_v45 = vpop.f32.mrb[12].mxu0 }
 0x156   :  { %v1234_v46 = vadd.f32 %v1233_v45, %v1194_v44  ;;  %v1510_v47 = vpop.f32.mrb[13].mxu0 }
 0x157   :  { %v1236_v48 = vpop.f32.mrb[14].mxu0 }
 0x158   :  { %v1239_v49 = vmax.f32 %v1234_v46, 0.0  ;;  %v1511_v50 = vpop.f32.mrb[15].mxu0 }
 0x15a   :  { %v1240_v51 = vpack.c.bf16 %v1239_v49, %v1239_v49 }
 0x15c   :  { %1241 = vst [vmem:[%s1999_s3] sm:$0x1] %v1240_v51 }

// kernel: forward.13
= control target key start
LH: loop header
LB: loop body
LE: loop exit
PB: predicated region body
PF: predicated region fallthrough
CT: control target
= control target key end

     0   :  { %v3199_v0 = vmov 0.0   ;;  %vm3200_vm0 = vmmov 0   ;;  %v3201_v14 = vmov 1966171168   ;;  %v538_v16 = vlaneseq  ;;  %s3973_s3 = inlined_call_operand.vmem [shape: bf16[128,128], index: 3, kind: input, shape index: {}]   ;;  %s3974_s1 = inlined_call_operand.vmem [shape: bf16[3200,128], index: 1, kind: input, shape index: {}]   ;;  %s3975_s0 = inlined_call_operand.vmem [shape: bf16[2,3200], index: 0, kind: input, shape index: {}]   ;;  %s3976_s2 = inlined_call_operand.vmem [shape: bf16[2,128], index: 2, kind: input, shape index: {}]   ;;  %s3977_s4 = inlined_call_operand.vmem [shape: f32[1,128], index: 4, kind: input, shape index: {}]   ;;  %s3978_s5 = inlined_call_operand.vmem [shape: f32[2,128], index: 5, kind: output, shape index: {}]  }
   0x1   :  { %2945 = vmatprep.subr.bf16.mxu0 %v3199_v0  ;;  %v2988_v1 = vld [vmem:[%s3973_s3] sm:$0xff]   ;;  %2961 = vmatprep.mubr.msk.bf16.mxu0 %vm3200_vm0, %v3199_v0  ;;  %v2991_v4 = vld [vmem:[%s3973_s3 + $0x8] sm:$0xff]   ;;  %v2994_v7 = vld [vmem:[%s3973_s3 + $0x10] sm:$0xff]   ;;  %v536_v15 = vunpack.c.l.s4 %v3201_v14 }
   0x2   :  { %v2989_v2 = vld [vmem:[%s3974_s1 + $0x40] sm:$0xff]   ;;  %2946 = vmatpush3.bf16.msra.mxu0 %v2988_v1  ;;  %v2992_v5 = vld [vmem:[%s3974_s1 + $0x48] sm:$0xff]   ;;  %v2995_v8 = vld [vmem:[%s3974_s1 + $0x50] sm:$0xff]   ;;  %v539_v21 = vshrl.u32 %v538_v16, 7 }
   0x3   :  { %v2990_v3 = vld [vmem:[%s3974_s1] sm:$0xff]   ;;  %2672 = vmatprep.subr.bf16.mxu1 %v2989_v2  ;;  %2947 = vmatprep.subr.bf16.mxu0 %v3199_v0  ;;  %v2993_v6 = vld [vmem:[%s3974_s1 + $0x8] sm:$0xff]   ;;  %v2996_v9 = vld [vmem:[%s3974_s1 + $0x10] sm:$0xff]   ;;  %v537_v20 = vunpack.c.0.s8 %v536_v15 }
   0x4   :  { %2673 = vmatpush3.bf16.msra.mxu1 %v2990_v3  ;;  %v2997_v10 = vld [vmem:[%s3973_s3 + $0x18] sm:$0xff]   ;;  %v3001_v13 = vld [vmem:[%s3974_s1 + $0x60] sm:$0xff]   ;;  %v3004_v19 = vld [vmem:[%s3974_s1 + $0x68] sm:$0xff]  }
   0x5   :  { %2674 = vmatprep.subr.bf16.mxu1 %v2992_v5  ;;  %v2998_v11 = vld [vmem:[%s3974_s1 + $0x58] sm:$0xff]   ;;  %v3000_v17 = vld [vmem:[%s3973_s3 + $0x20] sm:$0xff]   ;;  %v3003_v22 = vld [vmem:[%s3973_s3 + $0x28] sm:$0xff]   ;;  %v3297_v25 = vsub.s32 %v537_v20, %v539_v21 }
   0x6   :  { %2948 = vmatpush3.bf16.msra.mxu0 %v2991_v4  ;;  %v2999_v12 = vld [vmem:[%s3974_s1 + $0x18] sm:$0xff]   ;;  %v3002_v18 = vld [vmem:[%s3974_s1 + $0x20] sm:$0xff]   ;;  %v3005_v23 = vld [vmem:[%s3974_s1 + $0x28] sm:$0xff]  }
   0x7   :  { %2949 = vmatprep.subr.bf16.mxu0 %v3199_v0  ;;  %v3007_v24 = vld [vmem:[%s3974_s1 + $0x70] sm:$0xff]   ;;  %v3009_v28 = vld [vmem:[%s3973_s3 + $0x38] sm:$0xff]   ;;  %v21_v29 = vld [vmem:[%s3975_s0] sm:$0xff] }
   0x8   :  { %2675 = vmatpush3.bf16.msra.mxu1 %v2993_v6  ;;  %v3006_v26 = vld [vmem:[%s3973_s3 + $0x30] sm:$0xff]   ;;  %v3010_v30 = vld [vmem:[%s3974_s1 + $0x78] sm:$0xff]   ;;  %v534_v31 = vcombine.high %v21_v29, %v21_v29  ;;  %v541_v32 = vrot.slane %v21_v29, %v3297_v25  ;;  %v3013_v35 = vld [vmem:[%s3974_s1 + $0xc0] sm:$0xff]  }
   0x9   :  { %2676 = vmatprep.subr.bf16.mxu1 %v2995_v8  ;;  %v3008_v27 = vld [vmem:[%s3974_s1 + $0x30] sm:$0xff]   ;;  %v3011_v33 = vld [vmem:[%s3974_s1 + $0x38] sm:$0xff]   ;;  %v425_v37 = vld [vmem:[%s3976_s2] sm:$0x1] }
   0xa   :  { %2950 = vmatpush3.bf16.msra.mxu0 %v2994_v7  ;;  %v549_v34 = vcombine.high %v541_v32, %v541_v32  ;;  %v3324_v36 = vrot.slane %v534_v31, %v3297_v25  ;;  %v3014_v38 = vld [vmem:[%s3974_s1 + $0x80] sm:$0xff]   ;;  %v3342_v44 = vrot.slane %v541_v32, %v3297_v25  ;;  %v3017_v45 = vld [vmem:[%s3974_s1 + $0xc8] sm:$0xff]   ;;  %v3021_v50 = vld [vmem:[%s3974_s1 + $0xd0] sm:$0xff]  }
   0xb   :  { %2951 = vmatprep.subr.bf16.mxu0 %v3199_v0  ;;  %v3015_v40 = vld [vmem:[%s3974_s1 + $0x140] sm:$0xff]   ;;  %v3018_v46 = vld [vmem:[%s3974_s1 + $0x88] sm:$0xff]   ;;  %v3022_v51 = vld [vmem:[%s3974_s1 + $0x90] sm:$0xff]  }
   0xc   :  { %2677 = vmatpush3.bf16.msra.mxu1 %v2996_v9  ;;  %v571_v39 = vrot.slane %v549_v34, %v3297_v25  ;;  %v550_v41 = vcombine.high %v3324_v36, %v3324_v36  ;;  %v3016_v42 = vld [vmem:[%s3974_s1 + $0x100] sm:$0xff]   ;;  %v3019_v48 = vld [vmem:[%s3974_s1 + $0x148] sm:$0xff]   ;;  %v3023_v52 = vld [vmem:[%s3974_s1 + $0x150] sm:$0xff]  }
   0xd   :  { %2678 = vmatprep.subr.bf16.mxu1 %v2998_v11  ;;  %v3020_v49 = vld [vmem:[%s3974_s1 + $0x108] sm:$0xff]   ;;  %v3024_v53 = vld [vmem:[%s3974_s1 + $0x110] sm:$0xff]   ;;  %v3025_v54 = vld [vmem:[%s3974_s1 + $0xd8] sm:$0xff]  }
   0xe   :  { %2952 = vmatpush3.bf16.msra.mxu0 %v2997_v10  ;;  %v581_v43 = vcombine.high %v571_v39, %v571_v39  ;;  %1952 = vmatprep.mubr.bf16.mxu1 %v571_v39  ;;  %v3351_v47 = vrot.slane %v550_v41, %v3297_v25  ;;  %v3026_v55 = vld [vmem:[%s3974_s1 + $0x98] sm:$0xff]   ;;  %v3029_v58 = vld [vmem:[%s3974_s1 + $0xe0] sm:$0xff]   ;;  %v3033_v62 = vld [vmem:[%s3974_s1 + $0xe8] sm:$0xff]  }
   0xf   :  { %2953 = vmatprep.subr.bf16.mxu0 %v3199_v0  ;;  %v3027_v56 = vld [vmem:[%s3974_s1 + $0x158] sm:$0xff]   ;;  %v3030_v59 = vld [vmem:[%s3974_s1 + $0xa0] sm:$0xff]   ;;  %v3034_v63 = vld [vmem:[%s3974_s1 + $0xa8] sm:$0xff]  }
  0x10   :  { %2679 = vmatpush3.bf16.msra.mxu1 %v2999_v12  ;;  %v3028_v57 = vld [vmem:[%s3974_s1 + $0x118] sm:$0xff]   ;;  %v3031_v60 = vld [vmem:[%s3974_s1 + $0x160] sm:$0xff]   ;;  %v3035_v1 = vld [vmem:[%s3974_s1 + $0x168] sm:$0xff]   ;;  %v582_v16 = vcombine.high %v3351_v47, %v3351_v47 }
  0x11   :  { %2680 = vmatprep.subr.bf16.mxu1 %v3001_v13  ;;  %v3032_v61 = vld [vmem:[%s3974_s1 + $0x120] sm:$0xff]   ;;  %v3036_v2 = vld [vmem:[%s3974_s1 + $0x128] sm:$0xff]   ;;  %v3037_v3 = vld [vmem:[%s3974_s1 + $0xf0] sm:$0xff]   ;;  %v579_v13 = vcombine.high %v3342_v44, %v3342_v44 }
  0x12   :  { %2954 = vmatpush3.bf16.msra.mxu0 %v3000_v17  ;;  %v3038_v4 = vld [vmem:[%s3974_s1 + $0xb0] sm:$0xff]   ;;  %v3041_v7 = vld [vmem:[%s3974_s1 + $0xf8] sm:$0xff]   ;;  %v3045_v11 = vld [vmem:[%s3974_s1 + $0x1c0] sm:$0xff]   ;;  %v3451_v17 = vrot.slane %v3324_v36, %v3297_v25 }
  0x13   :  { %2955 = vmatprep.subr.bf16.mxu0 %v3199_v0  ;;  %v3039_v5 = vld [vmem:[%s3974_s1 + $0x170] sm:$0xff]   ;;  %v3042_v8 = vld [vmem:[%s3974_s1 + $0xb8] sm:$0xff]   ;;  %v3046_v12 = vld [vmem:[%s3974_s1 + $0x180] sm:$0xff]  }
  0x14   :  { %2681 = vmatpush3.bf16.msra.mxu1 %v3002_v18  ;;  %v3040_v6 = vld [vmem:[%s3974_s1 + $0x130] sm:$0xff]   ;;  %v3043_v9 = vld [vmem:[%s3974_s1 + $0x178] sm:$0xff]   ;;  %v3047_v14 = vld [vmem:[%s3974_s1 + $0x240] sm:$0xff]  }
  0x15   :  { %2682 = vmatprep.subr.bf16.mxu1 %v3004_v19  ;;  %v3044_v10 = vld [vmem:[%s3974_s1 + $0x138] sm:$0xff]   ;;  %v3048_v15 = vld [vmem:[%s3974_s1 + $0x200] sm:$0xff]   ;;  %v3049_v18 = vld [vmem:[%s3974_s1 + $0x1c8] sm:$0xff]  }
  0x16   :  { %2956 = vmatpush3.bf16.msra.mxu0 %v3003_v22  ;;  %v3050_v19 = vld [vmem:[%s3974_s1 + $0x188] sm:$0xff]   ;;  %v3053_v22 = vld [vmem:[%s3974_s1 + $0x1d0] sm:$0xff]   ;;  %v3059_v29 = vld [vmem:[%s3974_s1 + $0x258] sm:$0xff]  }
  0x17   :  { %2957 = vmatprep.subr.bf16.mxu0 %v3199_v0  ;;  %v3051_v20 = vld [vmem:[%s3974_s1 + $0x248] sm:$0xff]   ;;  %v3061_v31 = vld [vmem:[%s3974_s1 + $0x1e0] sm:$0xff]   ;;  %v3069_v39 = vld [vmem:[%s3974_s1 + $0x1f0] sm:$0xff]  }
  0x18   :  { %2683 = vmatpush3.bf16.msra.mxu1 %v3005_v23  ;;  %v3052_v21 = vld [vmem:[%s3974_s1 + $0x208] sm:$0xff]   ;;  %v3054_v23 = vld [vmem:[%s3974_s1 + $0x190] sm:$0xff]   ;;  %v3062_v32 = vld [vmem:[%s3974_s1 + $0x1a0] sm:$0xff]  }
  0x19   :  { %2684 = vmatprep.subr.bf16.mxu1 %v3007_v24  ;;  %v3055_v24 = vld [vmem:[%s3974_s1 + $0x250] sm:$0xff]   ;;  %v3064_v34 = vld [vmem:[%s3974_s1 + $0x220] sm:$0xff]   ;;  %v3066_v36 = vld [vmem:[%s3974_s1 + $0x1a8] sm:$0xff]  }
  0x1a   :  { %2958 = vmatpush3.bf16.msra.mxu0 %v3006_v26  ;;  %v3056_v26 = vld [vmem:[%s3974_s1 + $0x210] sm:$0xff]  }
  0x1b   :  { %2959 = vmatprep.subr.bf16.mxu0 %v3199_v0  ;;  %v3071_v41 = vld [vmem:[%s3974_s1 + $0x270] sm:$0xff]  }
  0x1c   :  { %2685 = vmatpush3.bf16.msra.mxu1 %v3008_v27  ;;  %v3057_v27 = vld [vmem:[%s3974_s1 + $0x1d8] sm:$0xff]  }
  0x1d   :  { %2686 = vmatprep.subr.bf16.mxu1 %v3010_v30  ;;  %v3060_v30 = vld [vmem:[%s3974_s1 + $0x218] sm:$0xff]  }
  0x1e   :  { %2960 = vmatpush3.bf16.msra.mxu0 %v3009_v28  ;;  %v3058_v28 = vld [vmem:[%s3974_s1 + $0x198] sm:$0xff]  }
  0x1f   :  { %2694 = vmatprep.subr.bf16.mxu0 %v3013_v35  ;;  %v3065_v35 = vld [vmem:[%s3974_s1 + $0x1e8] sm:$0xff]  }
  0x20   :  { %2687 = vmatpush3.bf16.msra.mxu1 %v3011_v33  ;;  %v3063_v33 = vld [vmem:[%s3974_s1 + $0x260] sm:$0xff]  }
  0x21   :  { %2962 = vmatmul.mubr.bf16.vlgmr.msra.gmra.mrb[0].mxu0 %v425_v37  ;;  %2716 = vmatprep.subr.bf16.mxu1 %v3015_v40  ;;  %v3067_v37 = vld [vmem:[%s3974_s1 + $0x268] sm:$0xff]   ;;  %v3070_v40 = vld [vmem:[%s3974_s1 + $0x1b0] sm:$0xff]  }
  0x22   :  { %2695 = vmatpush3.bf16.msra.mxu0 %v3014_v38  ;;  %1992 = vmatprep.mubr.bf16.mxu0 %v581_v43  ;;  %v3068_v38 = vld [vmem:[%s3974_s1 + $0x228] sm:$0xff]   ;;  %v3073_v43 = vld [vmem:[%s3974_s1 + $0x1f8] sm:$0xff]  }
  0x23   :  { %1953 = vmatmul.mubr.bf16.vlgmr.msra.gmra.mrb[0].mxu1 %v3342_v44  ;;  %2696 = vmatprep.subr.bf16.mxu0 %v3017_v45  ;;  %v3074_v44 = vld [vmem:[%s3974_s1 + $0x1b8] sm:$0xff]  }
  0x24   :  { %2717 = vmatpush3.bf16.msra.mxu1 %v3016_v42  ;;  %2032 = vmatprep.mubr.bf16.mxu1 %v3351_v47  ;;  %v3072_v42 = vld [vmem:[%s3974_s1 + $0x230] sm:$0xff]   ;;  %v3075_v45 = vld [vmem:[%s3974_s1 + $0x278] sm:$0xff]  }
  0x25   :  { %2718 = vmatprep.subr.bf16.mxu1 %v3019_v48  ;;  %v3076_v47 = vld [vmem:[%s3974_s1 + $0x238] sm:$0xff]  }
  0x26   :  { %2697 = vmatpush3.bf16.msra.mxu0 %v3018_v46  ;;  %v22_v46 = vld [vmem:[%s3975_s0 + $0x8] sm:$0xff] }
  0x27   :  { %2698 = vmatprep.subr.bf16.mxu0 %v3021_v50  ;;  %v590_v48 = vrot.slane %v22_v46, %v3297_v25  ;;  %v3077_v50 = vld [vmem:[%s3974_s1 + $0x2c0] sm:$0xff]  }
  0x28   :  { %2719 = vmatpush3.bf16.msra.mxu1 %v3020_v49  ;;  %v583_v49 = vcombine.high %v22_v46, %v22_v46  ;;  %v3125_v46 = vld [vmem:[%s3974_s1 + $0x418] sm:$0xff]  }
  0x29   :  { %2720 = vmatprep.subr.bf16.mxu1 %v3023_v52  ;;  %v3078_v52 = vld [vmem:[%s3974_s1 + $0x280] sm:$0xff]  }
  0x2a   :  { %2699 = vmatpush3.bf16.msra.mxu0 %v3022_v51  ;;  %v598_v51 = vcombine.high %v590_v48, %v590_v48 }
  0x2b   :  { %2700 = vmatprep.subr.bf16.mxu0 %v3025_v54  ;;  %v580_v54 = vcombine.high %v3451_v17, %v3451_v17 }
  0x2c   :  { %2721 = vmatpush3.bf16.msra.mxu1 %v3024_v53  ;;  %v3549_v53 = vrot.slane %v583_v49, %v3297_v25  ;;  %v3128_v49 = vld [vmem:[%s3974_s1 + $0x460] sm:$0xff]  }
  0x2d   :  { %2722 = vmatprep.subr.bf16.mxu1 %v3027_v56  ;;  %v620_v56 = vrot.slane %v598_v51, %v3297_v25  ;;  %v3130_v51 = vld [vmem:[%s3974_s1 + $0x3e8] sm:$0xff]  }
  0x2e   :  { %2701 = vmatpush3.bf16.msra.mxu0 %v3026_v55  ;;  %v3079_v55 = vld [vmem:[%s3974_s1 + $0x340] sm:$0xff]  }
  0x2f   :  { %2702 = vmatprep.subr.bf16.mxu0 %v3029_v58  ;;  %v599_v58 = vcombine.high %v3549_v53, %v3549_v53 }
  0x30   :  { %2723 = vmatpush3.bf16.msra.mxu1 %v3028_v57  ;;  %v3080_v57 = vld [vmem:[%s3974_s1 + $0x300] sm:$0xff]  }
  0x31   :  { %2724 = vmatprep.subr.bf16.mxu1 %v3031_v60  ;;  %v3081_v60 = vld [vmem:[%s3974_s1 + $0x2c8] sm:$0xff]  }
  0x32   :  { %2703 = vmatpush3.bf16.msra.mxu0 %v3030_v59  ;;  %v3563_v59 = vrot.slane %v590_v48, %v3297_v25  ;;  %v3127_v48 = vld [vmem:[%s3974_s1 + $0x3a0] sm:$0xff]  }
  0x33   :  { %2704 = vmatprep.subr.bf16.mxu0 %v3033_v62  ;;  %v630_v62 = vcombine.high %v620_v56, %v620_v56 }
  0x34   :  { %2725 = vmatpush3.bf16.msra.mxu1 %v3032_v61  ;;  %v3082_v61 = vld [vmem:[%s3974_s1 + $0x288] sm:$0xff]  }
  0x35   :  { %2726 = vmatprep.subr.bf16.mxu1 %v3035_v1  ;;  %v3083_v1 = vld [vmem:[%s3974_s1 + $0x348] sm:$0xff]  }
  0x36   :  { %2705 = vmatpush3.bf16.msra.mxu0 %v3034_v63  ;;  %v3572_v63 = vrot.slane %v599_v58, %v3297_v25  ;;  %v3137_v58 = vld [vmem:[%s3974_s1 + $0x430] sm:$0xff]  }
  0x37   :  { %2706 = vmatprep.subr.bf16.mxu0 %v3037_v3  ;;  %v3085_v3 = vld [vmem:[%s3974_s1 + $0x2d0] sm:$0xff]  }
  0x38   :  { %2727 = vmatpush3.bf16.msra.mxu1 %v3036_v2  ;;  %v3084_v2 = vld [vmem:[%s3974_s1 + $0x308] sm:$0xff]  }
  0x39   :  { %2728 = vmatprep.subr.bf16.mxu1 %v3039_v5  ;;  %v3087_v5 = vld [vmem:[%s3974_s1 + $0x350] sm:$0xff]  }
  0x3a   :  { %2707 = vmatpush3.bf16.msra.mxu0 %v3038_v4  ;;  %v3086_v4 = vld [vmem:[%s3974_s1 + $0x290] sm:$0xff]  }
  0x3b   :  { %2708 = vmatprep.subr.bf16.mxu0 %v3041_v7  ;;  %v3089_v7 = vld [vmem:[%s3974_s1 + $0x2d8] sm:$0xff]  }
  0x3c   :  { %2729 = vmatpush3.bf16.msra.mxu1 %v3040_v6  ;;  %v3088_v6 = vld [vmem:[%s3974_s1 + $0x310] sm:$0xff]  }
  0x3d   :  { %2730 = vmatprep.subr.bf16.mxu1 %v3043_v9  ;;  %v3091_v9 = vld [vmem:[%s3974_s1 + $0x358] sm:$0xff]  }
  0x3e   :  { %2709 = vmatpush3.bf16.msra.mxu0 %v3042_v8  ;;  %v3090_v8 = vld [vmem:[%s3974_s1 + $0x298] sm:$0xff]  }
  0x3f   :  { %2738 = vmatprep.subr.bf16.mxu0 %v3045_v11  ;;  %v3093_v11 = vld [vmem:[%s3974_s1 + $0x2e0] sm:$0xff]  }
  0x40   :  { %2731 = vmatpush3.bf16.msra.mxu1 %v3044_v10  ;;  %v3092_v10 = vld [vmem:[%s3974_s1 + $0x318] sm:$0xff]  }
  0x41   :  { %1993 = vmatmul.mubr.bf16.vlgmr.msra.gmra.mrb[4].mxu0 %v579_v13  ;;  %2760 = vmatprep.subr.bf16.mxu1 %v3047_v14  ;;  %v3095_v13 = vld [vmem:[%s3974_s1 + $0x360] sm:$0xff]  }
  0x42   :  { %2739 = vmatpush3.bf16.msra.mxu0 %v3046_v12  ;;  %2072 = vmatprep.mubr.bf16.mxu0 %v582_v16  ;;  %v3094_v12 = vld [vmem:[%s3974_s1 + $0x2a0] sm:$0xff]   ;;  %v3098_v16 = vld [vmem:[%s3974_s1 + $0x2a8] sm:$0xff]  }
  0x43   :  { %2033 = vmatmul.mubr.bf16.vlgmr.msra.gmra.mrb[4].mxu1 %v3451_v17  ;;  %2740 = vmatprep.subr.bf16.mxu0 %v3049_v18  ;;  %v3096_v14 = vld [vmem:[%s3974_s1 + $0x320] sm:$0xff]   ;;  %v3099_v17 = vld [vmem:[%s3974_s1 + $0x368] sm:$0xff]  }
  0x44   :  { %2761 = vmatpush3.bf16.msra.mxu1 %v3048_v15  ;;  %2112 = vmatprep.mubr.bf16.mxu1 %v620_v56  ;;  %v3097_v15 = vld [vmem:[%s3974_s1 + $0x2e8] sm:$0xff]   ;;  %v3135_v56 = vld [vmem:[%s3974_s1 + $0x3b0] sm:$0xff]  }
  0x45   :  { %2762 = vmatprep.subr.bf16.mxu1 %v3051_v20  ;;  %v3100_v18 = vld [vmem:[%s3974_s1 + $0x328] sm:$0xff]   ;;  %v3102_v20 = vld [vmem:[%s3974_s1 + $0x2b0] sm:$0xff]  }
  0x46   :  { %2741 = vmatpush3.bf16.msra.mxu0 %v3050_v19  ;;  %v3101_v19 = vld [vmem:[%s3974_s1 + $0x2f0] sm:$0xff]  }
  0x47   :  { %2742 = vmatprep.subr.bf16.mxu0 %v3053_v22  ;;  %v3104_v22 = vld [vmem:[%s3974_s1 + $0x330] sm:$0xff]  }
  0x48   :  { %2763 = vmatpush3.bf16.msra.mxu1 %v3052_v21  ;;  %v3103_v21 = vld [vmem:[%s3974_s1 + $0x370] sm:$0xff]  }
  0x49   :  { %2764 = vmatprep.subr.bf16.mxu1 %v3055_v24  ;;  %v3106_v24 = vld [vmem:[%s3974_s1 + $0x2b8] sm:$0xff]  }
  0x4a   :  { %2743 = vmatpush3.bf16.msra.mxu0 %v3054_v23  ;;  %v3105_v23 = vld [vmem:[%s3974_s1 + $0x2f8] sm:$0xff]  }
  0x4b   :  { %2744 = vmatprep.subr.bf16.mxu0 %v3057_v27  ;;  %v3108_v27 = vld [vmem:[%s3974_s1 + $0x338] sm:$0xff]  }
  0x4c   :  { %2765 = vmatpush3.bf16.msra.mxu1 %v3056_v26  ;;  %v3107_v26 = vld [vmem:[%s3974_s1 + $0x378] sm:$0xff]  }
  0x4d   :  { %2766 = vmatprep.subr.bf16.mxu1 %v3059_v29  ;;  %v3111_v29 = vld [vmem:[%s3974_s1 + $0x380] sm:$0xff]  }
  0x4e   :  { %2745 = vmatpush3.bf16.msra.mxu0 %v3058_v28  ;;  %v3109_v28 = vld [vmem:[%s3974_s1 + $0x3c0] sm:$0xff]  }
  0x4f   :  { %2746 = vmatprep.subr.bf16.mxu0 %v3061_v31  ;;  %v3112_v31 = vld [vmem:[%s3974_s1 + $0x440] sm:$0xff]  }
  0x50   :  { %2767 = vmatpush3.bf16.msra.mxu1 %v3060_v30  ;;  %v628_v30 = vcombine.high %v3563_v59, %v3563_v59 }
  0x51   :  { %2768 = vmatprep.subr.bf16.mxu1 %v3063_v33  ;;  %v631_v33 = vcombine.high %v3572_v63, %v3572_v63 }
  0x52   :  { %2747 = vmatpush3.bf16.msra.mxu0 %v3062_v32  ;;  %v3113_v32 = vld [vmem:[%s3974_s1 + $0x400] sm:$0xff]  }
  0x53   :  { %2748 = vmatprep.subr.bf16.mxu0 %v3065_v35  ;;  %v3114_v35 = vld [vmem:[%s3974_s1 + $0x3c8] sm:$0xff]  }
  0x54   :  { %2769 = vmatpush3.bf16.msra.mxu1 %v3064_v34  ;;  %v3672_v34 = vrot.slane %v3549_v53, %v3297_v25  ;;  %v3132_v53 = vld [vmem:[%s3974_s1 + $0x468] sm:$0xff]  }
  0x55   :  { %2770 = vmatprep.subr.bf16.mxu1 %v3067_v37  ;;  %v3116_v37 = vld [vmem:[%s3974_s1 + $0x448] sm:$0xff]  }
  0x56   :  { %2749 = vmatpush3.bf16.msra.mxu0 %v3066_v36  ;;  %v3115_v36 = vld [vmem:[%s3974_s1 + $0x388] sm:$0xff]  }
  0x57   :  { %2750 = vmatprep.subr.bf16.mxu0 %v3069_v39  ;;  %v3118_v39 = vld [vmem:[%s3974_s1 + $0x3d0] sm:$0xff]  }
  0x58   :  { %2771 = vmatpush3.bf16.msra.mxu1 %v3068_v38  ;;  %v3117_v38 = vld [vmem:[%s3974_s1 + $0x408] sm:$0xff]  }
  0x59   :  { %2772 = vmatprep.subr.bf16.mxu1 %v3071_v41  ;;  %v3120_v41 = vld [vmem:[%s3974_s1 + $0x450] sm:$0xff]  }
  0x5a   :  { %2751 = vmatpush3.bf16.msra.mxu0 %v3070_v40  ;;  %v3119_v40 = vld [vmem:[%s3974_s1 + $0x390] sm:$0xff]  }
  0x5b   :  { %2752 = vmatprep.subr.bf16.mxu0 %v3073_v43  ;;  %v3122_v43 = vld [vmem:[%s3974_s1 + $0x3d8] sm:$0xff]  }
  0x5c   :  { %2773 = vmatpush3.bf16.msra.mxu1 %v3072_v42  ;;  %v3121_v42 = vld [vmem:[%s3974_s1 + $0x410] sm:$0xff]  }
  0x5d   :  { %2774 = vmatprep.subr.bf16.mxu1 %v3075_v45  ;;  %v3124_v45 = vld [vmem:[%s3974_s1 + $0x458] sm:$0xff]  }
  0x5e   :  { %2753 = vmatpush3.bf16.msra.mxu0 %v3074_v44  ;;  %v3123_v44 = vld [vmem:[%s3974_s1 + $0x398] sm:$0xff]  }
  0x5f   :  { %2782 = vmatprep.subr.bf16.mxu0 %v3077_v50  ;;  %v3129_v50 = vld [vmem:[%s3974_s1 + $0x420] sm:$0xff]  }
  0x60   :  { %2775 = vmatpush3.bf16.msra.mxu1 %v3076_v47  ;;  %v3126_v47 = vld [vmem:[%s3974_s1 + $0x3e0] sm:$0xff]  }
  0x61   :  { %2073 = vmatmul.mubr.bf16.vlgmr.msra.gmra.mrb[8].mxu0 %v580_v54  ;;  %2804 = vmatprep.subr.bf16.mxu1 %v3079_v55  ;;  %v3133_v54 = vld [vmem:[%s3974_s1 + $0x428] sm:$0xff]   ;;  %v3134_v55 = vld [vmem:[%s3974_s1 + $0x3f0] sm:$0xff]  }
  0x62   :  { %2783 = vmatpush3.bf16.msra.mxu0 %v3078_v52  ;;  %2152 = vmatprep.mubr.bf16.mxu0 %v630_v62  ;;  %v3131_v52 = vld [vmem:[%s3974_s1 + $0x3a8] sm:$0xff]   ;;  %v23_v62 = vld [vmem:[%s3975_s0 + $0x10] sm:$0xff] }
  0x63   :  { %2113 = vmatmul.mubr.bf16.vlgmr.msra.gmra.mrb[8].mxu1 %v3563_v59  ;;  %2784 = vmatprep.subr.bf16.mxu0 %v3081_v60  ;;  %v3138_v59 = vld [vmem:[%s3974_s1 + $0x3f8] sm:$0xff]  }
  0x64   :  { %2805 = vmatpush3.bf16.msra.mxu1 %v3080_v57  ;;  %2192 = vmatprep.mubr.bf16.mxu1 %v3572_v63  ;;  %v3136_v57 = vld [vmem:[%s3974_s1 + $0x470] sm:$0xff]   ;;  %v3139_v60 = vld [vmem:[%s3974_s1 + $0x3b8] sm:$0xff]   ;;  %v3142_v63 = vld [vmem:[%s3974_s1 + $0x4c0] sm:$0xff]  }
  0x65   :  { %2806 = vmatprep.subr.bf16.mxu1 %v3083_v1  ;;  %v639_v1 = vrot.slane %v23_v62, %v3297_v25 }
  0x66   :  { %2785 = vmatpush3.bf16.msra.mxu0 %v3082_v61  ;;  %v3140_v61 = vld [vmem:[%s3974_s1 + $0x478] sm:$0xff]  }
  0x67   :  { %2786 = vmatprep.subr.bf16.mxu0 %v3085_v3  ;;  %v3141_v3 = vld [vmem:[%s3974_s1 + $0x438] sm:$0xff]  }
  0x68   :  { %2807 = vmatpush3.bf16.msra.mxu1 %v3084_v2  ;;  %v632_v2 = vcombine.high %v23_v62, %v23_v62  ;;  %v3189_v62 = vld [vmem:[%s3974_s1 + $0x620] sm:$0xff]  }
  0x69   :  { %2808 = vmatprep.subr.bf16.mxu1 %v3087_v5  ;;  %v647_v5 = vcombine.high %v639_v1, %v639_v1 }
  0x6a   :  { %2787 = vmatpush3.bf16.msra.mxu0 %v3086_v4  ;;  %v629_v4 = vcombine.high %v3672_v34, %v3672_v34 }
  0x6b   :  { %2788 = vmatprep.subr.bf16.mxu0 %v3089_v7  ;;  %v3772_v7 = vrot.slane %v632_v2, %v3297_v25  ;;  %v3192_v2 = vld [vmem:[%s3974_s1 + $0x628] sm:$0xff]  }
  0x6c   :  { %2809 = vmatpush3.bf16.msra.mxu1 %v3088_v6  ;;  %v3143_v6 = vld [vmem:[%s3974_s1 + $0x480] sm:$0xff]  }
  0x6d   :  { %2810 = vmatprep.subr.bf16.mxu1 %v3091_v9  ;;  %v669_v9 = vrot.slane %v647_v5, %v3297_v25  ;;  %v3195_v5 = vld [vmem:[%s3974_s1 + $0x630] sm:$0xff]  }
  0x6e   :  { %2789 = vmatpush3.bf16.msra.mxu0 %v3090_v8  ;;  %v3144_v8 = vld [vmem:[%s3974_s1 + $0x540] sm:$0xff]  }
  0x6f   :  { %2790 = vmatprep.subr.bf16.mxu0 %v3093_v11  ;;  %v3146_v11 = vld [vmem:[%s3974_s1 + $0x4c8] sm:$0xff]  }
  0x70   :  { %2811 = vmatpush3.bf16.msra.mxu1 %v3092_v10  ;;  %v3779_v10 = vrot.slane %v639_v1, %v3297_v25  ;;  %v3193_v1 = vld [vmem:[%s3974_s1 + $0x5f0] sm:$0xff]  }
  0x71   :  { %2812 = vmatprep.subr.bf16.mxu1 %v3095_v13  ;;  %v3145_v13 = vld [vmem:[%s3974_s1 + $0x500] sm:$0xff]  }
  0x72   :  { %2791 = vmatpush3.bf16.msra.mxu0 %v3094_v12  ;;  %v648_v12 = vcombine.high %v3772_v7, %v3772_v7 }
  0x73   :  { %2792 = vmatprep.subr.bf16.mxu0 %v3097_v15  ;;  %v679_v15 = vcombine.high %v669_v9, %v669_v9 }
  0x74   :  { %2813 = vmatpush3.bf16.msra.mxu1 %v3096_v14  ;;  %v3148_v14 = vld [vmem:[%s3974_s1 + $0x548] sm:$0xff]  }
  0x75   :  { %2814 = vmatprep.subr.bf16.mxu1 %v3099_v17  ;;  %v3147_v17 = vld [vmem:[%s3974_s1 + $0x488] sm:$0xff]  }
  0x76   :  { %2793 = vmatpush3.bf16.msra.mxu0 %v3098_v16  ;;  %v3793_v16 = vrot.slane %v648_v12, %v3297_v25 }
  0x77   :  { %2794 = vmatprep.subr.bf16.mxu0 %v3101_v19  ;;  %v3149_v19 = vld [vmem:[%s3974_s1 + $0x508] sm:$0xff]  }
  0x78   :  { %2815 = vmatpush3.bf16.msra.mxu1 %v3100_v18  ;;  %v3150_v18 = vld [vmem:[%s3974_s1 + $0x4d0] sm:$0xff]  }
  0x79   :  { %2816 = vmatprep.subr.bf16.mxu1 %v3103_v21  ;;  %v3151_v21 = vld [vmem:[%s3974_s1 + $0x490] sm:$0xff]  }
  0x7a   :  { %2795 = vmatpush3.bf16.msra.mxu0 %v3102_v20  ;;  %v3152_v20 = vld [vmem:[%s3974_s1 + $0x550] sm:$0xff]  }
  0x7b   :  { %2796 = vmatprep.subr.bf16.mxu0 %v3105_v23  ;;  %v3153_v23 = vld [vmem:[%s3974_s1 + $0x510] sm:$0xff]  }
  0x7c   :  { %2817 = vmatpush3.bf16.msra.mxu1 %v3104_v22  ;;  %v3154_v22 = vld [vmem:[%s3974_s1 + $0x4d8] sm:$0xff]  }
  0x7d   :  { %2818 = vmatprep.subr.bf16.mxu1 %v3107_v26  ;;  %v3155_v26 = vld [vmem:[%s3974_s1 + $0x498] sm:$0xff]  }
  0x7e   :  { %2797 = vmatpush3.bf16.msra.mxu0 %v3106_v24  ;;  %v3156_v24 = vld [vmem:[%s3974_s1 + $0x558] sm:$0xff]  }
  0x7f   :  { %2826 = vmatprep.subr.bf16.mxu0 %v3109_v28  ;;  %v3157_v28 = vld [vmem:[%s3974_s1 + $0x518] sm:$0xff]  }
  0x80   :  { %2819 = vmatpush3.bf16.msra.mxu1 %v3108_v27  ;;  %v3158_v27 = vld [vmem:[%s3974_s1 + $0x4e0] sm:$0xff]  }
  0x81   :  { %2153 = vmatmul.mubr.bf16.vlgmr.msra.gmra.mrb[12].mxu0 %v628_v30  ;;  %2848 = vmatprep.subr.bf16.mxu1 %v3112_v31  ;;  %v3159_v30 = vld [vmem:[%s3974_s1 + $0x4a0] sm:$0xff]   ;;  %v3162_v31 = vld [vmem:[%s3974_s1 + $0x4e8] sm:$0xff]  }
  0x82   :  { %2827 = vmatpush3.bf16.msra.mxu0 %v3111_v29  ;;  %2232 = vmatprep.mubr.bf16.mxu0 %v631_v33  ;;  %v3160_v29 = vld [vmem:[%s3974_s1 + $0x560] sm:$0xff]   ;;  %v3164_v33 = vld [vmem:[%s3974_s1 + $0x568] sm:$0xff]  }
  0x83   :  { %2193 = vmatmul.mubr.bf16.vlgmr.msra.gmra.mrb[12].mxu1 %v3672_v34  ;;  %2828 = vmatprep.subr.bf16.mxu0 %v3114_v35  ;;  %v3163_v34 = vld [vmem:[%s3974_s1 + $0x4a8] sm:$0xff]   ;;  %v3166_v35 = vld [vmem:[%s3974_s1 + $0x4f0] sm:$0xff]  }
  0x84   :  { %2849 = vmatpush3.bf16.msra.mxu1 %v3113_v32  ;;  %2272 = vmatprep.mubr.bf16.mxu1 %v669_v9  ;;  %v3161_v32 = vld [vmem:[%s3974_s1 + $0x520] sm:$0xff]  }
  0x85   :  { %2850 = vmatprep.subr.bf16.mxu1 %v3116_v37  ;;  %v3168_v37 = vld [vmem:[%s3974_s1 + $0x570] sm:$0xff]  }
  0x86   :  { %2829 = vmatpush3.bf16.msra.mxu0 %v3115_v36  ;;  %v3165_v36 = vld [vmem:[%s3974_s1 + $0x528] sm:$0xff]  }
  0x87   :  { %2830 = vmatprep.subr.bf16.mxu0 %v3118_v39  ;;  %v3170_v39 = vld [vmem:[%s3974_s1 + $0x4f8] sm:$0xff]  }
  0x88   :  { %2851 = vmatpush3.bf16.msra.mxu1 %v3117_v38  ;;  %v3167_v38 = vld [vmem:[%s3974_s1 + $0x4b0] sm:$0xff]  }
  0x89   :  { %2852 = vmatprep.subr.bf16.mxu1 %v3120_v41  ;;  %v3172_v41 = vld [vmem:[%s3974_s1 + $0x578] sm:$0xff]  }
  0x8a   :  { %2831 = vmatpush3.bf16.msra.mxu0 %v3119_v40  ;;  %v3169_v40 = vld [vmem:[%s3974_s1 + $0x530] sm:$0xff]  }
  0x8b   :  { %2832 = vmatprep.subr.bf16.mxu0 %v3122_v43  ;;  %v3174_v43 = vld [vmem:[%s3974_s1 + $0x5c0] sm:$0xff]  }
  0x8c   :  { %2853 = vmatpush3.bf16.msra.mxu1 %v3121_v42  ;;  %v3171_v42 = vld [vmem:[%s3974_s1 + $0x4b8] sm:$0xff]  }
  0x8d   :  { %2854 = vmatprep.subr.bf16.mxu1 %v3124_v45  ;;  %v677_v45 = vcombine.high %v3779_v10, %v3779_v10 }
  0x8e   :  { %2833 = vmatpush3.bf16.msra.mxu0 %v3123_v44  ;;  %v3173_v44 = vld [vmem:[%s3974_s1 + $0x538] sm:$0xff]  }
  0x8f   :  { %2834 = vmatprep.subr.bf16.mxu0 %v3126_v47  ;;  %v680_v47 = vcombine.high %v3793_v16, %v3793_v16 }
  0x90   :  { %2855 = vmatpush3.bf16.msra.mxu1 %v3125_v46  ;;  %v3176_v46 = vld [vmem:[%s3974_s1 + $0x580] sm:$0xff]  }
  0x91   :  { %2856 = vmatprep.subr.bf16.mxu1 %v3128_v49  ;;  %v3178_v49 = vld [vmem:[%s3974_s1 + $0x5c8] sm:$0xff]  }
  0x92   :  { %2835 = vmatpush3.bf16.msra.mxu0 %v3127_v48  ;;  %v662_v48 = vrot.slane %v3772_v7, %v3297_v25  ;;  %v3198_v7 = vld [vmem:[%s3974_s1 + $0x638] sm:$0xff]  }
  0x93   :  { %2836 = vmatprep.subr.bf16.mxu0 %v3130_v51  ;;  %v3179_v51 = vld [vmem:[%s3974_s1 + $0x588] sm:$0xff]  }
  0x94   :  { %2857 = vmatpush3.bf16.msra.mxu1 %v3129_v50  ;;  %v3177_v50 = vld [vmem:[%s3974_s1 + $0x600] sm:$0xff]   ;;  %v678_v9 = vcombine.high %v662_v48, %v662_v48 }
  0x95   :  { %2858 = vmatprep.subr.bf16.mxu1 %v3132_v53  ;;  %v3180_v53 = vld [vmem:[%s3974_s1 + $0x608] sm:$0xff]  }
  0x96   :  { %2837 = vmatpush3.bf16.msra.mxu0 %v3131_v52  ;;  %v3181_v52 = vld [vmem:[%s3974_s1 + $0x5d0] sm:$0xff]  }
  0x97   :  { %2838 = vmatprep.subr.bf16.mxu0 %v3134_v55  ;;  %v3184_v55 = vld [vmem:[%s3974_s1 + $0x5d8] sm:$0xff]  }
  0x98   :  { %2859 = vmatpush3.bf16.msra.mxu1 %v3133_v54  ;;  %v3182_v54 = vld [vmem:[%s3974_s1 + $0x590] sm:$0xff]  }
  0x99   :  { %2860 = vmatprep.subr.bf16.mxu1 %v3136_v57  ;;  %v3185_v57 = vld [vmem:[%s3974_s1 + $0x598] sm:$0xff]  }
  0x9a   :  { %2839 = vmatpush3.bf16.msra.mxu0 %v3135_v56  ;;  %v3183_v56 = vld [vmem:[%s3974_s1 + $0x610] sm:$0xff]  }
  0x9b   :  { %2840 = vmatprep.subr.bf16.mxu0 %v3138_v59  ;;  %v3186_v59 = vld [vmem:[%s3974_s1 + $0x618] sm:$0xff]  }
  0x9c   :  { %2861 = vmatpush3.bf16.msra.mxu1 %v3137_v58  ;;  %v3187_v58 = vld [vmem:[%s3974_s1 + $0x5e0] sm:$0xff]  }
  0x9d   :  { %2862 = vmatprep.subr.bf16.mxu1 %v3140_v61  ;;  %v3190_v61 = vld [vmem:[%s3974_s1 + $0x5e8] sm:$0xff]  }
  0x9e   :  { %2841 = vmatpush3.bf16.msra.mxu0 %v3139_v60  ;;  %v3188_v60 = vld [vmem:[%s3974_s1 + $0x5a0] sm:$0xff]  }
  0x9f   :  { %2870 = vmatprep.subr.bf16.mxu0 %v3142_v63  ;;  %v3191_v63 = vld [vmem:[%s3974_s1 + $0x5a8] sm:$0xff]  }
  0xa0   :  { %2863 = vmatpush3.bf16.msra.mxu1 %v3141_v3  ;;  %v3194_v3 = vld [vmem:[%s3974_s1 + $0x5b0] sm:$0xff]  }
  0xa1   :  { %2233 = vmatmul.mubr.bf16.vlgmr.msra.gmra.mrb[16].mxu0 %v629_v4  ;;  %2892 = vmatprep.subr.bf16.mxu1 %v3144_v8  ;;  %v3196_v4 = vld [vmem:[%s3974_s1 + $0x5f8] sm:$0xff]  }
  0xa2   :  { %2871 = vmatpush3.bf16.msra.mxu0 %v3143_v6  ;;  %2312 = vmatprep.mubr.bf16.mxu0 %v679_v15  ;;  %v3197_v6 = vld [vmem:[%s3974_s1 + $0x5b8] sm:$0xff]  }
  0xa3   :  { %2273 = vmatmul.mubr.bf16.vlgmr.msra.gmra.mrb[16].mxu1 %v3779_v10  ;;  %2872 = vmatprep.subr.bf16.mxu0 %v3146_v11  ;;  %v2461_v8 = vld.sshfl [vmem:[%s3975_s0 + $0x18] sm:$0x1 pattern:$0x75316420] }
  0xa4   :  { %2893 = vmatpush3.bf16.msra.mxu1 %v3145_v13  ;;  %2352 = vmatprep.mubr.bf16.mxu1 %v3793_v16  ;;  %v694_v10 = vrot.slane %v2461_v8, %v3297_v25 }
  0xa5   :  { %2894 = vmatprep.subr.bf16.mxu1 %v3148_v14 }
  0xa6   :  { %2873 = vmatpush3.bf16.msra.mxu0 %v3147_v17 }
  0xa7   :  { %2874 = vmatprep.subr.bf16.mxu0 %v3150_v18 }
  0xa8   :  { %2895 = vmatpush3.bf16.msra.mxu1 %v3149_v19 }
  0xa9   :  { %2896 = vmatprep.subr.bf16.mxu1 %v3152_v20 }
  0xaa   :  { %2875 = vmatpush3.bf16.msra.mxu0 %v3151_v21 }
  0xab   :  { %2876 = vmatprep.subr.bf16.mxu0 %v3154_v22 }
  0xac   :  { %2897 = vmatpush3.bf16.msra.mxu1 %v3153_v23 }
  0xad   :  { %2898 = vmatprep.subr.bf16.mxu1 %v3156_v24 }
  0xae   :  { %2877 = vmatpush3.bf16.msra.mxu0 %v3155_v26 }
  0xaf   :  { %2878 = vmatprep.subr.bf16.mxu0 %v3158_v27 }
  0xb0   :  { %2899 = vmatpush3.bf16.msra.mxu1 %v3157_v28 }
  0xb1   :  { %2900 = vmatprep.subr.bf16.mxu1 %v3160_v29 }
  0xb2   :  { %2879 = vmatpush3.bf16.msra.mxu0 %v3159_v30 }
  0xb3   :  { %2880 = vmatprep.subr.bf16.mxu0 %v3162_v31 }
  0xb4   :  { %2901 = vmatpush3.bf16.msra.mxu1 %v3161_v32 }
  0xb5   :  { %2902 = vmatprep.subr.bf16.mxu1 %v3164_v33 }
  0xb6   :  { %2881 = vmatpush3.bf16.msra.mxu0 %v3163_v34 }
  0xb7   :  { %2882 = vmatprep.subr.bf16.mxu0 %v3166_v35 }
  0xb8   :  { %2903 = vmatpush3.bf16.msra.mxu1 %v3165_v36 }
  0xb9   :  { %2904 = vmatprep.subr.bf16.mxu1 %v3168_v37 }
  0xba   :  { %2883 = vmatpush3.bf16.msra.mxu0 %v3167_v38 }
  0xbb   :  { %2884 = vmatprep.subr.bf16.mxu0 %v3170_v39 }
  0xbc   :  { %2905 = vmatpush3.bf16.msra.mxu1 %v3169_v40 }
  0xbd   :  { %2906 = vmatprep.subr.bf16.mxu1 %v3172_v41 }
  0xbe   :  { %2885 = vmatpush3.bf16.msra.mxu0 %v3171_v42 }
  0xbf   :  { %2914 = vmatprep.subr.bf16.mxu0 %v3174_v43 }
  0xc0   :  { %2907 = vmatpush3.bf16.msra.mxu1 %v3173_v44 }
  0xc1   :  { %2313 = vmatmul.mubr.bf16.vlgmr.msra.gmra.mrb[20].mxu0 %v677_v45  ;;  %2965 = vmatprep.subr.bf16.mxu1 %v3199_v0 }
  0xc2   :  { %2915 = vmatpush3.bf16.msra.mxu0 %v3176_v46  ;;  %2392 = vmatprep.mubr.bf16.mxu0 %v680_v47 }
  0xc3   :  { %2353 = vmatmul.mubr.bf16.vlgmr.msra.gmra.mrb[20].mxu1 %v662_v48  ;;  %2916 = vmatprep.subr.bf16.mxu0 %v3178_v49 }
  0xc4   :  { %2966 = vmatpush3.bf16.msra.mxu1 %v3177_v50  ;;  %2981 = vmatprep.mubr.msk.bf16.mxu1 %vm3200_vm0, %v3199_v0 }
  0xc5   :  { %2967 = vmatprep.subr.bf16.mxu1 %v3199_v0 }
  0xc6   :  { %2917 = vmatpush3.bf16.msra.mxu0 %v3179_v51 }
  0xc7   :  { %2918 = vmatprep.subr.bf16.mxu0 %v3181_v52 }
  0xc8   :  { %2968 = vmatpush3.bf16.msra.mxu1 %v3180_v53 }
  0xc9   :  { %2969 = vmatprep.subr.bf16.mxu1 %v3199_v0 }
  0xca   :  { %2919 = vmatpush3.bf16.msra.mxu0 %v3182_v54 }
  0xcb   :  { %2920 = vmatprep.subr.bf16.mxu0 %v3184_v55 }
  0xcc   :  { %2970 = vmatpush3.bf16.msra.mxu1 %v3183_v56 }
  0xcd   :  { %2971 = vmatprep.subr.bf16.mxu1 %v3199_v0 }
  0xce   :  { %2921 = vmatpush3.bf16.msra.mxu0 %v3185_v57 }
  0xcf   :  { %2922 = vmatprep.subr.bf16.mxu0 %v3187_v58 }
  0xd0   :  { %2972 = vmatpush3.bf16.msra.mxu1 %v3186_v59 }
  0xd1   :  { %2973 = vmatprep.subr.bf16.mxu1 %v3199_v0 }
  0xd2   :  { %2923 = vmatpush3.bf16.msra.mxu0 %v3188_v60 }
  0xd3   :  { %2924 = vmatprep.subr.bf16.mxu0 %v3190_v61 }
  0xd4   :  { %2974 = vmatpush3.bf16.msra.mxu1 %v3189_v62 }
  0xd5   :  { %2975 = vmatprep.subr.bf16.mxu1 %v3199_v0 }
  0xd6   :  { %2925 = vmatpush3.bf16.msra.mxu0 %v3191_v63 }
  0xd7   :  { %2926 = vmatprep.subr.bf16.mxu0 %v3193_v1 }
  0xd8   :  { %2976 = vmatpush3.bf16.msra.mxu1 %v3192_v2 }
  0xd9   :  { %2977 = vmatprep.subr.bf16.mxu1 %v3199_v0 }
  0xda   :  { %2927 = vmatpush3.bf16.msra.mxu0 %v3194_v3 }
  0xdb   :  { %2928 = vmatprep.subr.bf16.mxu0 %v3196_v4 }
  0xdc   :  { %2978 = vmatpush3.bf16.msra.mxu1 %v3195_v5 }
  0xdd   :  { %2979 = vmatprep.subr.bf16.mxu1 %v3199_v0 }
  0xde   :  { %2929 = vmatpush3.bf16.msra.mxu0 %v3197_v6 }
  0xe0   :  { %2980 = vmatpush3.bf16.msra.mxu1 %v3198_v7 }
  0xe1   :  { %2393 = vmatmul.mubr.bf16.vlgmr.msra.gmra.mrb[24].mxu0 %v678_v9 }
  0xe3   :  { %2982 = vmatmul.mubr.bf16.vlgmr.msra.gmra.mrb[24].mxu1 %v694_v10 }
  0xf4   :  { %v524_v11 = vpop.f32.mrb[0].mxu0 }
  0xf5   :  { %v2963_v12 = vpop.f32.mrb[1].mxu0 }
  0xf6   :  { %v2688_v13 = vpop.f32.mrb[0].mxu1  ;;  %v527_v14 = vpop.f32.mrb[2].mxu0 }
  0xf7   :  { %v2689_v15 = vpop.f32.mrb[1].mxu1  ;;  %v2964_v16 = vpop.f32.mrb[3].mxu0 }
  0xf8   :  { %v2690_v17 = vadd.f32 %v2689_v15, %v2688_v13  ;;  %v2691_v18 = vpop.f32.mrb[2].mxu1 }
  0xf9   :  { %v2692_v19 = vpop.f32.mrb[3].mxu1 }
  0xfa   :  { %v1955_v20 = vadd.f32 %v2690_v17, %v524_v11 }
 0x114   :  { %v2710_v21 = vpop.f32.mrb[4].mxu0 }
 0x115   :  { %v2711_v22 = vpop.f32.mrb[5].mxu0 }
 0x116   :  { %v2712_v0 = vadd.f32 %v2711_v22, %v2710_v21  ;;  %v2713_v23 = vpop.f32.mrb[6].mxu0  ;;  %v2732_v24 = vpop.f32.mrb[4].mxu1 }
 0x117   :  { %v2714_v26 = vpop.f32.mrb[7].mxu0  ;;  %v2733_v25 = vpop.f32.mrb[5].mxu1 }
 0x118   :  { %v1995_v27 = vadd.f32 %v2712_v0, %v1955_v20  ;;  %v2734_v28 = vadd.f32 %v2733_v25, %v2732_v24  ;;  %v2735_v29 = vpop.f32.mrb[6].mxu1  ;;  %v2662_v26 = vld [vmem:[%s3977_s4] ss:$0 sm:$0xff] }
 0x119   :  { %v2736_v30 = vpop.f32.mrb[7].mxu1 }
 0x11a   :  { %v2035_v31 = vadd.f32 %v2734_v28, %v1995_v27 }
 0x134   :  { %v2754_v32 = vpop.f32.mrb[8].mxu0 }
 0x135   :  { %v2755_v33 = vpop.f32.mrb[9].mxu0 }
 0x136   :  { %v2756_v34 = vadd.f32 %v2755_v33, %v2754_v32  ;;  %v2757_v35 = vpop.f32.mrb[10].mxu0  ;;  %v2776_v36 = vpop.f32.mrb[8].mxu1 }
 0x137   :  { %v2758_v37 = vpop.f32.mrb[11].mxu0  ;;  %v2777_v38 = vpop.f32.mrb[9].mxu1 }
 0x138   :  { %v2075_v39 = vadd.f32 %v2756_v34, %v2035_v31  ;;  %v2778_v40 = vadd.f32 %v2777_v38, %v2776_v36  ;;  %v2779_v41 = vpop.f32.mrb[10].mxu1 }
 0x139   :  { %v2780_v42 = vpop.f32.mrb[11].mxu1 }
 0x13a   :  { %v2115_v43 = vadd.f32 %v2778_v40, %v2075_v39 }
 0x154   :  { %v2798_v44 = vpop.f32.mrb[12].mxu0 }
 0x155   :  { %v2799_v45 = vpop.f32.mrb[13].mxu0 }
 0x156   :  { %v2800_v46 = vadd.f32 %v2799_v45, %v2798_v44  ;;  %v2801_v47 = vpop.f32.mrb[14].mxu0  ;;  %v2820_v48 = vpop.f32.mrb[12].mxu1 }
 0x157   :  { %v2802_v49 = vpop.f32.mrb[15].mxu0  ;;  %v2821_v50 = vpop.f32.mrb[13].mxu1 }
 0x158   :  { %v2155_v51 = vadd.f32 %v2800_v46, %v2115_v43  ;;  %v2822_v52 = vadd.f32 %v2821_v50, %v2820_v48  ;;  %v2823_v53 = vpop.f32.mrb[14].mxu1 }
 0x159   :  { %v2824_v54 = vpop.f32.mrb[15].mxu1 }
 0x15a   :  { %v2195_v55 = vadd.f32 %v2822_v52, %v2155_v51 }
 0x174   :  { %v2842_v56 = vpop.f32.mrb[16].mxu0 }
 0x175   :  { %v2843_v57 = vpop.f32.mrb[17].mxu0 }
 0x176   :  { %v2844_v58 = vadd.f32 %v2843_v57, %v2842_v56  ;;  %v2845_v59 = vpop.f32.mrb[18].mxu0  ;;  %v2864_v60 = vpop.f32.mrb[16].mxu1 }
 0x177   :  { %v2846_v61 = vpop.f32.mrb[19].mxu0  ;;  %v2865_v62 = vpop.f32.mrb[17].mxu1 }
 0x178   :  { %v2235_v63 = vadd.f32 %v2844_v58, %v2195_v55  ;;  %v2866_v1 = vadd.f32 %v2865_v62, %v2864_v60  ;;  %v2867_v2 = vpop.f32.mrb[18].mxu1 }
 0x179   :  { %v2868_v3 = vpop.f32.mrb[19].mxu1 }
 0x17a   :  { %v2275_v4 = vadd.f32 %v2866_v1, %v2235_v63 }
 0x194   :  { %v2886_v5 = vpop.f32.mrb[20].mxu0 }
 0x195   :  { %v2887_v6 = vpop.f32.mrb[21].mxu0 }
 0x196   :  { %v2888_v7 = vadd.f32 %v2887_v6, %v2886_v5  ;;  %v2889_v8 = vpop.f32.mrb[22].mxu0  ;;  %v2908_v9 = vpop.f32.mrb[20].mxu1 }
 0x197   :  { %v2890_v10 = vpop.f32.mrb[23].mxu0  ;;  %v2909_v11 = vpop.f32.mrb[21].mxu1 }
 0x198   :  { %v2315_v12 = vadd.f32 %v2888_v7, %v2275_v4  ;;  %v2910_v13 = vadd.f32 %v2909_v11, %v2908_v9  ;;  %v2911_v14 = vpop.f32.mrb[22].mxu1 }
 0x199   :  { %v2912_v15 = vpop.f32.mrb[23].mxu1 }
 0x19a   :  { %v2355_v16 = vadd.f32 %v2910_v13, %v2315_v12 }
 0x1b4   :  { %v2930_v17 = vpop.f32.mrb[24].mxu0 }
 0x1b5   :  { %v2931_v18 = vpop.f32.mrb[25].mxu0 }
 0x1b6   :  { %v2932_v19 = vadd.f32 %v2931_v18, %v2930_v17  ;;  %v2933_v20 = vpop.f32.mrb[26].mxu0  ;;  %v2434_v21 = vpop.f32.mrb[24].mxu1 }
 0x1b7   :  { %v2934_v22 = vpop.f32.mrb[27].mxu0  ;;  %v2983_v0 = vpop.f32.mrb[25].mxu1 }
 0x1b8   :  { %v2395_v23 = vadd.f32 %v2932_v19, %v2355_v16  ;;  %v2437_v24 = vpop.f32.mrb[26].mxu1 }
 0x1b9   :  { %v2984_v25 = vpop.f32.mrb[27].mxu1 }
 0x1ba   :  { %v2435_v27 = vadd.f32 %v2434_v21, %v2395_v23 }
 0x1bc   :  { %v2447_v28 = vadd.f32 %v2662_v26, %v2435_v27 }
 0x1be   :  { %2448 = vst [vmem:[%s3978_s5] sm:$0x3] %v2447_v28 }

</bundles_post_ra>
